<compile_context>
chip_gen: v6e
topology: v6e:2x2x1
jax: 0.10.0
libtpu: 0.0.40
codegen_flags: <defaults>
</compile_context>

<pallas_src>
import functools

import jax
import jax.numpy as jnp
from jax.experimental import pallas as pl
from jax.experimental.pallas import tpu as pltpu

LANE_TILE = 2048  # lane (M) tile for the large first conv; fits any VMEM limit


# ---------------------------------------------------------------------------
# Pallas kernels
# ---------------------------------------------------------------------------
def _conv_bias_act_kernel(w_ref, b_ref, p_ref, o_ref, *, act, slope):
    # (C_out, K) @ (K, TM_lanes) -> (C_out, TM_lanes), + bias (+ optional LeakyReLU)
    y = jnp.dot(w_ref[...], p_ref[...], preferred_element_type=jnp.float32)
    y = y + b_ref[...]                       # (C_out, 1) broadcast across lanes
    if act:
        y = jnp.where(y > 0, y, slope * y)
    o_ref[...] = y


def _conv_bn_act_kernel(w_ref, g_ref, b_ref, p_ref, o_ref, *, inv_m, slope, eps):
    # Fully fused conv (no bias) + train-mode BatchNorm + LeakyReLU.
    # Whole activation (C_out, M) stays in VMEM; stats reduce along the lane axis.
    y = jnp.dot(w_ref[...], p_ref[...], preferred_element_type=jnp.float32)
    mean = jnp.sum(y, axis=1, keepdims=True) * inv_m          # (C_out, 1)
    d = y - mean
    var = jnp.sum(d * d, axis=1, keepdims=True) * inv_m        # biased var (PyTorch train fwd)
    scale = g_ref[...] * jax.lax.rsqrt(var + eps)
    z = d * scale + b_ref[...]
    o_ref[...] = jnp.where(z > 0, z, slope * z)


def _tail_kernel(w_ref, g_ref, b_ref, p_ref, wf_ref, sel_ref, bf_ref, o_ref,
                 *, inv_m, slope, eps):
    # Block 4: conv (no bias) + BatchNorm(train) + LeakyReLU, fully in VMEM.
    y = jnp.dot(w_ref[...], p_ref[...], preferred_element_type=jnp.float32)
    mean = jnp.sum(y, axis=1, keepdims=True) * inv_m
    d = y - mean
    var = jnp.sum(d * d, axis=1, keepdims=True) * inv_m
    scale = g_ref[...] * jax.lax.rsqrt(var + eps)
    z = d * scale + b_ref[...]
    z = jnp.where(z > 0, z, slope * z)           # (C, N*16), lane order (n, h, w)
    # Final 4x4 VALID conv == full dot over (c,h,w) per sample:
    #   out[n] = bf + sum_{c,j} Wf2[c,j] * z[c, n*16 + j]
    prod = z * wf_ref[...]                        # weight pre-tiled per-sample along lanes
    colsum = jnp.sum(prod, axis=0, keepdims=True)            # (1, N*16)  sublane reduce
    o_ref[...] = jnp.dot(colsum, sel_ref[...],               # (1, N) per-sample lane-group sum
                         preferred_element_type=jnp.float32) + bf_ref[...]


# ---------------------------------------------------------------------------
# Pallas wrappers
# ---------------------------------------------------------------------------
def conv_bias_act(w_t, b, patches, *, act, slope=0.2, lane_tile=LANE_TILE):
    """y = leaky_relu(W_T @ patches + b).  Output shape (C_out, M), lane-dense."""
    C_out, K = w_t.shape
    M = patches.shape[1]
    if M % 128 != 0 or M <= lane_tile:
        tn, grid_n = M, 1                    # tiny / awkward M: single full block, no padding
    else:
        tn = lane_tile
        while M % tn != 0:                   # lane_tile is a pow2 multiple of 128 -> terminates
            tn //= 2
        grid_n = M // tn
    kernel = functools.partial(_conv_bias_act_kernel, act=act, slope=slope)
    return pl.pallas_call(
        kernel,
        out_shape=jax.ShapeDtypeStruct((C_out, M), jnp.float32),
        grid=(grid_n,),
        in_specs=[
            pl.BlockSpec((C_out, K), lambda i: (0, 0)),
            pl.BlockSpec((C_out, 1), lambda i: (0, 0)),
            pl.BlockSpec((K, tn), lambda i: (0, i)),
        ],
        out_specs=pl.BlockSpec((C_out, tn), lambda i: (0, i)),
        compiler_params=pltpu.CompilerParams(dimension_semantics=("parallel",)),
    )(w_t, b, patches)


def conv_bn_act(w_t, gamma, beta, patches, *, slope=0.2, eps=1e-5):
    """Fused conv + BatchNorm(train) + LeakyReLU in a single pallas_call (grid=(1,))."""
    C_out, K = w_t.shape
    M = patches.shape[1]
    kernel = functools.partial(_conv_bn_act_kernel, inv_m=1.0 / M, slope=slope, eps=eps)
    return pl.pallas_call(
        kernel,
        out_shape=jax.ShapeDtypeStruct((C_out, M), jnp.float32),
        grid=(1,),
        in_specs=[
            pl.BlockSpec((C_out, K), lambda i: (0, 0)),
            pl.BlockSpec((C_out, 1), lambda i: (0, 0)),
            pl.BlockSpec((C_out, 1), lambda i: (0, 0)),
            pl.BlockSpec((K, M), lambda i: (0, 0)),
        ],
        out_specs=pl.BlockSpec((C_out, M), lambda i: (0, 0)),
        compiler_params=pltpu.CompilerParams(dimension_semantics=("arbitrary",)),
    )(w_t, gamma, beta, patches)


def conv_bn_tail(w_t, gamma, beta, patches, wf_tiled, sel, bf, *, slope=0.2, eps=1e-5):
    """Fused [conv+BN+LeakyReLU] (block 4) + final 4x4 VALID conv -> (1, N)."""
    C_out, K = w_t.shape
    M = patches.shape[1]
    N = sel.shape[1]
    kernel = functools.partial(_tail_kernel, inv_m=1.0 / M, slope=slope, eps=eps)
    return pl.pallas_call(
        kernel,
        out_shape=jax.ShapeDtypeStruct((1, N), jnp.float32),
        grid=(1,),
        in_specs=[
            pl.BlockSpec((C_out, K), lambda i: (0, 0)),
            pl.BlockSpec((C_out, 1), lambda i: (0, 0)),
            pl.BlockSpec((C_out, 1), lambda i: (0, 0)),
            pl.BlockSpec((K, M), lambda i: (0, 0)),
            pl.BlockSpec((C_out, M), lambda i: (0, 0)),
            pl.BlockSpec((M, N), lambda i: (0, 0)),
            pl.BlockSpec((1, 1), lambda i: (0, 0)),
        ],
        out_specs=pl.BlockSpec((1, N), lambda i: (0, 0)),
        compiler_params=pltpu.CompilerParams(dimension_semantics=("arbitrary",)),
    )(w_t, gamma, beta, patches, wf_tiled, sel, bf)


# ---------------------------------------------------------------------------
# im2col in channel-major (CNHW) layout — XLA glue feeding the kernels
# ---------------------------------------------------------------------------
def im2col_cnhw(x, k, stride, pad):
    # x: (C, N, H, W) -> patches (k*k*C, N*Ho*Wo); feature order = (kh, kw, c_in)
    C, N, H, W = x.shape
    if pad > 0:
        x = jnp.pad(x, ((0, 0), (0, 0), (pad, pad), (pad, pad)))
    Ho = (H + 2 * pad - k) // stride + 1
    Wo = (W + 2 * pad - k) // stride + 1
    cols = []
    for i in range(k):
        for j in range(k):
            cols.append(x[:, :, i:i + stride * Ho:stride, j:j + stride * Wo:stride])
    p = jnp.stack(cols, axis=0)              # (k*k, C, N, Ho, Wo)
    return p.reshape(k * k * C, N * Ho * Wo), Ho, Wo


# ---------------------------------------------------------------------------
# Parameters: PyTorch-layout init + one-time packing (hoisted out of forward)
# ---------------------------------------------------------------------------
def init_params(key, channels=3, ndf=4):
    feats = [channels, ndf, 2 * ndf, 4 * ndf, 8 * ndf, 16 * ndf]
    blocks = []
    for i in range(5):
        key, k1, k2 = jax.random.split(key, 3)
        w = jax.random.normal(k1, (feats[i + 1], feats[i], 4, 4), jnp.float32) * 0.02
        if i == 0:
            b = jax.random.normal(k2, (feats[i + 1],), jnp.float32) * 0.01
            blocks.append({"w": w, "b": b})
        else:
            blocks.append({"w": w,
                           "gamma": jnp.ones((feats[i + 1],), jnp.float32),
                           "beta": jnp.zeros((feats[i + 1],), jnp.float32)})
    key, k1, k2 = jax.random.split(key, 3)
    wf = jax.random.normal(k1, (1, feats[5], 4, 4), jnp.float32) * 0.02
    bf = jax.random.normal(k2, (1,), jnp.float32) * 0.01
    return {"blocks": blocks, "final": {"w": wf, "b": bf}}


def pack_params(params):
    # (O, I, kH, kW) -> (O, kH*kW*I) matching the im2col (kh, kw, c_in) feature order.
    def pack_w(w):
        O, I, kH, kW = w.shape
        return jnp.transpose(w, (0, 2, 3, 1)).reshape(O, kH * kW * I)

    blocks = []
    for i, p in enumerate(params["blocks"]):
        q = {"w_t": pack_w(p["w"])}
        if i == 0:
            q["b"] = p["b"].reshape(-1, 1).astype(jnp.float32)
        else:
            q["gamma"] = p["gamma"].reshape(-1, 1)
            q["beta"] = p["beta"].reshape(-1, 1)
        blocks.append(q)
    pf = params["final"]
    # Final 4x4 conv weight packed as (C_in, kH*kW): wf2[c, h*4+w] = Wf[0, c, h, w]
    wf2 = pf["w"].reshape(pf["w"].shape[1], 16)
    return {"blocks": blocks, "final": {"wf2": wf2, "b": pf["b"].reshape(1, 1)}}


# ---------------------------------------------------------------------------
# Discriminator forward (CNHW internally, NCHW at the boundary)
# ---------------------------------------------------------------------------
def discriminator_forward(img_nchw, packed):
    N = img_nchw.shape[0]
    x = jnp.transpose(img_nchw, (1, 0, 2, 3)).astype(jnp.float32)  # NCHW -> CNHW
    blocks = packed["blocks"]

    # Blocks 0..3: one fused pallas_call each.
    for idx in range(4):
        p = blocks[idx]
        patches, Ho, Wo = im2col_cnhw(x, k=4, stride=2, pad=1)
        if idx == 0:
            y = conv_bias_act(p["w_t"], p["b"], patches, act=True)
        else:
            y = conv_bn_act(p["w_t"], p["gamma"], p["beta"], patches)
        x = y.reshape(y.shape[0], N, Ho, Wo)

    # Block 4 (conv+BN+LeakyReLU) fused with the final 4x4 VALID conv: the final
    # conv consumes the whole 4x4 map, so no extra im2col / HBM roundtrip needed.
    p4 = blocks[4]
    pf = packed["final"]
    patches, Ho, Wo = im2col_cnhw(x, k=4, stride=2, pad=1)       # (512, N*16)
    hw = Ho * Wo
    wf_tiled = jnp.tile(pf["wf2"], (1, N))                       # (64, N*16)
    sel = (jnp.arange(N * hw)[:, None] // hw
           == jnp.arange(N)[None, :]).astype(jnp.float32)        # (N*16, N)
    y = conv_bn_tail(p4["w_t"], p4["gamma"], p4["beta"], patches,
                     wf_tiled, sel, pf["b"])                     # (1, N)
    return y.T.reshape(N, 1, 1, 1)                               # NCHW: (N, 1, 1, 1)


# ---------------------------------------------------------------------------
# Pure-JAX reference (for correctness check)
# ---------------------------------------------------------------------------
def reference_forward(img, params, *, slope=0.2, eps=1e-5):
    x = img.astype(jnp.float32)
    for idx, p in enumerate(params["blocks"]):
        x = jax.lax.conv_general_dilated(
            x, p["w"], window_strides=(2, 2), padding=((1, 1), (1, 1)),
            dimension_numbers=("NCHW", "OIHW", "NCHW"))
        if idx == 0:
            x = x + p["b"].reshape(1, -1, 1, 1)
        else:
            mean = jnp.mean(x, axis=(0, 2, 3), keepdims=True)
            var = jnp.mean((x - mean) ** 2, axis=(0, 2, 3), keepdims=True)
            x = (x - mean) * jax.lax.rsqrt(var + eps)
            x = x * p["gamma"].reshape(1, -1, 1, 1) + p["beta"].reshape(1, -1, 1, 1)
        x = jnp.where(x > 0, x, slope * x)
    pf = params["final"]
    x = jax.lax.conv_general_dilated(
        x, pf["w"], window_strides=(1, 1), padding=((0, 0), (0, 0)),
        dimension_numbers=("NCHW", "OIHW", "NCHW"))
    return x + pf["b"].reshape(1, -1, 1, 1)


if __name__ == "__main__":
    key = jax.random.PRNGKey(0)
    kx, kp = jax.random.split(key)
    # batch=2, channels=3, spatial=128 (minimum the architecture supports:
    # five stride-2 convs 128 -> 4, then a valid 4x4 conv -> 1x1), n_d_feature=4.
    img = jax.random.normal(kx, (2, 3, 128, 128), jnp.float32)
    params = init_params(kp, channels=3, ndf=4)
    packed = pack_params(params)  # one-time weight repack, outside the jitted forward

    out = jax.jit(discriminator_forward)(img, packed)
    out = jax.block_until_ready(out)
    assert out.shape == (2, 1, 1, 1), out.shape
    assert jnp.all(jnp.isfinite(out))

    ref = jax.block_until_ready(jax.jit(reference_forward)(img, params))
    assert jnp.allclose(out, ref, rtol=1e-3, atol=1e-3), (out, ref)

    print("KERNEL_OK")
</pallas_src>

<mosaic_0001>
module attributes {stable_mosaic.version = 11 : i64} {
  func.func @_conv_bias_act_kernel(%arg0: i32, %arg1: memref<4x48xf32, #tpu.memory_space<vmem>>, %arg2: memref<4x1xf32, #tpu.memory_space<vmem>>, %arg3: memref<48x2048xf32, #tpu.memory_space<vmem>>, %arg4: memref<4x2048xf32, #tpu.memory_space<vmem>>) attributes {dimension_semantics = [#tpu.dimension_semantics<parallel>], iteration_bounds = array<i64: 4>, scalar_prefetch = 0 : i64, scratch_operands = 0 : i64, tpu.core_type = #tpu.core_type<tc>, window_params = [{pipeline_mode = #tpu.pipeline_mode<synchronous>, transform_indices = @transform_0, window_bounds = array<i64: 4, 48>}, {pipeline_mode = #tpu.pipeline_mode<synchronous>, transform_indices = @transform_1, window_bounds = array<i64: 4, 1>}, {transform_indices = @transform_2, window_bounds = array<i64: 48, 2048>}, {transform_indices = @transform_3, window_bounds = array<i64: 4, 2048>}]} {
    %c0 = arith.constant 0 : index
    %c0_0 = arith.constant 0 : index
    %0 = vector.load %arg1[%c0, %c0_0] : memref<4x48xf32, #tpu.memory_space<vmem>>, vector<4x48xf32>
    %c0_1 = arith.constant 0 : index
    %c0_2 = arith.constant 0 : index
    %1 = vector.load %arg3[%c0_1, %c0_2] : memref<48x2048xf32, #tpu.memory_space<vmem>>, vector<48x2048xf32>
    %cst = arith.constant dense<0.000000e+00> : vector<4x2048xf32>
    %2 = tpu.matmul %0, %1, %cst {dimension_numbers = #tpu.dot_dimension_numbers<[1], [0], [0], [1], [0, 0, 1, 1], [], []>} : vector<4x48xf32>, vector<48x2048xf32>, vector<4x2048xf32> -> vector<4x2048xf32>
    %c0_3 = arith.constant 0 : index
    %c0_4 = arith.constant 0 : index
    %3 = vector.load %arg2[%c0_3, %c0_4] : memref<4x1xf32, #tpu.memory_space<vmem>>, vector<4x1xf32>
    %4 = vector.broadcast %3 : vector<4x1xf32> to vector<4x2048xf32>
    %5 = arith.addf %2, %4 : vector<4x2048xf32>
    %cst_5 = arith.constant 0.000000e+00 : f32
    %6 = vector.broadcast %cst_5 : f32 to vector<4x2048xf32>
    %7 = arith.cmpf ogt, %5, %6 : vector<4x2048xf32>
    %cst_6 = arith.constant 2.000000e-01 : f32
    %8 = vector.broadcast %cst_6 : f32 to vector<4x2048xf32>
    %9 = arith.mulf %8, %5 : vector<4x2048xf32>
    %10 = arith.select %7, %5, %9 : vector<4x2048xi1>, vector<4x2048xf32>
    %c0_7 = arith.constant 0 : index
    %c0_8 = arith.constant 0 : index
    %11 = vector.load %arg4[%c0_7, %c0_8] : memref<4x2048xf32, #tpu.memory_space<vmem>>, vector<4x2048xf32>
    tpu.vector_store %arg4[%c0_7, %c0_8], %10 {strides = array<i32>} : memref<4x2048xf32, #tpu.memory_space<vmem>>, vector<4x2048xf32>,
    return
  }
  func.func @transform_0(%arg0: i32) -> (i32, i32) {
    %c0_i32 = arith.constant 0 : i32
    %c0_i32_0 = arith.constant 0 : i32
    %c0_i32_1 = arith.constant 0 : i32
    return %c0_i32, %c0_i32_0 : i32, i32
  }
  func.func @transform_1(%arg0: i32) -> (i32, i32) {
    %c0_i32 = arith.constant 0 : i32
    %c0_i32_0 = arith.constant 0 : i32
    %c0_i32_1 = arith.constant 0 : i32
    return %c0_i32, %c0_i32_0 : i32, i32
  }
  func.func @transform_2(%arg0: i32) -> (i32, i32) {
    %c0_i32 = arith.constant 0 : i32
    %c0_i32_0 = arith.constant 0 : i32
    return %c0_i32, %arg0 : i32, i32
  }
  func.func @transform_3(%arg0: i32) -> (i32, i32) {
    %c0_i32 = arith.constant 0 : i32
    %c0_i32_0 = arith.constant 0 : i32
    return %c0_i32, %arg0 : i32, i32
  }
}

module attributes {stable_mosaic.version = 11 : i64} {
  func.func @_conv_bn_act_kernel(%arg0: i32, %arg1: memref<8x64xf32, #tpu.memory_space<vmem>>, %arg2: memref<8x1xf32, #tpu.memory_space<vmem>>, %arg3: memref<8x1xf32, #tpu.memory_space<vmem>>, %arg4: memref<64x2048xf32, #tpu.memory_space<vmem>>, %arg5: memref<8x2048xf32, #tpu.memory_space<vmem>>) attributes {dimension_semantics = [#tpu.dimension_semantics<arbitrary>], iteration_bounds = array<i64: 1>, scalar_prefetch = 0 : i64, scratch_operands = 0 : i64, tpu.core_type = #tpu.core_type<tc>, window_params = [{pipeline_mode = #tpu.pipeline_mode<synchronous>, transform_indices = @transform_0, window_bounds = array<i64: 8, 64>}, {pipeline_mode = #tpu.pipeline_mode<synchronous>, transform_indices = @transform_1, window_bounds = array<i64: 8, 1>}, {pipeline_mode = #tpu.pipeline_mode<synchronous>, transform_indices = @transform_2, window_bounds = array<i64: 8, 1>}, {pipeline_mode = #tpu.pipeline_mode<synchronous>, transform_indices = @transform_3, window_bounds = array<i64: 64, 2048>}, {pipeline_mode = #tpu.pipeline_mode<synchronous>, transform_indices = @transform_4, window_bounds = array<i64: 8, 2048>}]} {
    %c0 = arith.constant 0 : index
    %c0_0 = arith.constant 0 : index
    %0 = vector.load %arg1[%c0, %c0_0] : memref<8x64xf32, #tpu.memory_space<vmem>>, vector<8x64xf32>
    %c0_1 = arith.constant 0 : index
    %c0_2 = arith.constant 0 : index
    %1 = vector.load %arg4[%c0_1, %c0_2] : memref<64x2048xf32, #tpu.memory_space<vmem>>, vector<64x2048xf32>
    %cst = arith.constant dense<0.000000e+00> : vector<8x2048xf32>
    %2 = tpu.matmul %0, %1, %cst {dimension_numbers = #tpu.dot_dimension_numbers<[1], [0], [0], [1], [0, 0, 1, 1], [], []>} : vector<8x64xf32>, vector<64x2048xf32>, vector<8x2048xf32> -> vector<8x2048xf32>
    %cst_3 = arith.constant dense<0.000000e+00> : vector<8xf32>
    %3 = vector.multi_reduction <add>, %2, %cst_3 [1] : vector<8x2048xf32> to vector<8xf32>
    %4 = vector.shape_cast %3 : vector<8xf32> to vector<8x1xf32>
    %cst_4 = arith.constant 4.8828125E-4 : f32
    %5 = vector.broadcast %cst_4 : f32 to vector<8x1xf32>
    %6 = arith.mulf %4, %5 : vector<8x1xf32>
    %7 = vector.broadcast %6 : vector<8x1xf32> to vector<8x2048xf32>
    %8 = arith.subf %2, %7 : vector<8x2048xf32>
    %9 = arith.mulf %8, %8 : vector<8x2048xf32>
    %cst_5 = arith.constant dense<0.000000e+00> : vector<8xf32>
    %10 = vector.multi_reduction <add>, %9, %cst_5 [1] : vector<8x2048xf32> to vector<8xf32>
    %11 = vector.shape_cast %10 : vector<8xf32> to vector<8x1xf32>
    %cst_6 = arith.constant 4.8828125E-4 : f32
    %12 = vector.broadcast %cst_6 : f32 to vector<8x1xf32>
    %13 = arith.mulf %11, %12 : vector<8x1xf32>
    %c0_7 = arith.constant 0 : index
    %c0_8 = arith.constant 0 : index
    %14 = vector.load %arg2[%c0_7, %c0_8] : memref<8x1xf32, #tpu.memory_space<vmem>>, vector<8x1xf32>
    %cst_9 = arith.constant 9.99999974E-6 : f32
    %15 = vector.broadcast %cst_9 : f32 to vector<8x1xf32>
    %16 = arith.addf %13, %15 : vector<8x1xf32>
    %17 = math.rsqrt %16 : vector<8x1xf32>
    %18 = arith.mulf %14, %17 : vector<8x1xf32>
    %19 = vector.broadcast %18 : vector<8x1xf32> to vector<8x2048xf32>
    %20 = arith.mulf %8, %19 : vector<8x2048xf32>
    %c0_10 = arith.constant 0 : index
    %c0_11 = arith.constant 0 : index
    %21 = vector.load %arg3[%c0_10, %c0_11] : memref<8x1xf32, #tpu.memory_space<vmem>>, vector<8x1xf32>
    %22 = vector.broadcast %21 : vector<8x1xf32> to vector<8x2048xf32>
    %23 = arith.addf %20, %22 : vector<8x2048xf32>
    %cst_12 = arith.constant 0.000000e+00 : f32
    %24 = vector.broadcast %cst_12 : f32 to vector<8x2048xf32>
    %25 = arith.cmpf ogt, %23, %24 : vector<8x2048xf32>
    %cst_13 = arith.constant 2.000000e-01 : f32
    %26 = vector.broadcast %cst_13 : f32 to vector<8x2048xf32>
    %27 = arith.mulf %26, %23 : vector<8x2048xf32>
    %28 = arith.select %25, %23, %27 : vector<8x2048xi1>, vector<8x2048xf32>
    %c0_14 = arith.constant 0 : index
    %c0_15 = arith.constant 0 : index
    %29 = vector.load %arg5[%c0_14, %c0_15] : memref<8x2048xf32, #tpu.memory_space<vmem>>, vector<8x2048xf32>
    tpu.vector_store %arg5[%c0_14, %c0_15], %28 {strides = array<i32>} : memref<8x2048xf32, #tpu.memory_space<vmem>>, vector<8x2048xf32>,
    return
  }
  func.func @transform_0(%arg0: i32) -> (i32, i32) {
    %c0_i32 = arith.constant 0 : i32
    %c0_i32_0 = arith.constant 0 : i32
    %c0_i32_1 = arith.constant 0 : i32
    return %c0_i32, %c0_i32_0 : i32, i32
  }
  func.func @transform_1(%arg0: i32) -> (i32, i32) {
    %c0_i32 = arith.constant 0 : i32
    %c0_i32_0 = arith.constant 0 : i32
    %c0_i32_1 = arith.constant 0 : i32
    return %c0_i32, %c0_i32_0 : i32, i32
  }
  func.func @transform_2(%arg0: i32) -> (i32, i32) {
    %c0_i32 = arith.constant 0 : i32
    %c0_i32_0 = arith.constant 0 : i32
    %c0_i32_1 = arith.constant 0 : i32
    return %c0_i32, %c0_i32_0 : i32, i32
  }
  func.func @transform_3(%arg0: i32) -> (i32, i32) {
    %c0_i32 = arith.constant 0 : i32
    %c0_i32_0 = arith.constant 0 : i32
    %c0_i32_1 = arith.constant 0 : i32
    return %c0_i32, %c0_i32_0 : i32, i32
  }
  func.func @transform_4(%arg0: i32) -> (i32, i32) {
    %c0_i32 = arith.constant 0 : i32
    %c0_i32_0 = arith.constant 0 : i32
    %c0_i32_1 = arith.constant 0 : i32
    return %c0_i32, %c0_i32_0 : i32, i32
  }
}

module attributes {stable_mosaic.version = 11 : i64} {
  func.func @_conv_bn_act_kernel(%arg0: i32, %arg1: memref<16x128xf32, #tpu.memory_space<vmem>>, %arg2: memref<16x1xf32, #tpu.memory_space<vmem>>, %arg3: memref<16x1xf32, #tpu.memory_space<vmem>>, %arg4: memref<128x512xf32, #tpu.memory_space<vmem>>, %arg5: memref<16x512xf32, #tpu.memory_space<vmem>>) attributes {dimension_semantics = [#tpu.dimension_semantics<arbitrary>], iteration_bounds = array<i64: 1>, scalar_prefetch = 0 : i64, scratch_operands = 0 : i64, tpu.core_type = #tpu.core_type<tc>, window_params = [{pipeline_mode = #tpu.pipeline_mode<synchronous>, transform_indices = @transform_0, window_bounds = array<i64: 16, 128>}, {pipeline_mode = #tpu.pipeline_mode<synchronous>, transform_indices = @transform_1, window_bounds = array<i64: 16, 1>}, {pipeline_mode = #tpu.pipeline_mode<synchronous>, transform_indices = @transform_2, window_bounds = array<i64: 16, 1>}, {pipeline_mode = #tpu.pipeline_mode<synchronous>, transform_indices = @transform_3, window_bounds = array<i64: 128, 512>}, {pipeline_mode = #tpu.pipeline_mode<synchronous>, transform_indices = @transform_4, window_bounds = array<i64: 16, 512>}]} {
    %c0 = arith.constant 0 : index
    %c0_0 = arith.constant 0 : index
    %0 = vector.load %arg1[%c0, %c0_0] : memref<16x128xf32, #tpu.memory_space<vmem>>, vector<16x128xf32>
    %c0_1 = arith.constant 0 : index
    %c0_2 = arith.constant 0 : index
    %1 = vector.load %arg4[%c0_1, %c0_2] : memref<128x512xf32, #tpu.memory_space<vmem>>, vector<128x512xf32>
    %cst = arith.constant dense<0.000000e+00> : vector<16x512xf32>
    %2 = tpu.matmul %0, %1, %cst {dimension_numbers = #tpu.dot_dimension_numbers<[1], [0], [0], [1], [0, 0, 1, 1], [], []>} : vector<16x128xf32>, vector<128x512xf32>, vector<16x512xf32> -> vector<16x512xf32>
    %cst_3 = arith.constant dense<0.000000e+00> : vector<16xf32>
    %3 = vector.multi_reduction <add>, %2, %cst_3 [1] : vector<16x512xf32> to vector<16xf32>
    %4 = vector.shape_cast %3 : vector<16xf32> to vector<16x1xf32>
    %cst_4 = arith.constant 0.001953125 : f32
    %5 = vector.broadcast %cst_4 : f32 to vector<16x1xf32>
    %6 = arith.mulf %4, %5 : vector<16x1xf32>
    %7 = vector.broadcast %6 : vector<16x1xf32> to vector<16x512xf32>
    %8 = arith.subf %2, %7 : vector<16x512xf32>
    %9 = arith.mulf %8, %8 : vector<16x512xf32>
    %cst_5 = arith.constant dense<0.000000e+00> : vector<16xf32>
    %10 = vector.multi_reduction <add>, %9, %cst_5 [1] : vector<16x512xf32> to vector<16xf32>
    %11 = vector.shape_cast %10 : vector<16xf32> to vector<16x1xf32>
    %cst_6 = arith.constant 0.001953125 : f32
    %12 = vector.broadcast %cst_6 : f32 to vector<16x1xf32>
    %13 = arith.mulf %11, %12 : vector<16x1xf32>
    %c0_7 = arith.constant 0 : index
    %c0_8 = arith.constant 0 : index
    %14 = vector.load %arg2[%c0_7, %c0_8] : memref<16x1xf32, #tpu.memory_space<vmem>>, vector<16x1xf32>
    %cst_9 = arith.constant 9.99999974E-6 : f32
    %15 = vector.broadcast %cst_9 : f32 to vector<16x1xf32>
    %16 = arith.addf %13, %15 : vector<16x1xf32>
    %17 = math.rsqrt %16 : vector<16x1xf32>
    %18 = arith.mulf %14, %17 : vector<16x1xf32>
    %19 = vector.broadcast %18 : vector<16x1xf32> to vector<16x512xf32>
    %20 = arith.mulf %8, %19 : vector<16x512xf32>
    %c0_10 = arith.constant 0 : index
    %c0_11 = arith.constant 0 : index
    %21 = vector.load %arg3[%c0_10, %c0_11] : memref<16x1xf32, #tpu.memory_space<vmem>>, vector<16x1xf32>
    %22 = vector.broadcast %21 : vector<16x1xf32> to vector<16x512xf32>
    %23 = arith.addf %20, %22 : vector<16x512xf32>
    %cst_12 = arith.constant 0.000000e+00 : f32
    %24 = vector.broadcast %cst_12 : f32 to vector<16x512xf32>
    %25 = arith.cmpf ogt, %23, %24 : vector<16x512xf32>
    %cst_13 = arith.constant 2.000000e-01 : f32
    %26 = vector.broadcast %cst_13 : f32 to vector<16x512xf32>
    %27 = arith.mulf %26, %23 : vector<16x512xf32>
    %28 = arith.select %25, %23, %27 : vector<16x512xi1>, vector<16x512xf32>
    %c0_14 = arith.constant 0 : index
    %c0_15 = arith.constant 0 : index
    %29 = vector.load %arg5[%c0_14, %c0_15] : memref<16x512xf32, #tpu.memory_space<vmem>>, vector<16x512xf32>
    tpu.vector_store %arg5[%c0_14, %c0_15], %28 {strides = array<i32>} : memref<16x512xf32, #tpu.memory_space<vmem>>, vector<16x512xf32>,
    return
  }
  func.func @transform_0(%arg0: i32) -> (i32, i32) {
    %c0_i32 = arith.constant 0 : i32
    %c0_i32_0 = arith.constant 0 : i32
    %c0_i32_1 = arith.constant 0 : i32
    return %c0_i32, %c0_i32_0 : i32, i32
  }
  func.func @transform_1(%arg0: i32) -> (i32, i32) {
    %c0_i32 = arith.constant 0 : i32
    %c0_i32_0 = arith.constant 0 : i32
    %c0_i32_1 = arith.constant 0 : i32
    return %c0_i32, %c0_i32_0 : i32, i32
  }
  func.func @transform_2(%arg0: i32) -> (i32, i32) {
    %c0_i32 = arith.constant 0 : i32
    %c0_i32_0 = arith.constant 0 : i32
    %c0_i32_1 = arith.constant 0 : i32
    return %c0_i32, %c0_i32_0 : i32, i32
  }
  func.func @transform_3(%arg0: i32) -> (i32, i32) {
    %c0_i32 = arith.constant 0 : i32
    %c0_i32_0 = arith.constant 0 : i32
    %c0_i32_1 = arith.constant 0 : i32
    return %c0_i32, %c0_i32_0 : i32, i32
  }
  func.func @transform_4(%arg0: i32) -> (i32, i32) {
    %c0_i32 = arith.constant 0 : i32
    %c0_i32_0 = arith.constant 0 : i32
    %c0_i32_1 = arith.constant 0 : i32
    return %c0_i32, %c0_i32_0 : i32, i32
  }
}

module attributes {stable_mosaic.version = 11 : i64} {
  func.func @_conv_bn_act_kernel(%arg0: i32, %arg1: memref<32x256xf32, #tpu.memory_space<vmem>>, %arg2: memref<32x1xf32, #tpu.memory_space<vmem>>, %arg3: memref<32x1xf32, #tpu.memory_space<vmem>>, %arg4: memref<256x128xf32, #tpu.memory_space<vmem>>, %arg5: memref<32x128xf32, #tpu.memory_space<vmem>>) attributes {dimension_semantics = [#tpu.dimension_semantics<arbitrary>], iteration_bounds = array<i64: 1>, scalar_prefetch = 0 : i64, scratch_operands = 0 : i64, tpu.core_type = #tpu.core_type<tc>, window_params = [{pipeline_mode = #tpu.pipeline_mode<synchronous>, transform_indices = @transform_0, window_bounds = array<i64: 32, 256>}, {pipeline_mode = #tpu.pipeline_mode<synchronous>, transform_indices = @transform_1, window_bounds = array<i64: 32, 1>}, {pipeline_mode = #tpu.pipeline_mode<synchronous>, transform_indices = @transform_2, window_bounds = array<i64: 32, 1>}, {pipeline_mode = #tpu.pipeline_mode<synchronous>, transform_indices = @transform_3, window_bounds = array<i64: 256, 128>}, {pipeline_mode = #tpu.pipeline_mode<synchronous>, transform_indices = @transform_4, window_bounds = array<i64: 32, 128>}]} {
    %c0 = arith.constant 0 : index
    %c0_0 = arith.constant 0 : index
    %0 = vector.load %arg1[%c0, %c0_0] : memref<32x256xf32, #tpu.memory_space<vmem>>, vector<32x256xf32>
    %c0_1 = arith.constant 0 : index
    %c0_2 = arith.constant 0 : index
    %1 = vector.load %arg4[%c0_1, %c0_2] : memref<256x128xf32, #tpu.memory_space<vmem>>, vector<256x128xf32>
    %cst = arith.constant dense<0.000000e+00> : vector<32x128xf32>
    %2 = tpu.matmul %0, %1, %cst {dimension_numbers = #tpu.dot_dimension_numbers<[1], [0], [0], [1], [0, 0, 1, 1], [], []>} : vector<32x256xf32>, vector<256x128xf32>, vector<32x128xf32> -> vector<32x128xf32>
    %cst_3 = arith.constant dense<0.000000e+00> : vector<32xf32>
    %3 = vector.multi_reduction <add>, %2, %cst_3 [1] : vector<32x128xf32> to vector<32xf32>
    %4 = vector.shape_cast %3 : vector<32xf32> to vector<32x1xf32>
    %cst_4 = arith.constant 7.812500e-03 : f32
    %5 = vector.broadcast %cst_4 : f32 to vector<32x1xf32>
    %6 = arith.mulf %4, %5 : vector<32x1xf32>
    %7 = vector.broadcast %6 : vector<32x1xf32> to vector<32x128xf32>
    %8 = arith.subf %2, %7 : vector<32x128xf32>
    %9 = arith.mulf %8, %8 : vector<32x128xf32>
    %cst_5 = arith.constant dense<0.000000e+00> : vector<32xf32>
    %10 = vector.multi_reduction <add>, %9, %cst_5 [1] : vector<32x128xf32> to vector<32xf32>
    %11 = vector.shape_cast %10 : vector<32xf32> to vector<32x1xf32>
    %cst_6 = arith.constant 7.812500e-03 : f32
    %12 = vector.broadcast %cst_6 : f32 to vector<32x1xf32>
    %13 = arith.mulf %11, %12 : vector<32x1xf32>
    %c0_7 = arith.constant 0 : index
    %c0_8 = arith.constant 0 : index
    %14 = vector.load %arg2[%c0_7, %c0_8] : memref<32x1xf32, #tpu.memory_space<vmem>>, vector<32x1xf32>
    %cst_9 = arith.constant 9.99999974E-6 : f32
    %15 = vector.broadcast %cst_9 : f32 to vector<32x1xf32>
    %16 = arith.addf %13, %15 : vector<32x1xf32>
    %17 = math.rsqrt %16 : vector<32x1xf32>
    %18 = arith.mulf %14, %17 : vector<32x1xf32>
    %19 = vector.broadcast %18 : vector<32x1xf32> to vector<32x128xf32>
    %20 = arith.mulf %8, %19 : vector<32x128xf32>
    %c0_10 = arith.constant 0 : index
    %c0_11 = arith.constant 0 : index
    %21 = vector.load %arg3[%c0_10, %c0_11] : memref<32x1xf32, #tpu.memory_space<vmem>>, vector<32x1xf32>
    %22 = vector.broadcast %21 : vector<32x1xf32> to vector<32x128xf32>
    %23 = arith.addf %20, %22 : vector<32x128xf32>
    %cst_12 = arith.constant 0.000000e+00 : f32
    %24 = vector.broadcast %cst_12 : f32 to vector<32x128xf32>
    %25 = arith.cmpf ogt, %23, %24 : vector<32x128xf32>
    %cst_13 = arith.constant 2.000000e-01 : f32
    %26 = vector.broadcast %cst_13 : f32 to vector<32x128xf32>
    %27 = arith.mulf %26, %23 : vector<32x128xf32>
    %28 = arith.select %25, %23, %27 : vector<32x128xi1>, vector<32x128xf32>
    %c0_14 = arith.constant 0 : index
    %c0_15 = arith.constant 0 : index
    %29 = vector.load %arg5[%c0_14, %c0_15] : memref<32x128xf32, #tpu.memory_space<vmem>>, vector<32x128xf32>
    tpu.vector_store %arg5[%c0_14, %c0_15], %28 {strides = array<i32>} : memref<32x128xf32, #tpu.memory_space<vmem>>, vector<32x128xf32>,
    return
  }
  func.func @transform_0(%arg0: i32) -> (i32, i32) {
    %c0_i32 = arith.constant 0 : i32
    %c0_i32_0 = arith.constant 0 : i32
    %c0_i32_1 = arith.constant 0 : i32
    return %c0_i32, %c0_i32_0 : i32, i32
  }
  func.func @transform_1(%arg0: i32) -> (i32, i32) {
    %c0_i32 = arith.constant 0 : i32
    %c0_i32_0 = arith.constant 0 : i32
    %c0_i32_1 = arith.constant 0 : i32
    return %c0_i32, %c0_i32_0 : i32, i32
  }
  func.func @transform_2(%arg0: i32) -> (i32, i32) {
    %c0_i32 = arith.constant 0 : i32
    %c0_i32_0 = arith.constant 0 : i32
    %c0_i32_1 = arith.constant 0 : i32
    return %c0_i32, %c0_i32_0 : i32, i32
  }
  func.func @transform_3(%arg0: i32) -> (i32, i32) {
    %c0_i32 = arith.constant 0 : i32
    %c0_i32_0 = arith.constant 0 : i32
    %c0_i32_1 = arith.constant 0 : i32
    return %c0_i32, %c0_i32_0 : i32, i32
  }
  func.func @transform_4(%arg0: i32) -> (i32, i32) {
    %c0_i32 = arith.constant 0 : i32
    %c0_i32_0 = arith.constant 0 : i32
    %c0_i32_1 = arith.constant 0 : i32
    return %c0_i32, %c0_i32_0 : i32, i32
  }
}

module attributes {stable_mosaic.version = 11 : i64} {
  func.func @_tail_kernel(%arg0: i32, %arg1: memref<64x512xf32, #tpu.memory_space<vmem>>, %arg2: memref<64x1xf32, #tpu.memory_space<vmem>>, %arg3: memref<64x1xf32, #tpu.memory_space<vmem>>, %arg4: memref<512x32xf32, #tpu.memory_space<vmem>>, %arg5: memref<64x32xf32, #tpu.memory_space<vmem>>, %arg6: memref<32x2xf32, #tpu.memory_space<vmem>>, %arg7: memref<1x1xf32, #tpu.memory_space<vmem>>, %arg8: memref<1x2xf32, #tpu.memory_space<vmem>>) attributes {dimension_semantics = [#tpu.dimension_semantics<arbitrary>], iteration_bounds = array<i64: 1>, scalar_prefetch = 0 : i64, scratch_operands = 0 : i64, tpu.core_type = #tpu.core_type<tc>, window_params = [{pipeline_mode = #tpu.pipeline_mode<synchronous>, transform_indices = @transform_0, window_bounds = array<i64: 64, 512>}, {pipeline_mode = #tpu.pipeline_mode<synchronous>, transform_indices = @transform_1, window_bounds = array<i64: 64, 1>}, {pipeline_mode = #tpu.pipeline_mode<synchronous>, transform_indices = @transform_2, window_bounds = array<i64: 64, 1>}, {pipeline_mode = #tpu.pipeline_mode<synchronous>, transform_indices = @transform_3, window_bounds = array<i64: 512, 32>}, {pipeline_mode = #tpu.pipeline_mode<synchronous>, transform_indices = @transform_4, window_bounds = array<i64: 64, 32>}, {pipeline_mode = #tpu.pipeline_mode<synchronous>, transform_indices = @transform_5, window_bounds = array<i64: 32, 2>}, {pipeline_mode = #tpu.pipeline_mode<synchronous>, transform_indices = @transform_6, window_bounds = array<i64: 1, 1>}, {pipeline_mode = #tpu.pipeline_mode<synchronous>, transform_indices = @transform_7, window_bounds = array<i64: 1, 2>}]} {
    %c0 = arith.constant 0 : index
    %c0_0 = arith.constant 0 : index
    %0 = vector.load %arg1[%c0, %c0_0] : memref<64x512xf32, #tpu.memory_space<vmem>>, vector<64x512xf32>
    %c0_1 = arith.constant 0 : index
    %c0_2 = arith.constant 0 : index
    %1 = vector.load %arg4[%c0_1, %c0_2] : memref<512x32xf32, #tpu.memory_space<vmem>>, vector<512x32xf32>
    %cst = arith.constant dense<0.000000e+00> : vector<64x32xf32>
    %2 = tpu.matmul %0, %1, %cst {dimension_numbers = #tpu.dot_dimension_numbers<[1], [0], [0], [1], [0, 0, 1, 1], [], []>} : vector<64x512xf32>, vector<512x32xf32>, vector<64x32xf32> -> vector<64x32xf32>
    %cst_3 = arith.constant dense<0.000000e+00> : vector<64xf32>
    %3 = vector.multi_reduction <add>, %2, %cst_3 [1] : vector<64x32xf32> to vector<64xf32>
    %4 = vector.shape_cast %3 : vector<64xf32> to vector<64x1xf32>
    %cst_4 = arith.constant 3.125000e-02 : f32
    %5 = vector.broadcast %cst_4 : f32 to vector<64x1xf32>
    %6 = arith.mulf %4, %5 : vector<64x1xf32>
    %7 = vector.broadcast %6 : vector<64x1xf32> to vector<64x32xf32>
    %8 = arith.subf %2, %7 : vector<64x32xf32>
    %9 = arith.mulf %8, %8 : vector<64x32xf32>
    %cst_5 = arith.constant dense<0.000000e+00> : vector<64xf32>
    %10 = vector.multi_reduction <add>, %9, %cst_5 [1] : vector<64x32xf32> to vector<64xf32>
    %11 = vector.shape_cast %10 : vector<64xf32> to vector<64x1xf32>
    %cst_6 = arith.constant 3.125000e-02 : f32
    %12 = vector.broadcast %cst_6 : f32 to vector<64x1xf32>
    %13 = arith.mulf %11, %12 : vector<64x1xf32>
    %c0_7 = arith.constant 0 : index
    %c0_8 = arith.constant 0 : index
    %14 = vector.load %arg2[%c0_7, %c0_8] : memref<64x1xf32, #tpu.memory_space<vmem>>, vector<64x1xf32>
    %cst_9 = arith.constant 9.99999974E-6 : f32
    %15 = vector.broadcast %cst_9 : f32 to vector<64x1xf32>
    %16 = arith.addf %13, %15 : vector<64x1xf32>
    %17 = math.rsqrt %16 : vector<64x1xf32>
    %18 = arith.mulf %14, %17 : vector<64x1xf32>
    %19 = vector.broadcast %18 : vector<64x1xf32> to vector<64x32xf32>
    %20 = arith.mulf %8, %19 : vector<64x32xf32>
    %c0_10 = arith.constant 0 : index
    %c0_11 = arith.constant 0 : index
    %21 = vector.load %arg3[%c0_10, %c0_11] : memref<64x1xf32, #tpu.memory_space<vmem>>, vector<64x1xf32>
    %22 = vector.broadcast %21 : vector<64x1xf32> to vector<64x32xf32>
    %23 = arith.addf %20, %22 : vector<64x32xf32>
    %cst_12 = arith.constant 0.000000e+00 : f32
    %24 = vector.broadcast %cst_12 : f32 to vector<64x32xf32>
    %25 = arith.cmpf ogt, %23, %24 : vector<64x32xf32>
    %cst_13 = arith.constant 2.000000e-01 : f32
    %26 = vector.broadcast %cst_13 : f32 to vector<64x32xf32>
    %27 = arith.mulf %26, %23 : vector<64x32xf32>
    %28 = arith.select %25, %23, %27 : vector<64x32xi1>, vector<64x32xf32>
    %c0_14 = arith.constant 0 : index
    %c0_15 = arith.constant 0 : index
    %29 = vector.load %arg5[%c0_14, %c0_15] : memref<64x32xf32, #tpu.memory_space<vmem>>, vector<64x32xf32>
    %30 = arith.mulf %28, %29 : vector<64x32xf32>
    %cst_16 = arith.constant dense<0.000000e+00> : vector<32xf32>
    %31 = vector.multi_reduction <add>, %30, %cst_16 [0] : vector<64x32xf32> to vector<32xf32>
    %32 = vector.shape_cast %31 : vector<32xf32> to vector<1x32xf32>
    %c0_17 = arith.constant 0 : index
    %c0_18 = arith.constant 0 : index
    %33 = vector.load %arg6[%c0_17, %c0_18] : memref<32x2xf32, #tpu.memory_space<vmem>>, vector<32x2xf32>
    %cst_19 = arith.constant dense<0.000000e+00> : vector<1x2xf32>
    %34 = tpu.matmul %32, %33, %cst_19 {dimension_numbers = #tpu.dot_dimension_numbers<[1], [0], [0], [1], [0, 0, 1, 1], [], []>} : vector<1x32xf32>, vector<32x2xf32>, vector<1x2xf32> -> vector<1x2xf32>
    %c0_20 = arith.constant 0 : index
    %c0_21 = arith.constant 0 : index
    %35 = vector.load %arg7[%c0_20, %c0_21] : memref<1x1xf32, #tpu.memory_space<vmem>>, vector<1x1xf32>
    %36 = vector.broadcast %35 : vector<1x1xf32> to vector<1x2xf32>
    %37 = arith.addf %34, %36 : vector<1x2xf32>
    %c0_22 = arith.constant 0 : index
    %c0_23 = arith.constant 0 : index
    %38 = vector.load %arg8[%c0_22, %c0_23] : memref<1x2xf32, #tpu.memory_space<vmem>>, vector<1x2xf32>
    tpu.vector_store %arg8[%c0_22, %c0_23], %37 {strides = array<i32>} : memref<1x2xf32, #tpu.memory_space<vmem>>, vector<1x2xf32>,
    return
  }
  func.func @transform_0(%arg0: i32) -> (i32, i32) {
    %c0_i32 = arith.constant 0 : i32
    %c0_i32_0 = arith.constant 0 : i32
    %c0_i32_1 = arith.constant 0 : i32
    return %c0_i32, %c0_i32_0 : i32, i32
  }
  func.func @transform_1(%arg0: i32) -> (i32, i32) {
    %c0_i32 = arith.constant 0 : i32
    %c0_i32_0 = arith.constant 0 : i32
    %c0_i32_1 = arith.constant 0 : i32
    return %c0_i32, %c0_i32_0 : i32, i32
  }
  func.func @transform_2(%arg0: i32) -> (i32, i32) {
    %c0_i32 = arith.constant 0 : i32
    %c0_i32_0 = arith.constant 0 : i32
    %c0_i32_1 = arith.constant 0 : i32
    return %c0_i32, %c0_i32_0 : i32, i32
  }
  func.func @transform_3(%arg0: i32) -> (i32, i32) {
    %c0_i32 = arith.constant 0 : i32
    %c0_i32_0 = arith.constant 0 : i32
    %c0_i32_1 = arith.constant 0 : i32
    return %c0_i32, %c0_i32_0 : i32, i32
  }
  func.func @transform_4(%arg0: i32) -> (i32, i32) {
    %c0_i32 = arith.constant 0 : i32
    %c0_i32_0 = arith.constant 0 : i32
    %c0_i32_1 = arith.constant 0 : i32
    return %c0_i32, %c0_i32_0 : i32, i32
  }
  func.func @transform_5(%arg0: i32) -> (i32, i32) {
    %c0_i32 = arith.constant 0 : i32
    %c0_i32_0 = arith.constant 0 : i32
    %c0_i32_1 = arith.constant 0 : i32
    return %c0_i32, %c0_i32_0 : i32, i32
  }
  func.func @transform_6(%arg0: i32) -> (i32, i32) {
    %c0_i32 = arith.constant 0 : i32
    %c0_i32_0 = arith.constant 0 : i32
    %c0_i32_1 = arith.constant 0 : i32
    return %c0_i32, %c0_i32_0 : i32, i32
  }
  func.func @transform_7(%arg0: i32) -> (i32, i32) {
    %c0_i32 = arith.constant 0 : i32
    %c0_i32_0 = arith.constant 0 : i32
    %c0_i32_1 = arith.constant 0 : i32
    return %c0_i32, %c0_i32_0 : i32, i32
  }
}

</mosaic_0001>

<bundles_post_ra>
// kernel: discriminator_forward.5
= control target key start
LH: loop header
LB: loop body
LE: loop exit
PB: predicated region body
PF: predicated region fallthrough
CT: control target
= control target key end

     0   :  { %s1303_s12 = smov 0   ;;  %s1305_s13 = smov 0   ;;  %s1709_s0 = inlined_call_operand.vmem [shape: f32[4,48], index: 0, kind: input, shape index: {}]   ;;  %s1710_s1 = inlined_call_operand.vmem [shape: f32[4,1], index: 1, kind: input, shape index: {}]   ;;  %s1711_s2 = inlined_call_operand.vmem [shape: f32[48,8192], index: 2, kind: input, shape index: {}]   ;;  %s1712_s3 = inlined_call_operand.vmem [shape: f32[4,8192], index: 3, kind: output, shape index: {}]  }
   0x1   :  { %s1307_s14 = smov 0  }
   0x2 LB: > { %s1208_s15 = sadd.s32 4294967295, %s1279_s14   ;;  %s1320_s16 = sadd.s32 1, %s1279_s14   ;;  %s1279_s14 = sphi %s1307_s14, %s1715_s14   ;;  %s1275_s13 = sphi %s1305_s13, %s1714_s13   ;;  %s1271_s12 = sphi %s1303_s12, %s1713_s12  }
   0x3   : > { %s59_s17 = ssub.s32 %s1279_s14, %s1320_s16  ;;  %s62_s18 = sadd.s32 1, %s1275_s13 }
   0x4   : > { %p60_p0 = scmp.eq.s32.totalorder %s59_s17, 0  ;;  %p69_p1 = scmp.ne.s32.totalorder %s1275_s13, %s1271_s12 }
   0x5   : > { %p70_p2 = scmp.eq.s32.totalorder %s1279_s14, 0  ;;  %p1211_p4 = scmp.ge.s32.totalorder %s1279_s14, 4 }
   0x6   : > { %s1329_s19 = scalar_select %p60_p0, %s1275_s13, %s62_s18  }
   0x7   : > { %p71_p3 = por %p70_p2, %p69_p1  ;;  %127 = sbr.rel (%p1211_p4) target bundleno = 65 (0x41), region = 24 }
   0xc   : > { %130 = sbr.rel (!%p71_p3) target bundleno = 65 (0x41), region = 28  ;;  %s132_s20 = sand.u32 (%p71_p3), 1, %s1275_s13  }
   0xd   : > { %s1227_s21 = sshll.u32 (%p71_p3), %s1279_s14, 7  ;;  %s1228_s22 = smul.u32 (%p71_p3), 768, %s132_s20 }
   0xe   : > { %s1337_s25 = scalar_lea.vmem (%p71_p3), %s1711_s2, %s1227_s21 }
   0xf   : > { %v150_v0 = vld [vmem:[%s1337_s25] sm:$0xff] (%p71_p3)  ;;  %v152_v1 = vld [vmem:[%s1337_s25 + $0x8] sm:$0xff] (%p71_p3)  ;;  %v154_v2 = vld [vmem:[%s1337_s25 + $0x10] sm:$0xff] (%p71_p3)  ;;  %s1345_s26 = scalar_lea.vmem (%p71_p3), [#allocation2], %s1228_s22 }
  0x10   : > { %v156_v3 = vld [vmem:[%s1337_s25 + $0x18] sm:$0xff] (%p71_p3)  ;;  %v158_v4 = vld [vmem:[%s1337_s25 + $0x20] sm:$0xff] (%p71_p3)  ;;  %v160_v5 = vld [vmem:[%s1337_s25 + $0x28] sm:$0xff] (%p71_p3)  ;;  %151 = vst [vmem:[%s1345_s26] sm:$0xff] (%p71_p3), %v150_v0 }
  0x11   : > { %153 = vst [vmem:[%s1345_s26 + $0x8] sm:$0xff] %v152_v1  ;;  %155 = vst [vmem:[%s1345_s26 + $0x10] sm:$0xff] %v154_v2  ;;  %v162_v6 = vld [vmem:[%s1337_s25 + $0x30] sm:$0xff]  ;;  %v164_v7 = vld [vmem:[%s1337_s25 + $0x38] sm:$0xff] }
  0x12   : > { %157 = vst [vmem:[%s1345_s26 + $0x18] sm:$0xff] %v156_v3  ;;  %159 = vst [vmem:[%s1345_s26 + $0x20] sm:$0xff] %v158_v4  ;;  %v166_v8 = vld [vmem:[%s1337_s25 + $0x40] sm:$0xff]  ;;  %v168_v9 = vld [vmem:[%s1337_s25 + $0x48] sm:$0xff] }
  0x13   : > { %161 = vst [vmem:[%s1345_s26 + $0x28] sm:$0xff] %v160_v5  ;;  %163 = vst [vmem:[%s1345_s26 + $0x30] sm:$0xff] %v162_v6  ;;  %v170_v10 = vld [vmem:[%s1337_s25 + $0x50] sm:$0xff]  ;;  %v172_v11 = vld [vmem:[%s1337_s25 + $0x58] sm:$0xff] }
  0x14   : > { %165 = vst [vmem:[%s1345_s26 + $0x38] sm:$0xff] %v164_v7  ;;  %167 = vst [vmem:[%s1345_s26 + $0x40] sm:$0xff] %v166_v8  ;;  %v174_v12 = vld [vmem:[%s1337_s25 + $0x60] sm:$0xff]  ;;  %v176_v13 = vld [vmem:[%s1337_s25 + $0x68] sm:$0xff] }
  0x15   : > { %169 = vst [vmem:[%s1345_s26 + $0x48] sm:$0xff] %v168_v9  ;;  %171 = vst [vmem:[%s1345_s26 + $0x50] sm:$0xff] %v170_v10  ;;  %v178_v14 = vld [vmem:[%s1337_s25 + $0x70] sm:$0xff]  ;;  %v180_v15 = vld [vmem:[%s1337_s25 + $0x78] sm:$0xff] }
  0x16   : > { %173 = vst [vmem:[%s1345_s26 + $0x58] sm:$0xff] %v172_v11  ;;  %175 = vst [vmem:[%s1345_s26 + $0x60] sm:$0xff] %v174_v12  ;;  %v182_v16 = vld [vmem:[%s1337_s25 + $0x200] sm:$0xff]  ;;  %v184_v17 = vld [vmem:[%s1337_s25 + $0x208] sm:$0xff] }
  0x17   : > { %177 = vst [vmem:[%s1345_s26 + $0x68] sm:$0xff] %v176_v13  ;;  %179 = vst [vmem:[%s1345_s26 + $0x70] sm:$0xff] %v178_v14  ;;  %v186_v18 = vld [vmem:[%s1337_s25 + $0x210] sm:$0xff]  ;;  %v188_v19 = vld [vmem:[%s1337_s25 + $0x218] sm:$0xff] }
  0x18   : > { %181 = vst [vmem:[%s1345_s26 + $0x78] sm:$0xff] %v180_v15  ;;  %183 = vst [vmem:[%s1345_s26 + $0x80] sm:$0xff] %v182_v16  ;;  %v190_v20 = vld [vmem:[%s1337_s25 + $0x220] sm:$0xff]  ;;  %v192_v21 = vld [vmem:[%s1337_s25 + $0x228] sm:$0xff] }
  0x19   : > { %185 = vst [vmem:[%s1345_s26 + $0x88] sm:$0xff] %v184_v17  ;;  %187 = vst [vmem:[%s1345_s26 + $0x90] sm:$0xff] %v186_v18  ;;  %v194_v22 = vld [vmem:[%s1337_s25 + $0x230] sm:$0xff]  ;;  %v196_v23 = vld [vmem:[%s1337_s25 + $0x238] sm:$0xff] }
  0x1a   : > { %189 = vst [vmem:[%s1345_s26 + $0x98] sm:$0xff] %v188_v19  ;;  %191 = vst [vmem:[%s1345_s26 + $0xa0] sm:$0xff] %v190_v20  ;;  %v198_v24 = vld [vmem:[%s1337_s25 + $0x240] sm:$0xff]  ;;  %v200_v25 = vld [vmem:[%s1337_s25 + $0x248] sm:$0xff] }
  0x1b   : > { %193 = vst [vmem:[%s1345_s26 + $0xa8] sm:$0xff] %v192_v21  ;;  %195 = vst [vmem:[%s1345_s26 + $0xb0] sm:$0xff] %v194_v22  ;;  %v202_v26 = vld [vmem:[%s1337_s25 + $0x250] sm:$0xff]  ;;  %v204_v27 = vld [vmem:[%s1337_s25 + $0x258] sm:$0xff] }
  0x1c   : > { %197 = vst [vmem:[%s1345_s26 + $0xb8] sm:$0xff] %v196_v23  ;;  %199 = vst [vmem:[%s1345_s26 + $0xc0] sm:$0xff] %v198_v24  ;;  %v206_v28 = vld [vmem:[%s1337_s25 + $0x260] sm:$0xff]  ;;  %v208_v29 = vld [vmem:[%s1337_s25 + $0x268] sm:$0xff] }
  0x1d   : > { %201 = vst [vmem:[%s1345_s26 + $0xc8] sm:$0xff] %v200_v25  ;;  %203 = vst [vmem:[%s1345_s26 + $0xd0] sm:$0xff] %v202_v26  ;;  %v210_v30 = vld [vmem:[%s1337_s25 + $0x270] sm:$0xff]  ;;  %v212_v31 = vld [vmem:[%s1337_s25 + $0x278] sm:$0xff] }
  0x1e   : > { %205 = vst [vmem:[%s1345_s26 + $0xd8] sm:$0xff] %v204_v27  ;;  %207 = vst [vmem:[%s1345_s26 + $0xe0] sm:$0xff] %v206_v28  ;;  %v214_v32 = vld [vmem:[%s1337_s25 + $0x400] sm:$0xff]  ;;  %v216_v33 = vld [vmem:[%s1337_s25 + $0x408] sm:$0xff] }
  0x1f   : > { %209 = vst [vmem:[%s1345_s26 + $0xe8] sm:$0xff] %v208_v29  ;;  %211 = vst [vmem:[%s1345_s26 + $0xf0] sm:$0xff] %v210_v30  ;;  %v218_v34 = vld [vmem:[%s1337_s25 + $0x410] sm:$0xff]  ;;  %v220_v35 = vld [vmem:[%s1337_s25 + $0x418] sm:$0xff] }
  0x20   : > { %213 = vst [vmem:[%s1345_s26 + $0xf8] sm:$0xff] %v212_v31  ;;  %215 = vst [vmem:[%s1345_s26 + $0x100] sm:$0xff] %v214_v32  ;;  %v222_v36 = vld [vmem:[%s1337_s25 + $0x420] sm:$0xff]  ;;  %v224_v37 = vld [vmem:[%s1337_s25 + $0x428] sm:$0xff] }
  0x21   : > { %217 = vst [vmem:[%s1345_s26 + $0x108] sm:$0xff] %v216_v33  ;;  %219 = vst [vmem:[%s1345_s26 + $0x110] sm:$0xff] %v218_v34  ;;  %v226_v38 = vld [vmem:[%s1337_s25 + $0x430] sm:$0xff]  ;;  %v228_v39 = vld [vmem:[%s1337_s25 + $0x438] sm:$0xff] }
  0x22   : > { %221 = vst [vmem:[%s1345_s26 + $0x118] sm:$0xff] %v220_v35  ;;  %223 = vst [vmem:[%s1345_s26 + $0x120] sm:$0xff] %v222_v36  ;;  %v230_v40 = vld [vmem:[%s1337_s25 + $0x440] sm:$0xff]  ;;  %v232_v41 = vld [vmem:[%s1337_s25 + $0x448] sm:$0xff] }
  0x23   : > { %225 = vst [vmem:[%s1345_s26 + $0x128] sm:$0xff] %v224_v37  ;;  %227 = vst [vmem:[%s1345_s26 + $0x130] sm:$0xff] %v226_v38  ;;  %v234_v42 = vld [vmem:[%s1337_s25 + $0x450] sm:$0xff]  ;;  %v236_v43 = vld [vmem:[%s1337_s25 + $0x458] sm:$0xff] }
  0x24   : > { %229 = vst [vmem:[%s1345_s26 + $0x138] sm:$0xff] %v228_v39  ;;  %231 = vst [vmem:[%s1345_s26 + $0x140] sm:$0xff] %v230_v40  ;;  %v238_v44 = vld [vmem:[%s1337_s25 + $0x460] sm:$0xff]  ;;  %v240_v45 = vld [vmem:[%s1337_s25 + $0x468] sm:$0xff] }
  0x25   : > { %233 = vst [vmem:[%s1345_s26 + $0x148] sm:$0xff] %v232_v41  ;;  %235 = vst [vmem:[%s1345_s26 + $0x150] sm:$0xff] %v234_v42  ;;  %v242_v46 = vld [vmem:[%s1337_s25 + $0x470] sm:$0xff]  ;;  %v244_v47 = vld [vmem:[%s1337_s25 + $0x478] sm:$0xff] }
  0x26   : > { %237 = vst [vmem:[%s1345_s26 + $0x158] sm:$0xff] %v236_v43  ;;  %239 = vst [vmem:[%s1345_s26 + $0x160] sm:$0xff] %v238_v44  ;;  %v246_v48 = vld [vmem:[%s1337_s25 + $0x600] sm:$0xff]  ;;  %v248_v49 = vld [vmem:[%s1337_s25 + $0x608] sm:$0xff] }
  0x27   : > { %241 = vst [vmem:[%s1345_s26 + $0x168] sm:$0xff] %v240_v45  ;;  %243 = vst [vmem:[%s1345_s26 + $0x170] sm:$0xff] %v242_v46  ;;  %v250_v50 = vld [vmem:[%s1337_s25 + $0x610] sm:$0xff]  ;;  %v252_v51 = vld [vmem:[%s1337_s25 + $0x618] sm:$0xff] }
  0x28   : > { %245 = vst [vmem:[%s1345_s26 + $0x178] sm:$0xff] %v244_v47  ;;  %247 = vst [vmem:[%s1345_s26 + $0x180] sm:$0xff] %v246_v48  ;;  %v254_v52 = vld [vmem:[%s1337_s25 + $0x620] sm:$0xff]  ;;  %v256_v53 = vld [vmem:[%s1337_s25 + $0x628] sm:$0xff] }
  0x29   : > { %249 = vst [vmem:[%s1345_s26 + $0x188] sm:$0xff] %v248_v49  ;;  %251 = vst [vmem:[%s1345_s26 + $0x190] sm:$0xff] %v250_v50  ;;  %v258_v54 = vld [vmem:[%s1337_s25 + $0x630] sm:$0xff]  ;;  %v260_v55 = vld [vmem:[%s1337_s25 + $0x638] sm:$0xff] }
  0x2a   : > { %253 = vst [vmem:[%s1345_s26 + $0x198] sm:$0xff] %v252_v51  ;;  %255 = vst [vmem:[%s1345_s26 + $0x1a0] sm:$0xff] %v254_v52  ;;  %v262_v56 = vld [vmem:[%s1337_s25 + $0x640] sm:$0xff]  ;;  %v264_v57 = vld [vmem:[%s1337_s25 + $0x648] sm:$0xff] }
  0x2b   : > { %257 = vst [vmem:[%s1345_s26 + $0x1a8] sm:$0xff] %v256_v53  ;;  %259 = vst [vmem:[%s1345_s26 + $0x1b0] sm:$0xff] %v258_v54  ;;  %v266_v58 = vld [vmem:[%s1337_s25 + $0x650] sm:$0xff]  ;;  %v268_v59 = vld [vmem:[%s1337_s25 + $0x658] sm:$0xff] }
  0x2c   : > { %261 = vst [vmem:[%s1345_s26 + $0x1b8] sm:$0xff] %v260_v55  ;;  %263 = vst [vmem:[%s1345_s26 + $0x1c0] sm:$0xff] %v262_v56  ;;  %v270_v60 = vld [vmem:[%s1337_s25 + $0x660] sm:$0xff]  ;;  %v272_v61 = vld [vmem:[%s1337_s25 + $0x668] sm:$0xff] }
  0x2d   : > { %265 = vst [vmem:[%s1345_s26 + $0x1c8] sm:$0xff] %v264_v57  ;;  %267 = vst [vmem:[%s1345_s26 + $0x1d0] sm:$0xff] %v266_v58  ;;  %v274_v62 = vld [vmem:[%s1337_s25 + $0x670] sm:$0xff]  ;;  %v276_v63 = vld [vmem:[%s1337_s25 + $0x678] sm:$0xff] }
  0x2e   : > { %269 = vst [vmem:[%s1345_s26 + $0x1d8] sm:$0xff] %v268_v59  ;;  %271 = vst [vmem:[%s1345_s26 + $0x1e0] sm:$0xff] %v270_v60  ;;  %v278_v0 = vld [vmem:[%s1337_s25 + $0x800] sm:$0xff]  ;;  %v280_v1 = vld [vmem:[%s1337_s25 + $0x808] sm:$0xff] }
  0x2f   : > { %273 = vst [vmem:[%s1345_s26 + $0x1e8] sm:$0xff] %v272_v61  ;;  %275 = vst [vmem:[%s1345_s26 + $0x1f0] sm:$0xff] %v274_v62  ;;  %v282_v2 = vld [vmem:[%s1337_s25 + $0x810] sm:$0xff]  ;;  %v284_v3 = vld [vmem:[%s1337_s25 + $0x818] sm:$0xff] }
  0x30   : > { %277 = vst [vmem:[%s1345_s26 + $0x1f8] sm:$0xff] %v276_v63  ;;  %279 = vst [vmem:[%s1345_s26 + $0x200] sm:$0xff] %v278_v0  ;;  %v286_v4 = vld [vmem:[%s1337_s25 + $0x820] sm:$0xff]  ;;  %v288_v5 = vld [vmem:[%s1337_s25 + $0x828] sm:$0xff] }
  0x31   : > { %281 = vst [vmem:[%s1345_s26 + $0x208] sm:$0xff] %v280_v1  ;;  %283 = vst [vmem:[%s1345_s26 + $0x210] sm:$0xff] %v282_v2  ;;  %v290_v6 = vld [vmem:[%s1337_s25 + $0x830] sm:$0xff]  ;;  %v292_v7 = vld [vmem:[%s1337_s25 + $0x838] sm:$0xff] }
  0x32   : > { %285 = vst [vmem:[%s1345_s26 + $0x218] sm:$0xff] %v284_v3  ;;  %287 = vst [vmem:[%s1345_s26 + $0x220] sm:$0xff] %v286_v4  ;;  %v294_v8 = vld [vmem:[%s1337_s25 + $0x840] sm:$0xff]  ;;  %v296_v9 = vld [vmem:[%s1337_s25 + $0x848] sm:$0xff] }
  0x33   : > { %289 = vst [vmem:[%s1345_s26 + $0x228] sm:$0xff] %v288_v5  ;;  %291 = vst [vmem:[%s1345_s26 + $0x230] sm:$0xff] %v290_v6  ;;  %v298_v10 = vld [vmem:[%s1337_s25 + $0x850] sm:$0xff]  ;;  %v300_v11 = vld [vmem:[%s1337_s25 + $0x858] sm:$0xff] }
  0x34   : > { %293 = vst [vmem:[%s1345_s26 + $0x238] sm:$0xff] %v292_v7  ;;  %295 = vst [vmem:[%s1345_s26 + $0x240] sm:$0xff] %v294_v8  ;;  %v302_v12 = vld [vmem:[%s1337_s25 + $0x860] sm:$0xff]  ;;  %v304_v13 = vld [vmem:[%s1337_s25 + $0x868] sm:$0xff] }
  0x35   : > { %297 = vst [vmem:[%s1345_s26 + $0x248] sm:$0xff] %v296_v9  ;;  %299 = vst [vmem:[%s1345_s26 + $0x250] sm:$0xff] %v298_v10  ;;  %v306_v14 = vld [vmem:[%s1337_s25 + $0x870] sm:$0xff]  ;;  %v308_v15 = vld [vmem:[%s1337_s25 + $0x878] sm:$0xff] }
  0x36   : > { %301 = vst [vmem:[%s1345_s26 + $0x258] sm:$0xff] %v300_v11  ;;  %303 = vst [vmem:[%s1345_s26 + $0x260] sm:$0xff] %v302_v12  ;;  %v310_v16 = vld [vmem:[%s1337_s25 + $0xa00] sm:$0xff]  ;;  %v312_v17 = vld [vmem:[%s1337_s25 + $0xa08] sm:$0xff] }
  0x37   : > { %305 = vst [vmem:[%s1345_s26 + $0x268] sm:$0xff] %v304_v13  ;;  %307 = vst [vmem:[%s1345_s26 + $0x270] sm:$0xff] %v306_v14  ;;  %v314_v18 = vld [vmem:[%s1337_s25 + $0xa10] sm:$0xff]  ;;  %v316_v19 = vld [vmem:[%s1337_s25 + $0xa18] sm:$0xff] }
  0x38   : > { %309 = vst [vmem:[%s1345_s26 + $0x278] sm:$0xff] %v308_v15  ;;  %311 = vst [vmem:[%s1345_s26 + $0x280] sm:$0xff] %v310_v16  ;;  %v318_v20 = vld [vmem:[%s1337_s25 + $0xa20] sm:$0xff]  ;;  %v320_v21 = vld [vmem:[%s1337_s25 + $0xa28] sm:$0xff] }
  0x39   : > { %313 = vst [vmem:[%s1345_s26 + $0x288] sm:$0xff] %v312_v17  ;;  %315 = vst [vmem:[%s1345_s26 + $0x290] sm:$0xff] %v314_v18  ;;  %v322_v22 = vld [vmem:[%s1337_s25 + $0xa30] sm:$0xff]  ;;  %v324_v23 = vld [vmem:[%s1337_s25 + $0xa38] sm:$0xff] }
  0x3a   : > { %317 = vst [vmem:[%s1345_s26 + $0x298] sm:$0xff] %v316_v19  ;;  %319 = vst [vmem:[%s1345_s26 + $0x2a0] sm:$0xff] %v318_v20  ;;  %v326_v24 = vld [vmem:[%s1337_s25 + $0xa40] sm:$0xff]  ;;  %v328_v25 = vld [vmem:[%s1337_s25 + $0xa48] sm:$0xff] }
  0x3b   : > { %321 = vst [vmem:[%s1345_s26 + $0x2a8] sm:$0xff] %v320_v21  ;;  %323 = vst [vmem:[%s1345_s26 + $0x2b0] sm:$0xff] %v322_v22  ;;  %v330_v26 = vld [vmem:[%s1337_s25 + $0xa50] sm:$0xff]  ;;  %v332_v27 = vld [vmem:[%s1337_s25 + $0xa58] sm:$0xff] }
  0x3c   : > { %325 = vst [vmem:[%s1345_s26 + $0x2b8] sm:$0xff] %v324_v23  ;;  %327 = vst [vmem:[%s1345_s26 + $0x2c0] sm:$0xff] %v326_v24  ;;  %v334_v28 = vld [vmem:[%s1337_s25 + $0xa60] sm:$0xff]  ;;  %v336_v29 = vld [vmem:[%s1337_s25 + $0xa68] sm:$0xff] }
  0x3d   : > { %329 = vst [vmem:[%s1345_s26 + $0x2c8] sm:$0xff] %v328_v25  ;;  %331 = vst [vmem:[%s1345_s26 + $0x2d0] sm:$0xff] %v330_v26  ;;  %v338_v30 = vld [vmem:[%s1337_s25 + $0xa70] sm:$0xff]  ;;  %v340_v31 = vld [vmem:[%s1337_s25 + $0xa78] sm:$0xff] }
  0x3e   : > { %333 = vst [vmem:[%s1345_s26 + $0x2d8] sm:$0xff] %v332_v27  ;;  %335 = vst [vmem:[%s1345_s26 + $0x2e0] sm:$0xff] %v334_v28 }
  0x3f   : > { %337 = vst [vmem:[%s1345_s26 + $0x2e8] sm:$0xff] %v336_v29  ;;  %339 = vst [vmem:[%s1345_s26 + $0x2f0] sm:$0xff] %v338_v30 }
  0x40   : > { %341 = vst [vmem:[%s1345_s26 + $0x2f8] sm:$0xff] %v340_v31 }
  0x41 PF: > { %p1214_p5 = scmp.ge.s32.totalorder %s1279_s14, 1  ;;  %p346_p6 = scmp.lt.s32.totalorder %s1279_s14, 5 }
  0x43   : > { %p347_p7 = pnand %p1214_p5, %p346_p6 }
  0x44   : > { %s353_s27 = sand.u32 (!%p347_p7), 1, %s1271_s12   ;;  %s1215_s7 = sshll.u32 (!%p347_p7), %s1208_s15, 4 }
  0x45   : > { %350 = sbr.rel (%p347_p7) target bundleno = 334 (0x14e), region = 51  ;;  %p378_p8 = scmp.lt.s32.totalorder (!%p347_p7), %s1215_s7, 63 }
  0x46   : > { %s1229_s28 = smul.u32 (!%p347_p7), 768, %s353_s27 }
  0x48   : > { %s1541_s4 = scalar_lea.vmem (!%p347_p7), [#allocation2], %s1229_s28 }
  0x4a   : > { %v1281_v32 = vmov 0.0   ;;  %v480_v33 = vld [vmem:[%s1710_s1] sm:$0xf]  ;;  %v1282_v34 = vmov 0   ;;  %v465_v35 = vld [vmem:[%s1541_s4 + $0x288] sm:$0xff]  ;;  %v467_v36 = vld [vmem:[%s1541_s4 + $0x298] sm:$0xff] }
  0x4b   : > { %554 = vmatprep.mubr.f32.mxu0 %v1281_v32  ;;  %625 = vmatprep.mubr.f32.mxu1 %v1281_v32  ;;  %v464_v37 = vld [vmem:[%s1541_s4 + $0x280] sm:$0xff]  ;;  %v466_v38 = vld [vmem:[%s1541_s4 + $0x290] sm:$0xff]  ;;  %v449_v39 = vld [vmem:[%s1541_s4 + $0x208] sm:$0xff]  ;;  %vm486_vm0 = vcmask 392192   ;;  %s1717_s7 = smov (!%p378_p8, %s1215_s7), 63 }
  0x4c   : > { %1256 = vset.pattern.permute.xlu0 %v1282_v34  ;;  %510 = vmatprep.subr.mxu0 %v465_v35  ;;  %v451_v40 = vld [vmem:[%s1541_s4 + $0x218] sm:$0xff]  ;;  %v448_v41 = vld [vmem:[%s1541_s4 + $0x200] sm:$0xff]  ;;  %v450_v42 = vld [vmem:[%s1541_s4 + $0x210] sm:$0xff]  ;;  %s1216_s8 = sshll.u32 %s1717_s7, 2 }
  0x4d   : > { %483 = vperm.xlu0 %1256, %v480_v33   ;;  %581 = vmatprep.subr.mxu1 %v467_v36  ;;  %v433_v43 = vld [vmem:[%s1541_s4 + $0x188] sm:$0xff]  ;;  %v435_v44 = vld [vmem:[%s1541_s4 + $0x198] sm:$0xff]  ;;  %v432_v45 = vld [vmem:[%s1541_s4 + $0x180] sm:$0xff]  ;;  %s1677_s11 = scalar_lea.vmem %s1712_s3, %s1216_s8 }
  0x4e   : > { %511 = vmatpush1.msra.mxu0 %v464_v37  ;;  %582 = vmatpush1.msra.mxu1 %v466_v38  ;;  %v434_v46 = vld [vmem:[%s1541_s4 + $0x190] sm:$0xff]  ;;  %v417_v47 = vld [vmem:[%s1541_s4 + $0x108] sm:$0xff]  ;;  %v419_v48 = vld [vmem:[%s1541_s4 + $0x118] sm:$0xff] }
  0x4f   : > { %512 = vmatprep.subr.mxu0 %v449_v39  ;;  %583 = vmatprep.subr.mxu1 %v451_v40  ;;  %v416_v49 = vld [vmem:[%s1541_s4 + $0x100] sm:$0xff]  ;;  %v418_v50 = vld [vmem:[%s1541_s4 + $0x110] sm:$0xff]  ;;  %v401_v51 = vld [vmem:[%s1541_s4 + $0x88] sm:$0xff] }
  0x50   : > { %513 = vmatpush1.msra.mxu0 %v448_v41  ;;  %584 = vmatpush1.msra.mxu1 %v450_v42  ;;  %v403_v52 = vld [vmem:[%s1541_s4 + $0x98] sm:$0xff]  ;;  %v400_v53 = vld [vmem:[%s1541_s4 + $0x80] sm:$0xff]  ;;  %v402_v54 = vld [vmem:[%s1541_s4 + $0x90] sm:$0xff] }
  0x51   : > { %514 = vmatprep.subr.mxu0 %v433_v43  ;;  %585 = vmatprep.subr.mxu1 %v435_v44  ;;  %v385_v55 = vld [vmem:[%s1541_s4 + $0x8] sm:$0xff]  ;;  %v387_v56 = vld [vmem:[%s1541_s4 + $0x18] sm:$0xff]  ;;  %v384_v57 = vld [vmem:[%s1541_s4] sm:$0xff] }
  0x52   : > { %515 = vmatpush1.msra.mxu0 %v432_v45  ;;  %586 = vmatpush1.msra.mxu1 %v434_v46  ;;  %v386_v58 = vld [vmem:[%s1541_s4 + $0x10] sm:$0xff]  ;;  %v1570_v59 = vld [vmem:[%s1709_s0] sm:$0xf]  ;;  %v469_v60 = vld [vmem:[%s1541_s4 + $0x2a8] sm:$0xff] }
  0x53   : > { %516 = vmatprep.subr.mxu0 %v417_v47  ;;  %587 = vmatprep.subr.mxu1 %v419_v48  ;;  %v471_v61 = vld [vmem:[%s1541_s4 + $0x2b8] sm:$0xff]  ;;  %v468_v62 = vld [vmem:[%s1541_s4 + $0x2a0] sm:$0xff]  ;;  %v470_v63 = vld [vmem:[%s1541_s4 + $0x2b0] sm:$0xff] }
  0x54   : > { %517 = vmatpush1.msra.mxu0 %v416_v49  ;;  %588 = vmatpush1.msra.mxu1 %v418_v50  ;;  %v453_v0 = vld [vmem:[%s1541_s4 + $0x228] sm:$0xff]  ;;  %v455_v1 = vld [vmem:[%s1541_s4 + $0x238] sm:$0xff]  ;;  %v452_v2 = vld [vmem:[%s1541_s4 + $0x220] sm:$0xff] }
  0x55   : > { %518 = vmatprep.subr.mxu0 %v401_v51  ;;  %589 = vmatprep.subr.mxu1 %v403_v52  ;;  %v454_v3 = vld [vmem:[%s1541_s4 + $0x230] sm:$0xff]  ;;  %v437_v4 = vld [vmem:[%s1541_s4 + $0x1a8] sm:$0xff]  ;;  %v439_v5 = vld [vmem:[%s1541_s4 + $0x1b8] sm:$0xff] }
  0x56   : > { %519 = vmatpush1.msra.mxu0 %v400_v53  ;;  %590 = vmatpush1.msra.mxu1 %v402_v54  ;;  %v436_v6 = vld [vmem:[%s1541_s4 + $0x1a0] sm:$0xff]  ;;  %v438_v7 = vld [vmem:[%s1541_s4 + $0x1b0] sm:$0xff]  ;;  %v421_v8 = vld [vmem:[%s1541_s4 + $0x128] sm:$0xff] }
  0x57   : > { %520 = vmatprep.subr.mxu0 %v385_v55  ;;  %591 = vmatprep.subr.mxu1 %v387_v56  ;;  %v423_v9 = vld [vmem:[%s1541_s4 + $0x138] sm:$0xff]  ;;  %v420_v10 = vld [vmem:[%s1541_s4 + $0x120] sm:$0xff]  ;;  %v422_v11 = vld [vmem:[%s1541_s4 + $0x130] sm:$0xff] }
  0x58   : > { %521 = vmatpush1.msra.mxu0 %v384_v57  ;;  %592 = vmatpush1.msra.mxu1 %v386_v58  ;;  %v405_v12 = vld [vmem:[%s1541_s4 + $0xa8] sm:$0xff]  ;;  %v407_v13 = vld [vmem:[%s1541_s4 + $0xb8] sm:$0xff]  ;;  %v404_v14 = vld [vmem:[%s1541_s4 + $0xa0] sm:$0xff] }
  0x59   : > { %1217 = vmatmul.mubr.msk.f32.vlgmr.msra.gmra.mxu0 %vm486_vm0, %v1570_v59  ;;  %1218 = vmatmul.mubr.msk.f32.vlgmr.msra.gmra.mxu1 %vm486_vm0, %v1570_v59  ;;  %v406_v15 = vld [vmem:[%s1541_s4 + $0xb0] sm:$0xff]  ;;  %v389_v16 = vld [vmem:[%s1541_s4 + $0x28] sm:$0xff]  ;;  %v391_v17 = vld [vmem:[%s1541_s4 + $0x38] sm:$0xff] }
  0x5a   : > { %652 = vmatprep.subr.mxu0 %v469_v60  ;;  %723 = vmatprep.subr.mxu1 %v471_v61  ;;  %v388_v18 = vld [vmem:[%s1541_s4 + $0x20] sm:$0xff]  ;;  %v390_v19 = vld [vmem:[%s1541_s4 + $0x30] sm:$0xff]  ;;  %v473_v20 = vld [vmem:[%s1541_s4 + $0x2c8] sm:$0xff] }
  0x5b   : > { %653 = vmatpush1.msra.mxu0 %v468_v62  ;;  %724 = vmatpush1.msra.mxu1 %v470_v63  ;;  %v475_v21 = vld [vmem:[%s1541_s4 + $0x2d8] sm:$0xff]  ;;  %v472_v22 = vld [vmem:[%s1541_s4 + $0x2c0] sm:$0xff]  ;;  %v474_v23 = vld [vmem:[%s1541_s4 + $0x2d0] sm:$0xff] }
  0x5c   : > { %654 = vmatprep.subr.mxu0 %v453_v0  ;;  %725 = vmatprep.subr.mxu1 %v455_v1  ;;  %v457_v24 = vld [vmem:[%s1541_s4 + $0x248] sm:$0xff]  ;;  %v459_v25 = vld [vmem:[%s1541_s4 + $0x258] sm:$0xff]  ;;  %v456_v26 = vld [vmem:[%s1541_s4 + $0x240] sm:$0xff] }
  0x5d   : > { %655 = vmatpush1.msra.mxu0 %v452_v2  ;;  %726 = vmatpush1.msra.mxu1 %v454_v3  ;;  %v458_v27 = vld [vmem:[%s1541_s4 + $0x250] sm:$0xff]  ;;  %v441_v28 = vld [vmem:[%s1541_s4 + $0x1c8] sm:$0xff]  ;;  %v443_v29 = vld [vmem:[%s1541_s4 + $0x1d8] sm:$0xff] }
  0x5e   : > { %656 = vmatprep.subr.mxu0 %v437_v4  ;;  %727 = vmatprep.subr.mxu1 %v439_v5  ;;  %v440_v30 = vld [vmem:[%s1541_s4 + $0x1c0] sm:$0xff]  ;;  %v442_v31 = vld [vmem:[%s1541_s4 + $0x1d0] sm:$0xff]  ;;  %v425_v33 = vld [vmem:[%s1541_s4 + $0x148] sm:$0xff] }
  0x5f   : > { %657 = vmatpush1.msra.mxu0 %v436_v6  ;;  %728 = vmatpush1.msra.mxu1 %v438_v7  ;;  %v427_v34 = vld [vmem:[%s1541_s4 + $0x158] sm:$0xff]  ;;  %v424_v35 = vld [vmem:[%s1541_s4 + $0x140] sm:$0xff]  ;;  %v426_v36 = vld [vmem:[%s1541_s4 + $0x150] sm:$0xff] }
  0x60   : > { %658 = vmatprep.subr.mxu0 %v421_v8  ;;  %729 = vmatprep.subr.mxu1 %v423_v9  ;;  %v409_v37 = vld [vmem:[%s1541_s4 + $0xc8] sm:$0xff]  ;;  %v411_v38 = vld [vmem:[%s1541_s4 + $0xd8] sm:$0xff]  ;;  %v408_v39 = vld [vmem:[%s1541_s4 + $0xc0] sm:$0xff] }
  0x61   : > { %659 = vmatpush1.msra.mxu0 %v420_v10  ;;  %730 = vmatpush1.msra.mxu1 %v422_v11  ;;  %v410_v40 = vld [vmem:[%s1541_s4 + $0xd0] sm:$0xff]  ;;  %v393_v41 = vld [vmem:[%s1541_s4 + $0x48] sm:$0xff]  ;;  %v395_v42 = vld [vmem:[%s1541_s4 + $0x58] sm:$0xff] }
  0x62   : > { %660 = vmatprep.subr.mxu0 %v405_v12  ;;  %731 = vmatprep.subr.mxu1 %v407_v13  ;;  %v392_v43 = vld [vmem:[%s1541_s4 + $0x40] sm:$0xff]  ;;  %v394_v44 = vld [vmem:[%s1541_s4 + $0x50] sm:$0xff]  ;;  %v477_v45 = vld [vmem:[%s1541_s4 + $0x2e8] sm:$0xff] }
  0x63   : > { %661 = vmatpush1.msra.mxu0 %v404_v14  ;;  %732 = vmatpush1.msra.mxu1 %v406_v15  ;;  %v479_v46 = vld [vmem:[%s1541_s4 + $0x2f8] sm:$0xff]  ;;  %v476_v47 = vld [vmem:[%s1541_s4 + $0x2e0] sm:$0xff]  ;;  %v478_v48 = vld [vmem:[%s1541_s4 + $0x2f0] sm:$0xff] }
  0x64   : > { %662 = vmatprep.subr.mxu0 %v389_v16  ;;  %733 = vmatprep.subr.mxu1 %v391_v17  ;;  %v461_v49 = vld [vmem:[%s1541_s4 + $0x268] sm:$0xff]  ;;  %v463_v50 = vld [vmem:[%s1541_s4 + $0x278] sm:$0xff]  ;;  %v460_v51 = vld [vmem:[%s1541_s4 + $0x260] sm:$0xff] }
  0x65   : > { %663 = vmatpush1.msra.mxu0 %v388_v18  ;;  %696 = vmatprep.mubr.f32.mxu0 %v1281_v32  ;;  %v462_v52 = vld [vmem:[%s1541_s4 + $0x270] sm:$0xff]  ;;  %v445_v53 = vld [vmem:[%s1541_s4 + $0x1e8] sm:$0xff]  ;;  %v447_v54 = vld [vmem:[%s1541_s4 + $0x1f8] sm:$0xff] }
  0x66   : > { %734 = vmatpush1.msra.mxu1 %v390_v19  ;;  %767 = vmatprep.mubr.f32.mxu1 %v1281_v32  ;;  %v444_v55 = vld [vmem:[%s1541_s4 + $0x1e0] sm:$0xff]  ;;  %v446_v56 = vld [vmem:[%s1541_s4 + $0x1f0] sm:$0xff]  ;;  %v429_v57 = vld [vmem:[%s1541_s4 + $0x168] sm:$0xff] }
  0x67   : > { %1219 = vmatmul.mubr.msk.f32.vlgmr.msra.gmra.mxu0 %vm486_vm0, %v1570_v59  ;;  %1220 = vmatmul.mubr.msk.f32.vlgmr.msra.gmra.mxu1 %vm486_vm0, %v1570_v59  ;;  %v431_v58 = vld [vmem:[%s1541_s4 + $0x178] sm:$0xff]  ;;  %v428_v60 = vld [vmem:[%s1541_s4 + $0x160] sm:$0xff]  ;;  %v430_v61 = vld [vmem:[%s1541_s4 + $0x170] sm:$0xff] }
  0x68   : > { %794 = vmatprep.subr.mxu0 %v473_v20  ;;  %865 = vmatprep.subr.mxu1 %v475_v21  ;;  %v413_v62 = vld [vmem:[%s1541_s4 + $0xe8] sm:$0xff]  ;;  %v415_v63 = vld [vmem:[%s1541_s4 + $0xf8] sm:$0xff]  ;;  %v412_v0 = vld [vmem:[%s1541_s4 + $0xe0] sm:$0xff] }
  0x69   : > { %795 = vmatpush1.msra.mxu0 %v472_v22  ;;  %866 = vmatpush1.msra.mxu1 %v474_v23  ;;  %v414_v1 = vld [vmem:[%s1541_s4 + $0xf0] sm:$0xff]  ;;  %v397_v2 = vld [vmem:[%s1541_s4 + $0x68] sm:$0xff]  ;;  %v399_v3 = vld [vmem:[%s1541_s4 + $0x78] sm:$0xff] }
  0x6a   : > { %796 = vmatprep.subr.mxu0 %v457_v24  ;;  %867 = vmatprep.subr.mxu1 %v459_v25  ;;  %v396_v4 = vld [vmem:[%s1541_s4 + $0x60] sm:$0xff]  ;;  %v398_v5 = vld [vmem:[%s1541_s4 + $0x70] sm:$0xff] }
  0x6b   : > { %797 = vmatpush1.msra.mxu0 %v456_v26  ;;  %868 = vmatpush1.msra.mxu1 %v458_v27 }
  0x6c   : > { %798 = vmatprep.subr.mxu0 %v441_v28  ;;  %869 = vmatprep.subr.mxu1 %v443_v29 }
  0x6d   : > { %799 = vmatpush1.msra.mxu0 %v440_v30  ;;  %870 = vmatpush1.msra.mxu1 %v442_v31 }
  0x6e   : > { %800 = vmatprep.subr.mxu0 %v425_v33  ;;  %871 = vmatprep.subr.mxu1 %v427_v34 }
  0x6f   : > { %801 = vmatpush1.msra.mxu0 %v424_v35  ;;  %872 = vmatpush1.msra.mxu1 %v426_v36 }
  0x70   : > { %802 = vmatprep.subr.mxu0 %v409_v37  ;;  %873 = vmatprep.subr.mxu1 %v411_v38 }
  0x71   : > { %803 = vmatpush1.msra.mxu0 %v408_v39  ;;  %874 = vmatpush1.msra.mxu1 %v410_v40 }
  0x72   : > { %804 = vmatprep.subr.mxu0 %v393_v41  ;;  %875 = vmatprep.subr.mxu1 %v395_v42 }
  0x73   : > { %805 = vmatpush1.msra.mxu0 %v392_v43  ;;  %838 = vmatprep.mubr.f32.mxu0 %v1281_v32 }
  0x74   : > { %876 = vmatpush1.msra.mxu1 %v394_v44  ;;  %909 = vmatprep.mubr.f32.mxu1 %v1281_v32 }
  0x75   : > { %1221 = vmatmul.mubr.msk.f32.vlgmr.msra.gmra.mxu0 %vm486_vm0, %v1570_v59  ;;  %1222 = vmatmul.mubr.msk.f32.vlgmr.msra.gmra.mxu1 %vm486_vm0, %v1570_v59 }
  0x76   : > { %936 = vmatprep.subr.mxu0 %v477_v45  ;;  %1007 = vmatprep.subr.mxu1 %v479_v46 }
  0x77   : > { %937 = vmatpush1.msra.mxu0 %v476_v47  ;;  %1008 = vmatpush1.msra.mxu1 %v478_v48 }
  0x78   : > { %938 = vmatprep.subr.mxu0 %v461_v49  ;;  %1009 = vmatprep.subr.mxu1 %v463_v50 }
  0x79   : > { %939 = vmatpush1.msra.mxu0 %v460_v51  ;;  %1010 = vmatpush1.msra.mxu1 %v462_v52 }
  0x7a   : > { %940 = vmatprep.subr.mxu0 %v445_v53  ;;  %1011 = vmatprep.subr.mxu1 %v447_v54 }
  0x7b   : > { %941 = vmatpush1.msra.mxu0 %v444_v55  ;;  %1012 = vmatpush1.msra.mxu1 %v446_v56 }
  0x7c   : > { %942 = vmatprep.subr.mxu0 %v429_v57  ;;  %1013 = vmatprep.subr.mxu1 %v431_v58 }
  0x7d   : > { %943 = vmatpush1.msra.mxu0 %v428_v60  ;;  %1014 = vmatpush1.msra.mxu1 %v430_v61 }
  0x7e   : > { %944 = vmatprep.subr.mxu0 %v413_v62  ;;  %1015 = vmatprep.subr.mxu1 %v415_v63 }
  0x7f   : > { %945 = vmatpush1.msra.mxu0 %v412_v0  ;;  %1016 = vmatpush1.msra.mxu1 %v414_v1 }
  0x80   : > { %946 = vmatprep.subr.mxu0 %v397_v2  ;;  %1017 = vmatprep.subr.mxu1 %v399_v3 }
  0x81   : > { %947 = vmatpush1.msra.mxu0 %v396_v4  ;;  %980 = vmatprep.mubr.f32.mxu0 %v1281_v32 }
  0x82   : > { %1018 = vmatpush1.msra.mxu1 %v398_v5  ;;  %1051 = vmatprep.mubr.f32.mxu1 %v1281_v32 }
  0x83   : > { %1223 = vmatmul.mubr.msk.f32.vlgmr.msra.gmra.mxu0 %vm486_vm0, %v1570_v59  ;;  %1224 = vmatmul.mubr.msk.f32.vlgmr.msra.gmra.mxu1 %vm486_vm0, %v1570_v59 }
  0xc8   : > { %v1668_v6 = vpop.permute.xlu0 %483 }
 0x119   : > { %v556_v7 = vpop.f32.mrf.mxu0  ;;  %v627_v8 = vpop.f32.mrf.mxu1 }
 0x11a   : > { %v557_v9 = vadd.f32 %v556_v7, %v1668_v6  ;;  %v628_v10 = vadd.f32 %v627_v8, %v1668_v6 }
 0x11b   : > { %v558_v11 = vpop.f32.mrf.mxu0  ;;  %v629_v32 = vpop.f32.mrf.mxu1 }
 0x11c   : > { %v1074_v12 = vmul.f32 0.2, %v557_v9  ;;  %v1076_v13 = vmul.f32 0.2, %v628_v10  ;;  %v559_v14 = vadd.f32 %v558_v11, %v1668_v6  ;;  %v630_v59 = vadd.f32 %v629_v32, %v1668_v6 }
 0x11d   : > { %vm1058_vm1 = vcmp.gt.f32.partialorder %v557_v9, 0.0  ;;  %vm1060_vm2 = vcmp.gt.f32.partialorder %v628_v10, 0.0 }
 0x11e   : > { %vm1059_vm3 = vcmp.gt.f32.partialorder %v559_v14, 0.0  ;;  %v1075_v15 = vmul.f32 0.2, %v559_v14  ;;  %vm1061_vm4 = vcmp.gt.f32.partialorder %v630_v59, 0.0  ;;  %v1077_v16 = vmul.f32 0.2, %v630_v59 }
 0x11f   : > { %v1090_v17 = vsel %vm1058_vm1, %v557_v9, %v1074_v12  ;;  %v1092_v18 = vsel %vm1060_vm2, %v628_v10, %v1076_v13 }
 0x120   : > { %v1091_v19 = vsel %vm1059_vm3, %v559_v14, %v1075_v15  ;;  %v1093_v20 = vsel %vm1061_vm4, %v630_v59, %v1077_v16 }
 0x121   : > { %v1122_v21 = vcombine.low %v1090_v17, %v1091_v19  ;;  %v1123_v22 = vcombine.low %v1092_v18, %v1093_v20 }
 0x123   : > { %1138 = vst [vmem:[%s1677_s11] sm:$0xff] %v1122_v21  ;;  %1139 = vst [vmem:[%s1677_s11 + $0x8] sm:$0xff] %v1123_v22 }
 0x127   : > { %v698_v23 = vpop.f32.mrf.mxu0  ;;  %v769_v24 = vpop.f32.mrf.mxu1 }
 0x128   : > { %v699_v25 = vadd.f32 %v698_v23, %v1668_v6  ;;  %v770_v26 = vadd.f32 %v769_v24, %v1668_v6 }
 0x129   : > { %v700_v27 = vpop.f32.mrf.mxu0  ;;  %v771_v28 = vpop.f32.mrf.mxu1 }
 0x12a   : > { %v1078_v29 = vmul.f32 0.2, %v699_v25  ;;  %v1080_v30 = vmul.f32 0.2, %v770_v26  ;;  %v701_v31 = vadd.f32 %v700_v27, %v1668_v6  ;;  %v772_v33 = vadd.f32 %v771_v28, %v1668_v6 }
 0x12b   : > { %vm1062_vm5 = vcmp.gt.f32.partialorder %v699_v25, 0.0  ;;  %vm1064_vm6 = vcmp.gt.f32.partialorder %v770_v26, 0.0 }
 0x12c   : > { %vm1063_vm7 = vcmp.gt.f32.partialorder %v701_v31, 0.0  ;;  %v1079_v34 = vmul.f32 0.2, %v701_v31  ;;  %vm1065_vm8 = vcmp.gt.f32.partialorder %v772_v33, 0.0  ;;  %v1081_v35 = vmul.f32 0.2, %v772_v33 }
 0x12d   : > { %v1094_v36 = vsel %vm1062_vm5, %v699_v25, %v1078_v29  ;;  %v1096_v37 = vsel %vm1064_vm6, %v770_v26, %v1080_v30 }
 0x12e   : > { %v1095_v38 = vsel %vm1063_vm7, %v701_v31, %v1079_v34  ;;  %v1097_v39 = vsel %vm1065_vm8, %v772_v33, %v1081_v35 }
 0x12f   : > { %v1124_v40 = vcombine.low %v1094_v36, %v1095_v38  ;;  %v1125_v41 = vcombine.low %v1096_v37, %v1097_v39 }
 0x131   : > { %1140 = vst [vmem:[%s1677_s11 + $0x10] sm:$0xff] %v1124_v40  ;;  %1141 = vst [vmem:[%s1677_s11 + $0x18] sm:$0xff] %v1125_v41 }
 0x135   : > { %v840_v42 = vpop.f32.mrf.mxu0  ;;  %v911_v43 = vpop.f32.mrf.mxu1 }
 0x136   : > { %v841_v44 = vadd.f32 %v840_v42, %v1668_v6  ;;  %v912_v45 = vadd.f32 %v911_v43, %v1668_v6 }
 0x137   : > { %v842_v46 = vpop.f32.mrf.mxu0  ;;  %v913_v47 = vpop.f32.mrf.mxu1 }
 0x138   : > { %v1082_v48 = vmul.f32 0.2, %v841_v44  ;;  %v1084_v49 = vmul.f32 0.2, %v912_v45  ;;  %v843_v50 = vadd.f32 %v842_v46, %v1668_v6  ;;  %v914_v51 = vadd.f32 %v913_v47, %v1668_v6 }
 0x139   : > { %vm1066_vm9 = vcmp.gt.f32.partialorder %v841_v44, 0.0  ;;  %vm1068_vm10 = vcmp.gt.f32.partialorder %v912_v45, 0.0 }
 0x13a   : > { %vm1067_vm11 = vcmp.gt.f32.partialorder %v843_v50, 0.0  ;;  %v1083_v52 = vmul.f32 0.2, %v843_v50  ;;  %vm1069_vm12 = vcmp.gt.f32.partialorder %v914_v51, 0.0  ;;  %v1085_v53 = vmul.f32 0.2, %v914_v51 }
 0x13b   : > { %v1098_v54 = vsel %vm1066_vm9, %v841_v44, %v1082_v48  ;;  %v1100_v55 = vsel %vm1068_vm10, %v912_v45, %v1084_v49 }
 0x13c   : > { %v1099_v56 = vsel %vm1067_vm11, %v843_v50, %v1083_v52  ;;  %v1101_v57 = vsel %vm1069_vm12, %v914_v51, %v1085_v53 }
 0x13d   : > { %v1126_v58 = vcombine.low %v1098_v54, %v1099_v56  ;;  %v1127_v60 = vcombine.low %v1100_v55, %v1101_v57 }
 0x13f   : > { %1142 = vst [vmem:[%s1677_s11 + $0x20] sm:$0xff] %v1126_v58  ;;  %1143 = vst [vmem:[%s1677_s11 + $0x28] sm:$0xff] %v1127_v60 }
 0x143   : > { %v982_v61 = vpop.f32.mrf.mxu0  ;;  %v1053_v62 = vpop.f32.mrf.mxu1 }
 0x144   : > { %v983_v63 = vadd.f32 %v982_v61, %v1668_v6  ;;  %v1054_v0 = vadd.f32 %v1053_v62, %v1668_v6 }
 0x145   : > { %v984_v1 = vpop.f32.mrf.mxu0  ;;  %v1055_v2 = vpop.f32.mrf.mxu1 }
 0x146   : > { %v1086_v3 = vmul.f32 0.2, %v983_v63  ;;  %v1088_v4 = vmul.f32 0.2, %v1054_v0  ;;  %v985_v5 = vadd.f32 %v984_v1, %v1668_v6  ;;  %v1056_v7 = vadd.f32 %v1055_v2, %v1668_v6 }
 0x147   : > { %vm1070_vm13 = vcmp.gt.f32.partialorder %v983_v63, 0.0  ;;  %vm1072_vm14 = vcmp.gt.f32.partialorder %v1054_v0, 0.0 }
 0x148   : > { %vm1071_vm15 = vcmp.gt.f32.partialorder %v985_v5, 0.0  ;;  %v1087_v8 = vmul.f32 0.2, %v985_v5  ;;  %vm1073_vm0 = vcmp.gt.f32.partialorder %v1056_v7, 0.0  ;;  %v1089_v9 = vmul.f32 0.2, %v1056_v7 }
 0x149   : > { %v1102_v10 = vsel %vm1070_vm13, %v983_v63, %v1086_v3  ;;  %v1104_v11 = vsel %vm1072_vm14, %v1054_v0, %v1088_v4 }
 0x14a   : > { %v1103_v32 = vsel %vm1071_vm15, %v985_v5, %v1087_v8  ;;  %v1105_v12 = vsel %vm1073_vm0, %v1056_v7, %v1089_v9 }
 0x14b   : > { %v1128_v13 = vcombine.low %v1102_v10, %v1103_v32  ;;  %v1129_v14 = vcombine.low %v1104_v11, %v1105_v12 }
 0x14d   : > { %1144 = vst [vmem:[%s1677_s11 + $0x30] sm:$0xff] %v1128_v13  ;;  %1145 = vst [vmem:[%s1677_s11 + $0x38] sm:$0xff] %v1129_v14 }
 0x14e PF: > { %p10_p9 = scmp.ge.s32.totalorder %s1320_s16, 6   ;;  %s1713_s12 = smov %s1275_s13 }
 0x14f   : > { %s1714_s13 = smov %s1329_s19  ;;  %s1715_s14 = smov %s1320_s16 }
 0x150   :  { %12 = sbr.rel (!%p10_p9) target bundleno = 2 (0x2), region = 90 }

// kernel: discriminator_forward.6
= control target key start
LH: loop header
LB: loop body
LE: loop exit
PB: predicated region body
PF: predicated region fallthrough
CT: control target
= control target key end

     0   :  { %v915_v3 = vmov 0.0   ;;  %vm146_vm0 = vcmask 523264   ;;  %s1440_s3 = inlined_call_operand.vmem [shape: f32[64,2048], index: 3, kind: input, shape index: {}]   ;;  %s1441_s0 = inlined_call_operand.vmem [shape: f32[8,64], index: 0, kind: input, shape index: {}]   ;;  %s1442_s1 = inlined_call_operand.vmem [shape: f32[8,1], index: 1, kind: input, shape index: {}]   ;;  %s1443_s2 = inlined_call_operand.vmem [shape: f32[8,1], index: 2, kind: input, shape index: {}]   ;;  %s1444_s4 = inlined_call_operand.vmem [shape: f32[8,2048], index: 4, kind: output, shape index: {}]  }
   0x1   :  { %v131_v0 = vld [vmem:[%s1440_s3 + $0x388] sm:$0xff]  ;;  %v130_v1 = vld [vmem:[%s1440_s3 + $0x380] sm:$0xff]  ;;  %214 = vmatprep.mubr.f32.mxu0 %v915_v3  ;;  %285 = vmatprep.mubr.f32.mxu1 %v915_v3  ;;  %v133_v4 = vld [vmem:[%s1440_s3 + $0x398] sm:$0xff] }
   0x2   :  { %v115_v2 = vld [vmem:[%s1440_s3 + $0x308] sm:$0xff]  ;;  %166 = vmatprep.subr.mxu0 %v131_v0  ;;  %v114_v5 = vld [vmem:[%s1440_s3 + $0x300] sm:$0xff]  ;;  %v132_v6 = vld [vmem:[%s1440_s3 + $0x390] sm:$0xff]  ;;  %237 = vmatprep.subr.mxu1 %v133_v4 }
   0x3   :  { %167 = vmatpush1.msra.mxu0 %v130_v1  ;;  %v99_v7 = vld [vmem:[%s1440_s3 + $0x288] sm:$0xff]  ;;  %v117_v8 = vld [vmem:[%s1440_s3 + $0x318] sm:$0xff]  ;;  %238 = vmatpush1.msra.mxu1 %v132_v6  ;;  %v98_v9 = vld [vmem:[%s1440_s3 + $0x280] sm:$0xff] }
   0x4   :  { %168 = vmatprep.subr.mxu0 %v115_v2  ;;  %v116_v10 = vld [vmem:[%s1440_s3 + $0x310] sm:$0xff]  ;;  %v101_v11 = vld [vmem:[%s1440_s3 + $0x298] sm:$0xff]  ;;  %239 = vmatprep.subr.mxu1 %v117_v8  ;;  %v83_v12 = vld [vmem:[%s1440_s3 + $0x208] sm:$0xff] }
   0x5   :  { %169 = vmatpush1.msra.mxu0 %v114_v5  ;;  %v100_v13 = vld [vmem:[%s1440_s3 + $0x290] sm:$0xff]  ;;  %240 = vmatpush1.msra.mxu1 %v116_v10  ;;  %v82_v14 = vld [vmem:[%s1440_s3 + $0x200] sm:$0xff]  ;;  %v85_v15 = vld [vmem:[%s1440_s3 + $0x218] sm:$0xff] }
   0x6   :  { %170 = vmatprep.subr.mxu0 %v99_v7  ;;  %241 = vmatprep.subr.mxu1 %v101_v11  ;;  %v67_v16 = vld [vmem:[%s1440_s3 + $0x188] sm:$0xff]  ;;  %v84_v17 = vld [vmem:[%s1440_s3 + $0x210] sm:$0xff]  ;;  %v66_v18 = vld [vmem:[%s1440_s3 + $0x180] sm:$0xff] }
   0x7   :  { %171 = vmatpush1.msra.mxu0 %v98_v9  ;;  %242 = vmatpush1.msra.mxu1 %v100_v13  ;;  %v69_v19 = vld [vmem:[%s1440_s3 + $0x198] sm:$0xff]  ;;  %v51_v20 = vld [vmem:[%s1440_s3 + $0x108] sm:$0xff]  ;;  %v68_v21 = vld [vmem:[%s1440_s3 + $0x190] sm:$0xff] }
   0x8   :  { %172 = vmatprep.subr.mxu0 %v83_v12  ;;  %243 = vmatprep.subr.mxu1 %v85_v15  ;;  %v50_v22 = vld [vmem:[%s1440_s3 + $0x100] sm:$0xff]  ;;  %v53_v23 = vld [vmem:[%s1440_s3 + $0x118] sm:$0xff]  ;;  %v35_v24 = vld [vmem:[%s1440_s3 + $0x88] sm:$0xff] }
   0x9   :  { %173 = vmatpush1.msra.mxu0 %v82_v14  ;;  %244 = vmatpush1.msra.mxu1 %v84_v17  ;;  %v52_v25 = vld [vmem:[%s1440_s3 + $0x110] sm:$0xff]  ;;  %v34_v26 = vld [vmem:[%s1440_s3 + $0x80] sm:$0xff]  ;;  %v37_v27 = vld [vmem:[%s1440_s3 + $0x98] sm:$0xff] }
   0xa   :  { %174 = vmatprep.subr.mxu0 %v67_v16  ;;  %245 = vmatprep.subr.mxu1 %v69_v19  ;;  %v19_v28 = vld [vmem:[%s1440_s3 + $0x8] sm:$0xff]  ;;  %v36_v29 = vld [vmem:[%s1440_s3 + $0x90] sm:$0xff]  ;;  %v18_v30 = vld [vmem:[%s1440_s3] sm:$0xff] }
   0xb   :  { %175 = vmatpush1.msra.mxu0 %v66_v18  ;;  %246 = vmatpush1.msra.mxu1 %v68_v21  ;;  %v21_v31 = vld [vmem:[%s1440_s3 + $0x18] sm:$0xff]  ;;  %v1040_v32 = vld [vmem:[%s1441_s0] sm:$0xff]  ;;  %v135_v33 = vld [vmem:[%s1440_s3 + $0x3a8] sm:$0xff] }
   0xc   :  { %176 = vmatprep.subr.mxu0 %v51_v20  ;;  %247 = vmatprep.subr.mxu1 %v53_v23  ;;  %v20_v34 = vld [vmem:[%s1440_s3 + $0x10] sm:$0xff]  ;;  %v134_v35 = vld [vmem:[%s1440_s3 + $0x3a0] sm:$0xff]  ;;  %v119_v36 = vld [vmem:[%s1440_s3 + $0x328] sm:$0xff] }
   0xd   :  { %177 = vmatpush1.msra.mxu0 %v50_v22  ;;  %248 = vmatpush1.msra.mxu1 %v52_v25  ;;  %v137_v37 = vld [vmem:[%s1440_s3 + $0x3b8] sm:$0xff]  ;;  %v118_v38 = vld [vmem:[%s1440_s3 + $0x320] sm:$0xff]  ;;  %v136_v39 = vld [vmem:[%s1440_s3 + $0x3b0] sm:$0xff] }
   0xe   :  { %178 = vmatprep.subr.mxu0 %v35_v24  ;;  %249 = vmatprep.subr.mxu1 %v37_v27  ;;  %v103_v40 = vld [vmem:[%s1440_s3 + $0x2a8] sm:$0xff]  ;;  %v121_v41 = vld [vmem:[%s1440_s3 + $0x338] sm:$0xff]  ;;  %v102_v42 = vld [vmem:[%s1440_s3 + $0x2a0] sm:$0xff] }
   0xf   :  { %179 = vmatpush1.msra.mxu0 %v34_v26  ;;  %250 = vmatpush1.msra.mxu1 %v36_v29  ;;  %v120_v43 = vld [vmem:[%s1440_s3 + $0x330] sm:$0xff]  ;;  %v87_v44 = vld [vmem:[%s1440_s3 + $0x228] sm:$0xff]  ;;  %v105_v45 = vld [vmem:[%s1440_s3 + $0x2b8] sm:$0xff] }
  0x10   :  { %180 = vmatprep.subr.mxu0 %v19_v28  ;;  %251 = vmatprep.subr.mxu1 %v21_v31  ;;  %v86_v46 = vld [vmem:[%s1440_s3 + $0x220] sm:$0xff]  ;;  %v104_v47 = vld [vmem:[%s1440_s3 + $0x2b0] sm:$0xff]  ;;  %v71_v48 = vld [vmem:[%s1440_s3 + $0x1a8] sm:$0xff] }
  0x11   :  { %181 = vmatpush1.msra.mxu0 %v18_v30  ;;  %252 = vmatpush1.msra.mxu1 %v20_v34  ;;  %v89_v49 = vld [vmem:[%s1440_s3 + $0x238] sm:$0xff]  ;;  %v70_v50 = vld [vmem:[%s1440_s3 + $0x1a0] sm:$0xff]  ;;  %v88_v51 = vld [vmem:[%s1440_s3 + $0x230] sm:$0xff] }
  0x12   :  { %901 = vmatmul.mubr.msk.f32.vlgmr.msra.gmra.mxu0 %vm146_vm0, %v1040_v32  ;;  %308 = vmatprep.subr.mxu0 %v135_v33  ;;  %v55_v52 = vld [vmem:[%s1440_s3 + $0x128] sm:$0xff]  ;;  %v73_v53 = vld [vmem:[%s1440_s3 + $0x1b8] sm:$0xff]  ;;  %v54_v54 = vld [vmem:[%s1440_s3 + $0x120] sm:$0xff] }
  0x13   :  { %309 = vmatpush1.msra.mxu0 %v134_v35  ;;  %379 = vmatprep.subr.mxu1 %v137_v37  ;;  %v72_v55 = vld [vmem:[%s1440_s3 + $0x1b0] sm:$0xff]  ;;  %v39_v56 = vld [vmem:[%s1440_s3 + $0xa8] sm:$0xff]  ;;  %v57_v57 = vld [vmem:[%s1440_s3 + $0x138] sm:$0xff] }
  0x14   :  { %310 = vmatprep.subr.mxu0 %v119_v36  ;;  %902 = vmatmul.mubr.msk.f32.vlgmr.msra.gmra.mxu1 %vm146_vm0, %v1040_v32  ;;  %v38_v58 = vld [vmem:[%s1440_s3 + $0xa0] sm:$0xff]  ;;  %v56_v59 = vld [vmem:[%s1440_s3 + $0x130] sm:$0xff]  ;;  %v23_v60 = vld [vmem:[%s1440_s3 + $0x28] sm:$0xff] }
  0x15   :  { %311 = vmatpush1.msra.mxu0 %v118_v38  ;;  %380 = vmatpush1.msra.mxu1 %v136_v39  ;;  %v41_v61 = vld [vmem:[%s1440_s3 + $0xb8] sm:$0xff]  ;;  %v22_v62 = vld [vmem:[%s1440_s3 + $0x20] sm:$0xff]  ;;  %v40_v63 = vld [vmem:[%s1440_s3 + $0xb0] sm:$0xff] }
  0x16   :  { %312 = vmatprep.subr.mxu0 %v103_v40  ;;  %381 = vmatprep.subr.mxu1 %v121_v41  ;;  %v25_v0 = vld [vmem:[%s1440_s3 + $0x38] sm:$0xff]  ;;  %v139_v1 = vld [vmem:[%s1440_s3 + $0x3c8] sm:$0xff]  ;;  %v24_v2 = vld [vmem:[%s1440_s3 + $0x30] sm:$0xff] }
  0x17   :  { %313 = vmatpush1.msra.mxu0 %v102_v42  ;;  %382 = vmatpush1.msra.mxu1 %v120_v43  ;;  %v138_v4 = vld [vmem:[%s1440_s3 + $0x3c0] sm:$0xff]  ;;  %v123_v5 = vld [vmem:[%s1440_s3 + $0x348] sm:$0xff]  ;;  %v141_v6 = vld [vmem:[%s1440_s3 + $0x3d8] sm:$0xff] }
  0x18   :  { %314 = vmatprep.subr.mxu0 %v87_v44  ;;  %383 = vmatprep.subr.mxu1 %v105_v45  ;;  %v122_v7 = vld [vmem:[%s1440_s3 + $0x340] sm:$0xff]  ;;  %v140_v8 = vld [vmem:[%s1440_s3 + $0x3d0] sm:$0xff]  ;;  %v107_v9 = vld [vmem:[%s1440_s3 + $0x2c8] sm:$0xff] }
  0x19   :  { %315 = vmatpush1.msra.mxu0 %v86_v46  ;;  %384 = vmatpush1.msra.mxu1 %v104_v47  ;;  %v125_v10 = vld [vmem:[%s1440_s3 + $0x358] sm:$0xff]  ;;  %v106_v11 = vld [vmem:[%s1440_s3 + $0x2c0] sm:$0xff]  ;;  %v124_v12 = vld [vmem:[%s1440_s3 + $0x350] sm:$0xff] }
  0x1a   :  { %316 = vmatprep.subr.mxu0 %v71_v48  ;;  %385 = vmatprep.subr.mxu1 %v89_v49  ;;  %v91_v13 = vld [vmem:[%s1440_s3 + $0x248] sm:$0xff]  ;;  %v109_v14 = vld [vmem:[%s1440_s3 + $0x2d8] sm:$0xff]  ;;  %v90_v15 = vld [vmem:[%s1440_s3 + $0x240] sm:$0xff] }
  0x1b   :  { %317 = vmatpush1.msra.mxu0 %v70_v50  ;;  %386 = vmatpush1.msra.mxu1 %v88_v51  ;;  %v108_v16 = vld [vmem:[%s1440_s3 + $0x2d0] sm:$0xff]  ;;  %v75_v17 = vld [vmem:[%s1440_s3 + $0x1c8] sm:$0xff]  ;;  %v93_v18 = vld [vmem:[%s1440_s3 + $0x258] sm:$0xff] }
  0x1c   :  { %318 = vmatprep.subr.mxu0 %v55_v52  ;;  %387 = vmatprep.subr.mxu1 %v73_v53  ;;  %v74_v19 = vld [vmem:[%s1440_s3 + $0x1c0] sm:$0xff]  ;;  %v92_v20 = vld [vmem:[%s1440_s3 + $0x250] sm:$0xff]  ;;  %v59_v21 = vld [vmem:[%s1440_s3 + $0x148] sm:$0xff] }
  0x1d   :  { %319 = vmatpush1.msra.mxu0 %v54_v54  ;;  %388 = vmatpush1.msra.mxu1 %v72_v55  ;;  %v77_v22 = vld [vmem:[%s1440_s3 + $0x1d8] sm:$0xff]  ;;  %v58_v23 = vld [vmem:[%s1440_s3 + $0x140] sm:$0xff]  ;;  %v76_v24 = vld [vmem:[%s1440_s3 + $0x1d0] sm:$0xff] }
  0x1e   :  { %320 = vmatprep.subr.mxu0 %v39_v56  ;;  %389 = vmatprep.subr.mxu1 %v57_v57  ;;  %v43_v25 = vld [vmem:[%s1440_s3 + $0xc8] sm:$0xff]  ;;  %v61_v26 = vld [vmem:[%s1440_s3 + $0x158] sm:$0xff]  ;;  %v42_v27 = vld [vmem:[%s1440_s3 + $0xc0] sm:$0xff] }
  0x1f   :  { %321 = vmatpush1.msra.mxu0 %v38_v58  ;;  %390 = vmatpush1.msra.mxu1 %v56_v59  ;;  %v60_v28 = vld [vmem:[%s1440_s3 + $0x150] sm:$0xff]  ;;  %v27_v29 = vld [vmem:[%s1440_s3 + $0x48] sm:$0xff]  ;;  %v45_v30 = vld [vmem:[%s1440_s3 + $0xd8] sm:$0xff] }
  0x20   :  { %322 = vmatprep.subr.mxu0 %v23_v60  ;;  %391 = vmatprep.subr.mxu1 %v41_v61  ;;  %v26_v31 = vld [vmem:[%s1440_s3 + $0x40] sm:$0xff]  ;;  %v44_v33 = vld [vmem:[%s1440_s3 + $0xd0] sm:$0xff]  ;;  %v29_v34 = vld [vmem:[%s1440_s3 + $0x58] sm:$0xff] }
  0x21   :  { %323 = vmatpush1.msra.mxu0 %v22_v62  ;;  %356 = vmatprep.mubr.f32.mxu0 %v915_v3  ;;  %v143_v35 = vld [vmem:[%s1440_s3 + $0x3e8] sm:$0xff]  ;;  %v28_v36 = vld [vmem:[%s1440_s3 + $0x50] sm:$0xff]  ;;  %v142_v37 = vld [vmem:[%s1440_s3 + $0x3e0] sm:$0xff] }
  0x22   :  { %392 = vmatpush1.msra.mxu1 %v40_v63  ;;  %903 = vmatmul.mubr.msk.f32.vlgmr.msra.gmra.mxu0 %vm146_vm0, %v1040_v32  ;;  %v127_v38 = vld [vmem:[%s1440_s3 + $0x368] sm:$0xff]  ;;  %v145_v39 = vld [vmem:[%s1440_s3 + $0x3f8] sm:$0xff]  ;;  %v126_v40 = vld [vmem:[%s1440_s3 + $0x360] sm:$0xff] }
  0x23   :  { %393 = vmatprep.subr.mxu1 %v25_v0  ;;  %450 = vmatprep.subr.mxu0 %v139_v1  ;;  %v144_v41 = vld [vmem:[%s1440_s3 + $0x3f0] sm:$0xff]  ;;  %v111_v42 = vld [vmem:[%s1440_s3 + $0x2e8] sm:$0xff]  ;;  %v129_v43 = vld [vmem:[%s1440_s3 + $0x378] sm:$0xff] }
  0x24   :  { %394 = vmatpush1.msra.mxu1 %v24_v2  ;;  %451 = vmatpush1.msra.mxu0 %v138_v4  ;;  %v110_v44 = vld [vmem:[%s1440_s3 + $0x2e0] sm:$0xff]  ;;  %v128_v45 = vld [vmem:[%s1440_s3 + $0x370] sm:$0xff]  ;;  %v95_v46 = vld [vmem:[%s1440_s3 + $0x268] sm:$0xff] }
  0x25   :  { %427 = vmatprep.mubr.f32.mxu1 %v915_v3  ;;  %452 = vmatprep.subr.mxu0 %v123_v5  ;;  %v113_v47 = vld [vmem:[%s1440_s3 + $0x2f8] sm:$0xff]  ;;  %v94_v48 = vld [vmem:[%s1440_s3 + $0x260] sm:$0xff]  ;;  %v112_v49 = vld [vmem:[%s1440_s3 + $0x2f0] sm:$0xff] }
  0x26   :  { %521 = vmatprep.subr.mxu1 %v141_v6  ;;  %904 = vmatmul.mubr.msk.f32.vlgmr.msra.gmra.mxu1 %vm146_vm0, %v1040_v32  ;;  %v79_v50 = vld [vmem:[%s1440_s3 + $0x1e8] sm:$0xff]  ;;  %v97_v51 = vld [vmem:[%s1440_s3 + $0x278] sm:$0xff]  ;;  %v78_v52 = vld [vmem:[%s1440_s3 + $0x1e0] sm:$0xff] }
  0x27   :  { %453 = vmatpush1.msra.mxu0 %v122_v7  ;;  %522 = vmatpush1.msra.mxu1 %v140_v8  ;;  %v96_v53 = vld [vmem:[%s1440_s3 + $0x270] sm:$0xff]  ;;  %v63_v54 = vld [vmem:[%s1440_s3 + $0x168] sm:$0xff]  ;;  %v81_v55 = vld [vmem:[%s1440_s3 + $0x1f8] sm:$0xff] }
  0x28   :  { %454 = vmatprep.subr.mxu0 %v107_v9  ;;  %523 = vmatprep.subr.mxu1 %v125_v10  ;;  %v62_v56 = vld [vmem:[%s1440_s3 + $0x160] sm:$0xff]  ;;  %v80_v57 = vld [vmem:[%s1440_s3 + $0x1f0] sm:$0xff]  ;;  %v47_v58 = vld [vmem:[%s1440_s3 + $0xe8] sm:$0xff] }
  0x29   :  { %455 = vmatpush1.msra.mxu0 %v106_v11  ;;  %524 = vmatpush1.msra.mxu1 %v124_v12  ;;  %v65_v59 = vld [vmem:[%s1440_s3 + $0x178] sm:$0xff]  ;;  %v46_v60 = vld [vmem:[%s1440_s3 + $0xe0] sm:$0xff]  ;;  %v64_v61 = vld [vmem:[%s1440_s3 + $0x170] sm:$0xff] }
  0x2a   :  { %456 = vmatprep.subr.mxu0 %v91_v13  ;;  %525 = vmatprep.subr.mxu1 %v109_v14  ;;  %v31_v62 = vld [vmem:[%s1440_s3 + $0x68] sm:$0xff]  ;;  %v49_v63 = vld [vmem:[%s1440_s3 + $0xf8] sm:$0xff]  ;;  %v30_v0 = vld [vmem:[%s1440_s3 + $0x60] sm:$0xff] }
  0x2b   :  { %457 = vmatpush1.msra.mxu0 %v90_v15  ;;  %526 = vmatpush1.msra.mxu1 %v108_v16  ;;  %v48_v1 = vld [vmem:[%s1440_s3 + $0xf0] sm:$0xff]  ;;  %v33_v2 = vld [vmem:[%s1440_s3 + $0x78] sm:$0xff] }
  0x2c   :  { %458 = vmatprep.subr.mxu0 %v75_v17  ;;  %527 = vmatprep.subr.mxu1 %v93_v18  ;;  %v32_v4 = vld [vmem:[%s1440_s3 + $0x70] sm:$0xff] }
  0x2d   :  { %459 = vmatpush1.msra.mxu0 %v74_v19  ;;  %528 = vmatpush1.msra.mxu1 %v92_v20 }
  0x2e   :  { %460 = vmatprep.subr.mxu0 %v59_v21  ;;  %529 = vmatprep.subr.mxu1 %v77_v22 }
  0x2f   :  { %461 = vmatpush1.msra.mxu0 %v58_v23  ;;  %530 = vmatpush1.msra.mxu1 %v76_v24 }
  0x30   :  { %462 = vmatprep.subr.mxu0 %v43_v25  ;;  %531 = vmatprep.subr.mxu1 %v61_v26 }
  0x31   :  { %463 = vmatpush1.msra.mxu0 %v42_v27  ;;  %532 = vmatpush1.msra.mxu1 %v60_v28 }
  0x32   :  { %464 = vmatprep.subr.mxu0 %v27_v29  ;;  %533 = vmatprep.subr.mxu1 %v45_v30 }
  0x33   :  { %465 = vmatpush1.msra.mxu0 %v26_v31  ;;  %498 = vmatprep.mubr.f32.mxu0 %v915_v3 }
  0x34   :  { %534 = vmatpush1.msra.mxu1 %v44_v33  ;;  %905 = vmatmul.mubr.msk.f32.vlgmr.msra.gmra.mxu0 %vm146_vm0, %v1040_v32 }
  0x35   :  { %535 = vmatprep.subr.mxu1 %v29_v34  ;;  %592 = vmatprep.subr.mxu0 %v143_v35 }
  0x36   :  { %536 = vmatpush1.msra.mxu1 %v28_v36  ;;  %593 = vmatpush1.msra.mxu0 %v142_v37 }
  0x37   :  { %569 = vmatprep.mubr.f32.mxu1 %v915_v3  ;;  %594 = vmatprep.subr.mxu0 %v127_v38 }
  0x38   :  { %663 = vmatprep.subr.mxu1 %v145_v39  ;;  %906 = vmatmul.mubr.msk.f32.vlgmr.msra.gmra.mxu1 %vm146_vm0, %v1040_v32 }
  0x39   :  { %595 = vmatpush1.msra.mxu0 %v126_v40  ;;  %664 = vmatpush1.msra.mxu1 %v144_v41 }
  0x3a   :  { %596 = vmatprep.subr.mxu0 %v111_v42  ;;  %665 = vmatprep.subr.mxu1 %v129_v43 }
  0x3b   :  { %597 = vmatpush1.msra.mxu0 %v110_v44  ;;  %666 = vmatpush1.msra.mxu1 %v128_v45 }
  0x3c   :  { %598 = vmatprep.subr.mxu0 %v95_v46  ;;  %667 = vmatprep.subr.mxu1 %v113_v47 }
  0x3d   :  { %599 = vmatpush1.msra.mxu0 %v94_v48  ;;  %668 = vmatpush1.msra.mxu1 %v112_v49 }
  0x3e   :  { %600 = vmatprep.subr.mxu0 %v79_v50  ;;  %669 = vmatprep.subr.mxu1 %v97_v51 }
  0x3f   :  { %601 = vmatpush1.msra.mxu0 %v78_v52  ;;  %670 = vmatpush1.msra.mxu1 %v96_v53 }
  0x40   :  { %602 = vmatprep.subr.mxu0 %v63_v54  ;;  %671 = vmatprep.subr.mxu1 %v81_v55 }
  0x41   :  { %603 = vmatpush1.msra.mxu0 %v62_v56  ;;  %672 = vmatpush1.msra.mxu1 %v80_v57 }
  0x42   :  { %604 = vmatprep.subr.mxu0 %v47_v58  ;;  %673 = vmatprep.subr.mxu1 %v65_v59 }
  0x43   :  { %605 = vmatpush1.msra.mxu0 %v46_v60  ;;  %674 = vmatpush1.msra.mxu1 %v64_v61 }
  0x44   :  { %606 = vmatprep.subr.mxu0 %v31_v62  ;;  %675 = vmatprep.subr.mxu1 %v49_v63 }
  0x45   :  { %607 = vmatpush1.msra.mxu0 %v30_v0  ;;  %640 = vmatprep.mubr.f32.mxu0 %v915_v3 }
  0x46   :  { %676 = vmatpush1.msra.mxu1 %v48_v1  ;;  %907 = vmatmul.mubr.msk.f32.vlgmr.msra.gmra.mxu0 %vm146_vm0, %v1040_v32 }
  0x47   :  { %677 = vmatprep.subr.mxu1 %v33_v2  ;;  %711 = vmatprep.mubr.f32.mxu1 %v915_v3 }
  0x48   :  { %678 = vmatpush1.msra.mxu1 %v32_v4 }
  0x49   :  { %908 = vmatmul.mubr.msk.f32.vlgmr.msra.gmra.mxu1 %vm146_vm0, %v1040_v32 }
  0xd2   :  { %v216_v5 = vpop.f32.mrf.mxu0 }
  0xd4   :  { %v218_v6 = vpop.f32.mrf.mxu0  ;;  %v287_v8 = vpop.f32.mrf.mxu1 }
  0xd5   :  { %v718_v7 = vadd.f32 %v218_v6, %v216_v5 }
  0xd6   :  { %v289_v10 = vpop.f32.mrf.mxu1 }
  0xd7   :  { %v719_v9 = vadd.f32 %v718_v7, %v287_v8 }
  0xd9   :  { %v720_v12 = vadd.f32 %v719_v9, %v289_v10 }
  0xe2   :  { %v358_v11 = vpop.f32.mrf.mxu0 }
  0xe3   :  { %v721_v13 = vadd.f32 %v720_v12, %v358_v11 }
  0xe4   :  { %v360_v14 = vpop.f32.mrf.mxu0 }
  0xe5   :  { %v722_v15 = vadd.f32 %v721_v13, %v360_v14 }
  0xe6   :  { %v429_v16 = vpop.f32.mrf.mxu1 }
  0xe7   :  { %v723_v17 = vadd.f32 %v722_v15, %v429_v16 }
  0xe8   :  { %v431_v18 = vpop.f32.mrf.mxu1 }
  0xe9   :  { %v724_v20 = vadd.f32 %v723_v17, %v431_v18 }
  0xf4   :  { %v500_v19 = vpop.f32.mrf.mxu0 }
  0xf5   :  { %v725_v3 = vadd.f32 %v724_v20, %v500_v19 }
  0xf6   :  { %v502_v21 = vpop.f32.mrf.mxu0 }
  0xf7   :  { %v726_v22 = vadd.f32 %v725_v3, %v502_v21  ;;  %v916_v3 = vmov 0  }
  0xf8   :  { %v571_v32 = vpop.f32.mrf.mxu1  ;;  %911 = vset.pattern.permute.xlu1 %v916_v3  ;;  %912 = vset.pattern.permute.xlu0 %v916_v3 }
  0xf9   :  { %v727_v23 = vadd.f32 %v726_v22, %v571_v32 }
  0xfa   :  { %v573_v24 = vpop.f32.mrf.mxu1 }
  0xfb   :  { %v728_v25 = vadd.f32 %v727_v23, %v573_v24  ;;  %v786_v23 = vld [vmem:[%s1442_s1] sm:$0xff] }
 0x106   :  { %v642_v26 = vpop.f32.mrf.mxu0 }
 0x107   :  { %v729_v27 = vadd.f32 %v728_v25, %v642_v26 }
 0x108   :  { %v644_v28 = vpop.f32.mrf.mxu0 }
 0x109   :  { %v713_v29 = vpop.f32.mrf.mxu1  ;;  %v730_v30 = vadd.f32 %v729_v27, %v644_v28 }
 0x10b   :  { %v731_v31 = vadd.f32 %v730_v30, %v713_v29  ;;  %v715_v33 = vpop.f32.mrf.mxu1 }
 0x10d   :  { %v732_v34 = vadd.f32 %v731_v31, %v715_v33 }
 0x10f   :  { %733 = vadd.xlane.f32.xlu0 %v732_v34 }
 0x198   :  { %v734_v35 = vpop.xlane.xlu0 %733 }
 0x199   :  { %v735_v36 = vmul.f32 0.00048828125, %v734_v35 }
 0x19b   :  { %v1355_v37 = vsub.f32 %v216_v5, %v735_v36  ;;  %v1357_v38 = vsub.f32 %v218_v6, %v735_v36  ;;  %v1359_v39 = vsub.f32 %v287_v8, %v735_v36  ;;  %v739_v42 = vsub.f32 %v289_v10, %v735_v36 }
 0x19c   :  { %v740_v43 = vsub.f32 %v358_v11, %v735_v36  ;;  %v741_v46 = vsub.f32 %v360_v14, %v735_v36  ;;  %v742_v49 = vsub.f32 %v429_v16, %v735_v36  ;;  %v743_v52 = vsub.f32 %v431_v18, %v735_v36 }
 0x19d   :  { %v752_v40 = vmul.f32 %v1355_v37, %v1355_v37  ;;  %v753_v41 = vmul.f32 %v1357_v38, %v1357_v38  ;;  %v754_v44 = vmul.f32 %v1359_v39, %v1359_v39  ;;  %v755_v47 = vmul.f32 %v739_v42, %v739_v42 }
 0x19e   :  { %v756_v50 = vmul.f32 %v740_v43, %v740_v43  ;;  %v757_v53 = vmul.f32 %v741_v46, %v741_v46  ;;  %v744_v55 = vsub.f32 %v500_v19, %v735_v36  ;;  %v758_v56 = vmul.f32 %v742_v49, %v742_v49 }
 0x19f   :  { %v768_v45 = vadd.f32 %v753_v41, %v752_v40  ;;  %v745_v58 = vsub.f32 %v502_v21, %v735_v36  ;;  %v759_v59 = vmul.f32 %v743_v52, %v743_v52  ;;  %v746_v61 = vsub.f32 %v571_v32, %v735_v36 }
 0x1a0   :  { %v760_v62 = vmul.f32 %v744_v55, %v744_v55  ;;  %v747_v0 = vsub.f32 %v573_v24, %v735_v36  ;;  %v748_v4 = vsub.f32 %v642_v26, %v735_v36  ;;  %v749_v7 = vsub.f32 %v644_v28, %v735_v36  ;;  %v811_v26 = vld [vmem:[%s1443_s2] sm:$0xff] }
 0x1a1   :  { %v769_v48 = vadd.f32 %v768_v45, %v754_v44  ;;  %v761_v1 = vmul.f32 %v745_v58, %v745_v58  ;;  %v762_v5 = vmul.f32 %v746_v61, %v746_v61  ;;  %v750_v10 = vsub.f32 %v713_v29, %v735_v36 }
 0x1a2   :  { %v763_v8 = vmul.f32 %v747_v0, %v747_v0  ;;  %v764_v11 = vmul.f32 %v748_v4, %v748_v4  ;;  %v751_v13 = vsub.f32 %v715_v33, %v735_v36  ;;  %v765_v14 = vmul.f32 %v749_v7, %v749_v7 }
 0x1a3   :  { %v770_v51 = vadd.f32 %v769_v48, %v755_v47  ;;  %v766_v16 = vmul.f32 %v750_v10, %v750_v10 }
 0x1a4   :  { %v767_v18 = vmul.f32 %v751_v13, %v751_v13 }
 0x1a5   :  { %v771_v54 = vadd.f32 %v770_v51, %v756_v50 }
 0x1a7   :  { %v772_v57 = vadd.f32 %v771_v54, %v757_v53 }
 0x1a9   :  { %v773_v60 = vadd.f32 %v772_v57, %v758_v56 }
 0x1ab   :  { %v774_v63 = vadd.f32 %v773_v60, %v759_v59 }
 0x1ad   :  { %v775_v2 = vadd.f32 %v774_v63, %v760_v62 }
 0x1af   :  { %v776_v6 = vadd.f32 %v775_v2, %v761_v1 }
 0x1b1   :  { %v777_v9 = vadd.f32 %v776_v6, %v762_v5 }
 0x1b3   :  { %v778_v12 = vadd.f32 %v777_v9, %v763_v8 }
 0x1b5   :  { %v779_v15 = vadd.f32 %v778_v12, %v764_v11 }
 0x1b7   :  { %v780_v17 = vadd.f32 %v779_v15, %v765_v14 }
 0x1b9   :  { %v781_v19 = vadd.f32 %v780_v17, %v766_v16 }
 0x1bb   :  { %v782_v20 = vadd.f32 %v781_v19, %v767_v18 }
 0x1bd   :  { %783 = vadd.xlane.f32.xlu0 %v782_v20 }
 0x246   :  { %v784_v21 = vpop.xlane.xlu0 %783 }
 0x247   :  { %v785_v22 = vmul.f32 0.00048828125, %v784_v21 }
 0x249   :  { %v787_v32 = vadd.f32 1e-05, %v785_v22 }
 0x24b   :  { %913 = vrsqrt.f32 %v787_v32 }
 0x258   :  { %v914_v24 = vpop.eup %913 }
 0x259   :  { %v789_v25 = vmul.f32 %v914_v24, %v786_v23 }
 0x25b   :  { %792 = vperm.xlu1 %911, %v789_v25  }
 0x25f   :  { %814 = vperm.xlu1 %911, %v811_v26  }
 0x2d6   :  { %v793_v27 = vpop.permute.xlu1 %792 }
 0x2d7   :  { %v795_v28 = vmul.f32 %v793_v27, %v1355_v37  ;;  %v796_v29 = vmul.f32 %v793_v27, %v1357_v38  ;;  %v797_v30 = vmul.f32 %v793_v27, %v1359_v39  ;;  %v798_v31 = vmul.f32 %v793_v27, %v739_v42 }
 0x2d8   :  { %v799_v33 = vmul.f32 %v793_v27, %v740_v43  ;;  %v800_v34 = vmul.f32 %v793_v27, %v741_v46  ;;  %v801_v35 = vmul.f32 %v793_v27, %v742_v49  ;;  %v802_v36 = vmul.f32 %v793_v27, %v743_v52 }
 0x2d9   :  { %v803_v40 = vmul.f32 %v793_v27, %v744_v55  ;;  %v804_v41 = vmul.f32 %v793_v27, %v745_v58  ;;  %v805_v44 = vmul.f32 %v793_v27, %v746_v61  ;;  %v806_v45 = vmul.f32 %v793_v27, %v747_v0 }
 0x2da   :  { %v807_v47 = vmul.f32 %v793_v27, %v748_v4  ;;  %v808_v48 = vmul.f32 %v793_v27, %v749_v7  ;;  %v809_v50 = vmul.f32 %v793_v27, %v750_v10  ;;  %v810_v51 = vmul.f32 %v793_v27, %v751_v13  ;;  %v815_v53 = vpop.permute.xlu1 %814 }
 0x2db   :  { %v817_v54 = vadd.f32 %v815_v53, %v795_v28  ;;  %v818_v37 = vadd.f32 %v815_v53, %v796_v29  ;;  %v819_v56 = vadd.f32 %v815_v53, %v797_v30  ;;  %v820_v38 = vadd.f32 %v815_v53, %v798_v31 }
 0x2dc   :  { %v821_v57 = vadd.f32 %v815_v53, %v799_v33  ;;  %v822_v39 = vadd.f32 %v815_v53, %v800_v34  ;;  %v823_v42 = vadd.f32 %v815_v53, %v801_v35  ;;  %v824_v43 = vadd.f32 %v815_v53, %v802_v36 }
 0x2dd   :  { %v825_v46 = vadd.f32 %v815_v53, %v803_v40  ;;  %v826_v49 = vadd.f32 %v815_v53, %v804_v41  ;;  %v827_v52 = vadd.f32 %v815_v53, %v805_v44  ;;  %v828_v55 = vadd.f32 %v815_v53, %v806_v45 }
 0x2de   :  { %v829_v58 = vadd.f32 %v815_v53, %v807_v47  ;;  %v830_v59 = vadd.f32 %v815_v53, %v808_v48  ;;  %v831_v60 = vadd.f32 %v815_v53, %v809_v50  ;;  %v832_v61 = vadd.f32 %v815_v53, %v810_v51 }
 0x2df   :  { %vm833_vm1 = vcmp.gt.f32.partialorder %v817_v54, 0.0  ;;  %vm834_vm2 = vcmp.gt.f32.partialorder %v818_v37, 0.0  ;;  %vm835_vm3 = vcmp.gt.f32.partialorder %v819_v56, 0.0  ;;  %vm836_vm4 = vcmp.gt.f32.partialorder %v820_v38, 0.0 }
 0x2e0   :  { %vm837_vm5 = vcmp.gt.f32.partialorder %v821_v57, 0.0  ;;  %vm838_vm6 = vcmp.gt.f32.partialorder %v822_v39, 0.0  ;;  %vm839_vm7 = vcmp.gt.f32.partialorder %v823_v42, 0.0  ;;  %vm840_vm8 = vcmp.gt.f32.partialorder %v824_v43, 0.0 }
 0x2e1   :  { %vm841_vm9 = vcmp.gt.f32.partialorder %v825_v46, 0.0  ;;  %vm842_vm10 = vcmp.gt.f32.partialorder %v826_v49, 0.0  ;;  %vm843_vm11 = vcmp.gt.f32.partialorder %v827_v52, 0.0  ;;  %vm844_vm12 = vcmp.gt.f32.partialorder %v828_v55, 0.0 }
 0x2e2   :  { %vm845_vm13 = vcmp.gt.f32.partialorder %v829_v58, 0.0  ;;  %vm846_vm14 = vcmp.gt.f32.partialorder %v830_v59, 0.0  ;;  %vm847_vm15 = vcmp.gt.f32.partialorder %v831_v60, 0.0  ;;  %vm848_vm0 = vcmp.gt.f32.partialorder %v832_v61, 0.0 }
 0x2e3   :  { %v849_v62 = vmul.f32 0.2, %v817_v54  ;;  %v850_v63 = vmul.f32 0.2, %v818_v37  ;;  %v851_v0 = vmul.f32 0.2, %v819_v56 }
 0x2e4   :  { %v852_v1 = vmul.f32 0.2, %v820_v38  ;;  %v853_v2 = vmul.f32 0.2, %v821_v57  ;;  %v854_v4 = vmul.f32 0.2, %v822_v39 }
 0x2e5   :  { %v855_v5 = vmul.f32 0.2, %v823_v42  ;;  %v856_v6 = vmul.f32 0.2, %v824_v43  ;;  %v857_v7 = vmul.f32 0.2, %v825_v46  ;;  %v865_v8 = vsel %vm833_vm1, %v817_v54, %v849_v62 }
 0x2e6   :  { %v858_v9 = vmul.f32 0.2, %v826_v49  ;;  %v859_v10 = vmul.f32 0.2, %v827_v52  ;;  %v860_v11 = vmul.f32 0.2, %v828_v55  ;;  %v866_v12 = vsel %vm834_vm2, %v818_v37, %v850_v63  ;;  %881 = vst [vmem:[%s1444_s4] sm:$0xff] %v865_v8 }
 0x2e7   :  { %v861_v13 = vmul.f32 0.2, %v829_v58  ;;  %v862_v14 = vmul.f32 0.2, %v830_v59  ;;  %v863_v15 = vmul.f32 0.2, %v831_v60  ;;  %v867_v16 = vsel %vm835_vm3, %v819_v56, %v851_v0 }
 0x2e8   :  { %882 = vst [vmem:[%s1444_s4 + $0x8] sm:$0xff] %v866_v12  ;;  %v864_v17 = vmul.f32 0.2, %v832_v61  ;;  %v868_v18 = vsel %vm836_vm4, %v820_v38, %v852_v1  ;;  %v869_v19 = vsel %vm837_vm5, %v821_v57, %v853_v2  ;;  %v870_v20 = vsel %vm838_vm6, %v822_v39, %v854_v4  ;;  %883 = vst [vmem:[%s1444_s4 + $0x10] sm:$0xff] %v867_v16 }
 0x2e9   :  { %v871_v3 = vsel %vm839_vm7, %v823_v42, %v855_v5  ;;  %v872_v21 = vsel %vm840_vm8, %v824_v43, %v856_v6  ;;  %v873_v22 = vsel %vm841_vm9, %v825_v46, %v857_v7  ;;  %v874_v32 = vsel %vm842_vm10, %v826_v49, %v858_v9  ;;  %884 = vst [vmem:[%s1444_s4 + $0x18] sm:$0xff] %v868_v18 }
 0x2ea   :  { %885 = vst [vmem:[%s1444_s4 + $0x20] sm:$0xff] %v869_v19  ;;  %886 = vst [vmem:[%s1444_s4 + $0x28] sm:$0xff] %v870_v20  ;;  %v875_v23 = vsel %vm843_vm11, %v827_v52, %v859_v10  ;;  %v876_v24 = vsel %vm844_vm12, %v828_v55, %v860_v11  ;;  %v877_v25 = vsel %vm845_vm13, %v829_v58, %v861_v13 }
 0x2eb   :  { %v878_v26 = vsel %vm846_vm14, %v830_v59, %v862_v14  ;;  %887 = vst [vmem:[%s1444_s4 + $0x30] sm:$0xff] %v871_v3  ;;  %888 = vst [vmem:[%s1444_s4 + $0x38] sm:$0xff] %v872_v21  ;;  %v879_v27 = vsel %vm847_vm15, %v831_v60, %v863_v15  ;;  %v880_v28 = vsel %vm848_vm0, %v832_v61, %v864_v17 }
 0x2ec   :  { %889 = vst [vmem:[%s1444_s4 + $0x40] sm:$0xff] %v873_v22  ;;  %890 = vst [vmem:[%s1444_s4 + $0x48] sm:$0xff] %v874_v32 }
 0x2ed   :  { %891 = vst [vmem:[%s1444_s4 + $0x50] sm:$0xff] %v875_v23  ;;  %892 = vst [vmem:[%s1444_s4 + $0x58] sm:$0xff] %v876_v24 }
 0x2ee   :  { %893 = vst [vmem:[%s1444_s4 + $0x60] sm:$0xff] %v877_v25  ;;  %894 = vst [vmem:[%s1444_s4 + $0x68] sm:$0xff] %v878_v26 }
 0x2ef   :  { %895 = vst [vmem:[%s1444_s4 + $0x70] sm:$0xff] %v879_v27  ;;  %896 = vst [vmem:[%s1444_s4 + $0x78] sm:$0xff] %v880_v28 }

// kernel: discriminator_forward.7
= control target key start
LH: loop header
LB: loop body
LE: loop exit
PB: predicated region body
PF: predicated region fallthrough
CT: control target
= control target key end

     0   :  { %v367_v3 = vmov 0.0   ;;  %s637_s3 = inlined_call_operand.vmem [shape: f32[128,512], index: 3, kind: input, shape index: {}]   ;;  %s638_s0 = inlined_call_operand.vmem [shape: f32[16,128], index: 0, kind: input, shape index: {}]   ;;  %s639_s2 = inlined_call_operand.vmem [shape: f32[16,1], index: 2, kind: input, shape index: {}]   ;;  %s640_s1 = inlined_call_operand.vmem [shape: f32[16,1], index: 1, kind: input, shape index: {}]   ;;  %s641_s4 = inlined_call_operand.vmem [shape: f32[16,512], index: 4, kind: output, shape index: {}]  }
   0x1   :  { %v80_v0 = vld [vmem:[%s637_s3 + $0x1e8] sm:$0xff]  ;;  %v79_v1 = vld [vmem:[%s637_s3 + $0x1e0] sm:$0xff]  ;;  %147 = vmatprep.mubr.f32.mxu0 %v367_v3  ;;  %224 = vmatprep.mubr.f32.mxu1 %v367_v3  ;;  %v82_v4 = vld [vmem:[%s637_s3 + $0x1f8] sm:$0xff] }
   0x2   :  { %v76_v2 = vld [vmem:[%s637_s3 + $0x1c8] sm:$0xff]  ;;  %83 = vmatprep.subr.mxu0 %v80_v0  ;;  %v75_v5 = vld [vmem:[%s637_s3 + $0x1c0] sm:$0xff]  ;;  %v81_v6 = vld [vmem:[%s637_s3 + $0x1f0] sm:$0xff]  ;;  %160 = vmatprep.subr.mxu1 %v82_v4 }
   0x3   :  { %84 = vmatpush1.msra.mxu0 %v79_v1  ;;  %v72_v7 = vld [vmem:[%s637_s3 + $0x1a8] sm:$0xff]  ;;  %v78_v8 = vld [vmem:[%s637_s3 + $0x1d8] sm:$0xff]  ;;  %161 = vmatpush1.msra.mxu1 %v81_v6  ;;  %v71_v9 = vld [vmem:[%s637_s3 + $0x1a0] sm:$0xff] }
   0x4   :  { %85 = vmatprep.subr.mxu0 %v76_v2  ;;  %v77_v10 = vld [vmem:[%s637_s3 + $0x1d0] sm:$0xff]  ;;  %v74_v11 = vld [vmem:[%s637_s3 + $0x1b8] sm:$0xff]  ;;  %162 = vmatprep.subr.mxu1 %v78_v8  ;;  %v68_v12 = vld [vmem:[%s637_s3 + $0x188] sm:$0xff] }
   0x5   :  { %86 = vmatpush1.msra.mxu0 %v75_v5  ;;  %v73_v13 = vld [vmem:[%s637_s3 + $0x1b0] sm:$0xff]  ;;  %163 = vmatpush1.msra.mxu1 %v77_v10  ;;  %v67_v14 = vld [vmem:[%s637_s3 + $0x180] sm:$0xff]  ;;  %v70_v15 = vld [vmem:[%s637_s3 + $0x198] sm:$0xff] }
   0x6   :  { %87 = vmatprep.subr.mxu0 %v72_v7  ;;  %164 = vmatprep.subr.mxu1 %v74_v11  ;;  %v64_v16 = vld [vmem:[%s637_s3 + $0x168] sm:$0xff]  ;;  %v69_v17 = vld [vmem:[%s637_s3 + $0x190] sm:$0xff]  ;;  %v63_v18 = vld [vmem:[%s637_s3 + $0x160] sm:$0xff] }
   0x7   :  { %88 = vmatpush1.msra.mxu0 %v71_v9  ;;  %165 = vmatpush1.msra.mxu1 %v73_v13  ;;  %v66_v19 = vld [vmem:[%s637_s3 + $0x178] sm:$0xff]  ;;  %v60_v20 = vld [vmem:[%s637_s3 + $0x148] sm:$0xff]  ;;  %v65_v21 = vld [vmem:[%s637_s3 + $0x170] sm:$0xff] }
   0x8   :  { %89 = vmatprep.subr.mxu0 %v68_v12  ;;  %166 = vmatprep.subr.mxu1 %v70_v15  ;;  %v59_v22 = vld [vmem:[%s637_s3 + $0x140] sm:$0xff]  ;;  %v62_v23 = vld [vmem:[%s637_s3 + $0x158] sm:$0xff]  ;;  %v56_v24 = vld [vmem:[%s637_s3 + $0x128] sm:$0xff] }
   0x9   :  { %90 = vmatpush1.msra.mxu0 %v67_v14  ;;  %167 = vmatpush1.msra.mxu1 %v69_v17  ;;  %v61_v25 = vld [vmem:[%s637_s3 + $0x150] sm:$0xff]  ;;  %v55_v26 = vld [vmem:[%s637_s3 + $0x120] sm:$0xff]  ;;  %v58_v27 = vld [vmem:[%s637_s3 + $0x138] sm:$0xff] }
   0xa   :  { %91 = vmatprep.subr.mxu0 %v64_v16  ;;  %168 = vmatprep.subr.mxu1 %v66_v19  ;;  %v52_v28 = vld [vmem:[%s637_s3 + $0x108] sm:$0xff]  ;;  %v57_v29 = vld [vmem:[%s637_s3 + $0x130] sm:$0xff]  ;;  %v51_v30 = vld [vmem:[%s637_s3 + $0x100] sm:$0xff] }
   0xb   :  { %92 = vmatpush1.msra.mxu0 %v63_v18  ;;  %169 = vmatpush1.msra.mxu1 %v65_v21  ;;  %v54_v31 = vld [vmem:[%s637_s3 + $0x118] sm:$0xff]  ;;  %v48_v32 = vld [vmem:[%s637_s3 + $0xe8] sm:$0xff]  ;;  %v53_v33 = vld [vmem:[%s637_s3 + $0x110] sm:$0xff] }
   0xc   :  { %93 = vmatprep.subr.mxu0 %v60_v20  ;;  %170 = vmatprep.subr.mxu1 %v62_v23  ;;  %v47_v34 = vld [vmem:[%s637_s3 + $0xe0] sm:$0xff]  ;;  %v50_v35 = vld [vmem:[%s637_s3 + $0xf8] sm:$0xff]  ;;  %v44_v36 = vld [vmem:[%s637_s3 + $0xc8] sm:$0xff] }
   0xd   :  { %94 = vmatpush1.msra.mxu0 %v59_v22  ;;  %171 = vmatpush1.msra.mxu1 %v61_v25  ;;  %v49_v37 = vld [vmem:[%s637_s3 + $0xf0] sm:$0xff]  ;;  %v43_v38 = vld [vmem:[%s637_s3 + $0xc0] sm:$0xff]  ;;  %v46_v39 = vld [vmem:[%s637_s3 + $0xd8] sm:$0xff] }
   0xe   :  { %95 = vmatprep.subr.mxu0 %v56_v24  ;;  %172 = vmatprep.subr.mxu1 %v58_v27  ;;  %v40_v40 = vld [vmem:[%s637_s3 + $0xa8] sm:$0xff]  ;;  %v45_v41 = vld [vmem:[%s637_s3 + $0xd0] sm:$0xff]  ;;  %v39_v42 = vld [vmem:[%s637_s3 + $0xa0] sm:$0xff] }
   0xf   :  { %96 = vmatpush1.msra.mxu0 %v55_v26  ;;  %173 = vmatpush1.msra.mxu1 %v57_v29  ;;  %v42_v43 = vld [vmem:[%s637_s3 + $0xb8] sm:$0xff]  ;;  %v36_v44 = vld [vmem:[%s637_s3 + $0x88] sm:$0xff]  ;;  %v41_v45 = vld [vmem:[%s637_s3 + $0xb0] sm:$0xff] }
  0x10   :  { %97 = vmatprep.subr.mxu0 %v52_v28  ;;  %174 = vmatprep.subr.mxu1 %v54_v31  ;;  %v35_v46 = vld [vmem:[%s637_s3 + $0x80] sm:$0xff]  ;;  %v38_v47 = vld [vmem:[%s637_s3 + $0x98] sm:$0xff]  ;;  %v32_v48 = vld [vmem:[%s637_s3 + $0x68] sm:$0xff] }
  0x11   :  { %98 = vmatpush1.msra.mxu0 %v51_v30  ;;  %175 = vmatpush1.msra.mxu1 %v53_v33  ;;  %v37_v49 = vld [vmem:[%s637_s3 + $0x90] sm:$0xff]  ;;  %v31_v50 = vld [vmem:[%s637_s3 + $0x60] sm:$0xff]  ;;  %v34_v51 = vld [vmem:[%s637_s3 + $0x78] sm:$0xff] }
  0x12   :  { %99 = vmatprep.subr.mxu0 %v48_v32  ;;  %176 = vmatprep.subr.mxu1 %v50_v35  ;;  %v28_v52 = vld [vmem:[%s637_s3 + $0x48] sm:$0xff]  ;;  %v33_v53 = vld [vmem:[%s637_s3 + $0x70] sm:$0xff]  ;;  %v27_v54 = vld [vmem:[%s637_s3 + $0x40] sm:$0xff] }
  0x13   :  { %100 = vmatpush1.msra.mxu0 %v47_v34  ;;  %177 = vmatpush1.msra.mxu1 %v49_v37  ;;  %v30_v55 = vld [vmem:[%s637_s3 + $0x58] sm:$0xff]  ;;  %v24_v56 = vld [vmem:[%s637_s3 + $0x28] sm:$0xff]  ;;  %v29_v57 = vld [vmem:[%s637_s3 + $0x50] sm:$0xff] }
  0x14   :  { %101 = vmatprep.subr.mxu0 %v44_v36  ;;  %178 = vmatprep.subr.mxu1 %v46_v39  ;;  %v23_v58 = vld [vmem:[%s637_s3 + $0x20] sm:$0xff]  ;;  %v26_v59 = vld [vmem:[%s637_s3 + $0x38] sm:$0xff]  ;;  %v20_v60 = vld [vmem:[%s637_s3 + $0x8] sm:$0xff] }
  0x15   :  { %102 = vmatpush1.msra.mxu0 %v43_v38  ;;  %179 = vmatpush1.msra.mxu1 %v45_v41  ;;  %v25_v61 = vld [vmem:[%s637_s3 + $0x30] sm:$0xff]  ;;  %v19_v62 = vld [vmem:[%s637_s3] sm:$0xff]  ;;  %v22_v63 = vld [vmem:[%s637_s3 + $0x18] sm:$0xff] }
  0x16   :  { %103 = vmatprep.subr.mxu0 %v40_v40  ;;  %180 = vmatprep.subr.mxu1 %v42_v43  ;;  %v17_v0 = vld [vmem:[%s638_s0] sm:$0xff]  ;;  %v21_v1 = vld [vmem:[%s637_s3 + $0x10] sm:$0xff]  ;;  %v18_v2 = vld [vmem:[%s638_s0 + $0x8] sm:$0xff]  ;;  %v368_v43 = vmov 0  }
  0x17   :  { %104 = vmatpush1.msra.mxu0 %v39_v42  ;;  %181 = vmatpush1.msra.mxu1 %v41_v45 }
  0x18   :  { %105 = vmatprep.subr.mxu0 %v36_v44  ;;  %182 = vmatprep.subr.mxu1 %v38_v47  ;;  %v303_v44 = vld [vmem:[%s639_s2] sm:$0xff] }
  0x19   :  { %106 = vmatpush1.msra.mxu0 %v35_v46  ;;  %183 = vmatpush1.msra.mxu1 %v37_v49 }
  0x1a   :  { %107 = vmatprep.subr.mxu0 %v32_v48  ;;  %184 = vmatprep.subr.mxu1 %v34_v51  ;;  %v277_v51 = vld [vmem:[%s640_s1] sm:$0xff] }
  0x1b   :  { %108 = vmatpush1.msra.mxu0 %v31_v50  ;;  %185 = vmatpush1.msra.mxu1 %v33_v53 }
  0x1c   :  { %109 = vmatprep.subr.mxu0 %v28_v52  ;;  %186 = vmatprep.subr.mxu1 %v30_v55 }
  0x1d   :  { %110 = vmatpush1.msra.mxu0 %v27_v54  ;;  %187 = vmatpush1.msra.mxu1 %v29_v57  ;;  %v278_v54 = vld [vmem:[%s640_s1 + $0x8] sm:$0xff] }
  0x1e   :  { %111 = vmatprep.subr.mxu0 %v24_v56  ;;  %188 = vmatprep.subr.mxu1 %v26_v59  ;;  %v304_v57 = vld [vmem:[%s639_s2 + $0x8] sm:$0xff] }
  0x1f   :  { %112 = vmatpush1.msra.mxu0 %v23_v58  ;;  %189 = vmatpush1.msra.mxu1 %v25_v61 }
  0x20   :  { %113 = vmatprep.subr.mxu0 %v20_v60  ;;  %190 = vmatprep.subr.mxu1 %v22_v63 }
  0x21   :  { %114 = vmatpush1.msra.mxu0 %v19_v62  ;;  %191 = vmatpush1.msra.mxu1 %v21_v1 }
  0x22   :  { %148 = vmatmul.mubr.f32.vlgmr.msra.gmra.mxu0 %v17_v0  ;;  %225 = vmatmul.mubr.f32.vlgmr.msra.gmra.mxu1 %v17_v0 }
  0x23   :  { %153 = vmatprep.mubr.f32.mxu0 %v367_v3  ;;  %230 = vmatprep.mubr.f32.mxu1 %v367_v3 }
  0x24   :  { %362 = vset.pattern.permute.xlu1 %v368_v43  ;;  %361 = vset.pattern.permute.xlu0 %v368_v43 }
  0x26   :  { %154 = vmatmul.mubr.f32.gmra.mxu0 %v18_v2  ;;  %231 = vmatmul.mubr.f32.gmra.mxu1 %v18_v2 }
  0xe2   :  { %v149_v4 = vpop.f32.mrf.mxu0  ;;  %v226_v5 = vpop.f32.mrf.mxu1 }
  0xe4   :  { %v151_v6 = vpop.f32.mrf.mxu0  ;;  %v228_v8 = vpop.f32.mrf.mxu1 }
  0xe5   :  { %v237_v7 = vadd.f32 %v151_v6, %v149_v4 }
  0xe6   :  { %v155_v9 = vpop.f32.mrf.mxu0  ;;  %v232_v12 = vpop.f32.mrf.mxu1 }
  0xe7   :  { %v238_v10 = vadd.f32 %v237_v7, %v226_v5 }
  0xe8   :  { %v157_v11 = vpop.f32.mrf.mxu0  ;;  %v234_v16 = vpop.f32.mrf.mxu1 }
  0xe9   :  { %v242_v13 = vadd.f32 %v157_v11, %v155_v9  ;;  %v239_v14 = vadd.f32 %v238_v10, %v228_v8 }
  0xeb   :  { %v243_v15 = vadd.f32 %v242_v13, %v232_v12  ;;  %240 = vadd.xlane.f32.xlu0 %v239_v14 }
  0xed   :  { %v244_v17 = vadd.f32 %v243_v15, %v234_v16 }
  0xef   :  { %245 = vadd.xlane.f32.xlu0 %v244_v17 }
 0x174   :  { %v241_v18 = vpop.xlane.xlu0 %240 }
 0x175   :  { %v247_v3 = vmul.f32 0.001953125, %v241_v18 }
 0x177   :  { %v249_v19 = vsub.f32 %v149_v4, %v247_v3  ;;  %v250_v20 = vsub.f32 %v151_v6, %v247_v3  ;;  %v251_v21 = vsub.f32 %v226_v5, %v247_v3  ;;  %v252_v23 = vsub.f32 %v228_v8, %v247_v3 }
 0x178   :  { %v246_v22 = vpop.xlane.xlu0 %245 }
 0x179   :  { %v248_v24 = vmul.f32 0.001953125, %v246_v22  ;;  %v257_v25 = vmul.f32 %v249_v19, %v249_v19  ;;  %v258_v26 = vmul.f32 %v250_v20, %v250_v20  ;;  %v259_v27 = vmul.f32 %v251_v21, %v251_v21 }
 0x17a   :  { %v260_v32 = vmul.f32 %v252_v23, %v252_v23 }
 0x17b   :  { %v253_v28 = vsub.f32 %v155_v9, %v248_v24  ;;  %v254_v29 = vsub.f32 %v157_v11, %v248_v24  ;;  %v265_v30 = vadd.f32 %v258_v26, %v257_v25  ;;  %v255_v31 = vsub.f32 %v232_v12, %v248_v24 }
 0x17c   :  { %v596_v34 = vsub.f32 %v234_v16, %v248_v24 }
 0x17d   :  { %v266_v33 = vadd.f32 %v265_v30, %v259_v27  ;;  %v261_v35 = vmul.f32 %v253_v28, %v253_v28  ;;  %v262_v36 = vmul.f32 %v254_v29, %v254_v29  ;;  %v263_v38 = vmul.f32 %v255_v31, %v255_v31 }
 0x17e   :  { %v264_v40 = vmul.f32 %v596_v34, %v596_v34 }
 0x17f   :  { %v267_v37 = vadd.f32 %v266_v33, %v260_v32  ;;  %v270_v39 = vadd.f32 %v262_v36, %v261_v35 }
 0x181   :  { %268 = vadd.xlane.f32.xlu1 %v267_v37  ;;  %v271_v41 = vadd.f32 %v270_v39, %v263_v38 }
 0x183   :  { %v272_v42 = vadd.f32 %v271_v41, %v264_v40 }
 0x185   :  { %273 = vadd.xlane.f32.xlu1 %v272_v42 }
 0x196   :  { %307 = vperm.xlu1 %362, %v303_v44  }
 0x20a   :  { %v269_v45 = vpop.xlane.xlu1 %268 }
 0x20b   :  { %v275_v46 = vmul.f32 0.001953125, %v269_v45 }
 0x20d   :  { %v279_v47 = vadd.f32 1e-05, %v275_v46 }
 0x20e   :  { %v274_v48 = vpop.xlane.xlu1 %273 }
 0x20f   :  { %363 = vrsqrt.f32 %v279_v47  ;;  %v276_v49 = vmul.f32 0.001953125, %v274_v48 }
 0x211   :  { %v280_v50 = vadd.f32 1e-05, %v276_v49 }
 0x212   :  { %v308_v58 = vpop.permute.xlu1 %307 }
 0x213   :  { %365 = vrsqrt.f32 %v280_v50 }
 0x21c   :  { %v364_v52 = vpop.eup %363 }
 0x21d   :  { %v283_v53 = vmul.f32 %v364_v52, %v277_v51 }
 0x21f   :  { %287 = vperm.xlu0 %361, %v283_v53  }
 0x220   :  { %v366_v55 = vpop.eup %365 }
 0x221   :  { %v284_v56 = vmul.f32 %v366_v55, %v278_v54 }
 0x223   :  { %292 = vperm.xlu1 %362, %v284_v56  }
 0x227   :  { %312 = vperm.xlu1 %362, %v304_v57  }
 0x29a   :  { %v288_v59 = vpop.permute.xlu0 %287 }
 0x29b   :  { %v295_v60 = vmul.f32 %v288_v59, %v249_v19  ;;  %v296_v61 = vmul.f32 %v288_v59, %v250_v20  ;;  %v297_v62 = vmul.f32 %v288_v59, %v251_v21  ;;  %v298_v63 = vmul.f32 %v288_v59, %v252_v23 }
 0x29d   :  { %v315_v0 = vadd.f32 %v308_v58, %v295_v60  ;;  %v316_v1 = vadd.f32 %v308_v58, %v296_v61  ;;  %v317_v2 = vadd.f32 %v308_v58, %v297_v62  ;;  %v318_v4 = vadd.f32 %v308_v58, %v298_v63 }
 0x29e   :  { %v293_v5 = vpop.permute.xlu1 %292 }
 0x29f   :  { %vm323_vm0 = vcmp.gt.f32.partialorder %v315_v0, 0.0  ;;  %vm324_vm1 = vcmp.gt.f32.partialorder %v316_v1, 0.0  ;;  %vm325_vm2 = vcmp.gt.f32.partialorder %v317_v2, 0.0  ;;  %vm326_vm3 = vcmp.gt.f32.partialorder %v318_v4, 0.0 }
 0x2a0   :  { %v331_v6 = vmul.f32 0.2, %v315_v0  ;;  %v332_v7 = vmul.f32 0.2, %v316_v1  ;;  %v333_v8 = vmul.f32 0.2, %v317_v2  ;;  %v299_v10 = vmul.f32 %v293_v5, %v253_v28 }
 0x2a1   :  { %v334_v9 = vmul.f32 0.2, %v318_v4  ;;  %v300_v11 = vmul.f32 %v293_v5, %v254_v29  ;;  %v301_v12 = vmul.f32 %v293_v5, %v255_v31  ;;  %v302_v16 = vmul.f32 %v293_v5, %v596_v34 }
 0x2a2   :  { %v339_v13 = vsel %vm323_vm0, %v315_v0, %v331_v6  ;;  %v340_v14 = vsel %vm324_vm1, %v316_v1, %v332_v7  ;;  %v341_v15 = vsel %vm325_vm2, %v317_v2, %v333_v8  ;;  %v313_v17 = vpop.permute.xlu1 %312 }
 0x2a3   :  { %v342_v18 = vsel %vm326_vm3, %v318_v4, %v334_v9  ;;  %347 = vst [vmem:[%s641_s4] sm:$0xff] %v339_v13  ;;  %348 = vst [vmem:[%s641_s4 + $0x8] sm:$0xff] %v340_v14  ;;  %v319_v3 = vadd.f32 %v313_v17, %v299_v10  ;;  %v320_v19 = vadd.f32 %v313_v17, %v300_v11 }
 0x2a4   :  { %349 = vst [vmem:[%s641_s4 + $0x10] sm:$0xff] %v341_v15  ;;  %v321_v20 = vadd.f32 %v313_v17, %v301_v12  ;;  %350 = vst [vmem:[%s641_s4 + $0x18] sm:$0xff] %v342_v18  ;;  %v322_v21 = vadd.f32 %v313_v17, %v302_v16 }
 0x2a5   :  { %vm327_vm4 = vcmp.gt.f32.partialorder %v319_v3, 0.0  ;;  %vm328_vm5 = vcmp.gt.f32.partialorder %v320_v19, 0.0  ;;  %v335_v22 = vmul.f32 0.2, %v319_v3  ;;  %v336_v23 = vmul.f32 0.2, %v320_v19 }
 0x2a6   :  { %vm329_vm6 = vcmp.gt.f32.partialorder %v321_v20, 0.0  ;;  %vm330_vm7 = vcmp.gt.f32.partialorder %v322_v21, 0.0  ;;  %v337_v24 = vmul.f32 0.2, %v321_v20  ;;  %v338_v25 = vmul.f32 0.2, %v322_v21 }
 0x2a7   :  { %v343_v26 = vsel %vm327_vm4, %v319_v3, %v335_v22  ;;  %v344_v27 = vsel %vm328_vm5, %v320_v19, %v336_v23 }
 0x2a8   :  { %v345_v28 = vsel %vm329_vm6, %v321_v20, %v337_v24  ;;  %351 = vst [vmem:[%s641_s4 + $0x20] sm:$0xff] %v343_v26  ;;  %v346_v29 = vsel %vm330_vm7, %v322_v21, %v338_v25  ;;  %352 = vst [vmem:[%s641_s4 + $0x28] sm:$0xff] %v344_v27 }
 0x2a9   :  { %353 = vst [vmem:[%s641_s4 + $0x30] sm:$0xff] %v345_v28  ;;  %354 = vst [vmem:[%s641_s4 + $0x38] sm:$0xff] %v346_v29 }

// kernel: discriminator_forward.8
= control target key start
LH: loop header
LB: loop body
LE: loop exit
PB: predicated region body
PF: predicated region fallthrough
CT: control target
= control target key end

     0   :  { %s551_s3 = inlined_call_operand.vmem [shape: f32[256,128], index: 3, kind: input, shape index: {}]   ;;  %s552_s0 = inlined_call_operand.vmem [shape: f32[32,256], index: 0, kind: input, shape index: {}]   ;;  %s553_s2 = inlined_call_operand.vmem [shape: f32[32,1], index: 2, kind: input, shape index: {}]   ;;  %s554_s1 = inlined_call_operand.vmem [shape: f32[32,1], index: 1, kind: input, shape index: {}]   ;;  %s555_s4 = inlined_call_operand.vmem [shape: f32[32,128], index: 4, kind: output, shape index: {}]  }
   0x1   :  { %v56_v0 = vld [vmem:[%s551_s3 + $0xf8] sm:$0xff]  ;;  %v55_v2 = vld [vmem:[%s551_s3 + $0xf0] sm:$0xff]  ;;  %v54_v4 = vld [vmem:[%s551_s3 + $0xe8] sm:$0xff] }
   0x2   :  { %v40_v1 = vld [vmem:[%s551_s3 + $0x78] sm:$0xff]  ;;  %262 = vmatprep.subr.mxu0 %v56_v0  ;;  %306 = vmatprep.subr.mxu1 %v56_v0  ;;  %v39_v3 = vld [vmem:[%s551_s3 + $0x70] sm:$0xff]  ;;  %v38_v5 = vld [vmem:[%s551_s3 + $0x68] sm:$0xff] }
   0x3   :  { %263 = vmatpush3.msra.mxu0 %v40_v1  ;;  %322 = vmatpush3.msra.mxu1 %v40_v1  ;;  %v53_v6 = vld [vmem:[%s551_s3 + $0xe0] sm:$0xff]  ;;  %v52_v8 = vld [vmem:[%s551_s3 + $0xd8] sm:$0xff]  ;;  %v51_v10 = vld [vmem:[%s551_s3 + $0xd0] sm:$0xff] }
   0x4   :  { %264 = vmatprep.subr.mxu0 %v55_v2  ;;  %307 = vmatprep.subr.mxu1 %v55_v2  ;;  %v37_v7 = vld [vmem:[%s551_s3 + $0x60] sm:$0xff]  ;;  %v36_v9 = vld [vmem:[%s551_s3 + $0x58] sm:$0xff]  ;;  %v35_v11 = vld [vmem:[%s551_s3 + $0x50] sm:$0xff] }
   0x5   :  { %265 = vmatpush3.msra.mxu0 %v39_v3  ;;  %323 = vmatpush3.msra.mxu1 %v39_v3  ;;  %v50_v12 = vld [vmem:[%s551_s3 + $0xc8] sm:$0xff]  ;;  %v49_v14 = vld [vmem:[%s551_s3 + $0xc0] sm:$0xff]  ;;  %v48_v16 = vld [vmem:[%s551_s3 + $0xb8] sm:$0xff] }
   0x6   :  { %266 = vmatprep.subr.mxu0 %v54_v4  ;;  %308 = vmatprep.subr.mxu1 %v54_v4  ;;  %v34_v13 = vld [vmem:[%s551_s3 + $0x48] sm:$0xff]  ;;  %v33_v15 = vld [vmem:[%s551_s3 + $0x40] sm:$0xff]  ;;  %v32_v17 = vld [vmem:[%s551_s3 + $0x38] sm:$0xff]  ;;  %v349_v4 = vmov 0  }
   0x7   :  { %267 = vmatpush3.msra.mxu0 %v38_v5  ;;  %324 = vmatpush3.msra.mxu1 %v38_v5  ;;  %v47_v18 = vld [vmem:[%s551_s3 + $0xb0] sm:$0xff]  ;;  %v46_v20 = vld [vmem:[%s551_s3 + $0xa8] sm:$0xff]  ;;  %v45_v22 = vld [vmem:[%s551_s3 + $0xa0] sm:$0xff] }
   0x8   :  { %268 = vmatprep.subr.mxu0 %v53_v6  ;;  %309 = vmatprep.subr.mxu1 %v53_v6  ;;  %v31_v19 = vld [vmem:[%s551_s3 + $0x30] sm:$0xff]  ;;  %v30_v21 = vld [vmem:[%s551_s3 + $0x28] sm:$0xff]  ;;  %v29_v23 = vld [vmem:[%s551_s3 + $0x20] sm:$0xff] }
   0x9   :  { %269 = vmatpush3.msra.mxu0 %v37_v7  ;;  %325 = vmatpush3.msra.mxu1 %v37_v7  ;;  %v44_v24 = vld [vmem:[%s551_s3 + $0x98] sm:$0xff]  ;;  %v43_v26 = vld [vmem:[%s551_s3 + $0x90] sm:$0xff]  ;;  %v42_v28 = vld [vmem:[%s551_s3 + $0x88] sm:$0xff] }
   0xa   :  { %270 = vmatprep.subr.mxu0 %v52_v8  ;;  %310 = vmatprep.subr.mxu1 %v52_v8  ;;  %v28_v25 = vld [vmem:[%s551_s3 + $0x18] sm:$0xff]  ;;  %v27_v27 = vld [vmem:[%s551_s3 + $0x10] sm:$0xff]  ;;  %v26_v29 = vld [vmem:[%s551_s3 + $0x8] sm:$0xff] }
   0xb   :  { %271 = vmatpush3.msra.mxu0 %v36_v9  ;;  %326 = vmatpush3.msra.mxu1 %v36_v9  ;;  %v41_v30 = vld [vmem:[%s551_s3 + $0x80] sm:$0xff]  ;;  %v18_v32 = vld [vmem:[%s552_s0 + $0x8] sm:$0xff]  ;;  %v20_v36 = vld [vmem:[%s552_s0 + $0x18] sm:$0xff] }
   0xc   :  { %272 = vmatprep.subr.mxu0 %v51_v10  ;;  %311 = vmatprep.subr.mxu1 %v51_v10  ;;  %v25_v31 = vld [vmem:[%s551_s3] sm:$0xff]  ;;  %v22_v33 = vld [vmem:[%s552_s0 + $0x28] sm:$0xff]  ;;  %v24_v37 = vld [vmem:[%s552_s0 + $0x38] sm:$0xff] }
   0xd   :  { %273 = vmatpush3.msra.mxu0 %v35_v11  ;;  %327 = vmatpush3.msra.mxu1 %v35_v11  ;;  %v17_v34 = vld [vmem:[%s552_s0] sm:$0xff]  ;;  %v19_v38 = vld [vmem:[%s552_s0 + $0x10] sm:$0xff]  ;;  %v215_v6 = vld [vmem:[%s553_s2 + $0x8] sm:$0xff] }
   0xe   :  { %274 = vmatprep.subr.mxu0 %v50_v12  ;;  %312 = vmatprep.subr.mxu1 %v50_v12  ;;  %v21_v35 = vld [vmem:[%s552_s0 + $0x20] sm:$0xff]  ;;  %v23_v39 = vld [vmem:[%s552_s0 + $0x30] sm:$0xff] }
   0xf   :  { %275 = vmatpush3.msra.mxu0 %v34_v13  ;;  %328 = vmatpush3.msra.mxu1 %v34_v13  ;;  %v214_v5 = vld [vmem:[%s553_s2] sm:$0xff]  ;;  %v216_v7 = vld [vmem:[%s553_s2 + $0x10] sm:$0xff] }
  0x10   :  { %276 = vmatprep.subr.mxu0 %v49_v14  ;;  %313 = vmatprep.subr.mxu1 %v49_v14 }
  0x11   :  { %277 = vmatpush3.msra.mxu0 %v33_v15  ;;  %329 = vmatpush3.msra.mxu1 %v33_v15 }
  0x12   :  { %278 = vmatprep.subr.mxu0 %v48_v16  ;;  %314 = vmatprep.subr.mxu1 %v48_v16 }
  0x13   :  { %279 = vmatpush3.msra.mxu0 %v32_v17  ;;  %330 = vmatpush3.msra.mxu1 %v32_v17 }
  0x14   :  { %280 = vmatprep.subr.mxu0 %v47_v18  ;;  %315 = vmatprep.subr.mxu1 %v47_v18 }
  0x15   :  { %281 = vmatpush3.msra.mxu0 %v31_v19  ;;  %331 = vmatpush3.msra.mxu1 %v31_v19 }
  0x16   :  { %282 = vmatprep.subr.mxu0 %v46_v20  ;;  %316 = vmatprep.subr.mxu1 %v46_v20  ;;  %v174_v20 = vld [vmem:[%s554_s1] sm:$0xff] }
  0x17   :  { %283 = vmatpush3.msra.mxu0 %v30_v21  ;;  %332 = vmatpush3.msra.mxu1 %v30_v21 }
  0x18   :  { %284 = vmatprep.subr.mxu0 %v45_v22  ;;  %317 = vmatprep.subr.mxu1 %v45_v22 }
  0x19   :  { %285 = vmatpush3.msra.mxu0 %v29_v23  ;;  %333 = vmatpush3.msra.mxu1 %v29_v23  ;;  %v176_v23 = vld [vmem:[%s554_s1 + $0x10] sm:$0xff] }
  0x1a   :  { %286 = vmatprep.subr.mxu0 %v44_v24  ;;  %318 = vmatprep.subr.mxu1 %v44_v24 }
  0x1b   :  { %287 = vmatpush3.msra.mxu0 %v28_v25  ;;  %334 = vmatpush3.msra.mxu1 %v28_v25 }
  0x1c   :  { %288 = vmatprep.subr.mxu0 %v43_v26  ;;  %319 = vmatprep.subr.mxu1 %v43_v26 }
  0x1d   :  { %289 = vmatpush3.msra.mxu0 %v27_v27  ;;  %335 = vmatpush3.msra.mxu1 %v27_v27  ;;  %v175_v27 = vld [vmem:[%s554_s1 + $0x8] sm:$0xff] }
  0x1e   :  { %290 = vmatprep.subr.mxu0 %v42_v28  ;;  %320 = vmatprep.subr.mxu1 %v42_v28 }
  0x1f   :  { %291 = vmatpush3.msra.mxu0 %v26_v29  ;;  %336 = vmatpush3.msra.mxu1 %v26_v29 }
  0x20   :  { %292 = vmatprep.subr.mxu0 %v41_v30  ;;  %321 = vmatprep.subr.mxu1 %v41_v30  ;;  %v177_v30 = vld [vmem:[%s554_s1 + $0x18] sm:$0xff] }
  0x21   :  { %293 = vmatpush3.msra.mxu0 %v25_v31  ;;  %337 = vmatpush3.msra.mxu1 %v25_v31 }
  0x22   :  { %121 = vmatprep.mubr.f32.mxu0 %v18_v32  ;;  %131 = vmatprep.mubr.f32.mxu1 %v22_v33  ;;  %v217_v32 = vld [vmem:[%s553_s2 + $0x18] sm:$0xff] }
  0x23   :  { %122 = vmatmul.mubr.f32.vlgmr.msra.gmra.mxu0 %v17_v34  ;;  %132 = vmatmul.mubr.f32.vlgmr.msra.gmra.mxu1 %v21_v35 }
  0x24   :  { %126 = vmatprep.mubr.f32.mxu0 %v20_v36  ;;  %136 = vmatprep.mubr.f32.mxu1 %v24_v37 }
  0x25   :  { %340 = vset.pattern.permute.xlu1 %v349_v4  ;;  %339 = vset.pattern.permute.xlu0 %v349_v4 }
  0x27   :  { %127 = vmatmul.mubr.f32.gmra.mxu0 %v19_v38  ;;  %137 = vmatmul.mubr.f32.gmra.mxu1 %v23_v39 }
  0xe3   :  { %v294_v40 = vpop.f32.mrf.mxu0  ;;  %v300_v41 = vpop.f32.mrf.mxu1 }
  0xe5   :  { %v295_v42 = vpop.f32.mrf.mxu0  ;;  %v301_v43 = vpop.f32.mrf.mxu1 }
  0xe6   :  { %v296_v44 = vadd.f32 %v295_v42, %v294_v40  ;;  %v302_v45 = vadd.f32 %v301_v43, %v300_v41 }
  0xe7   :  { %v297_v46 = vpop.f32.mrf.mxu0  ;;  %v303_v47 = vpop.f32.mrf.mxu1 }
  0xe8   :  { %146 = vadd.xlane.f32.xlu1 %v302_v45  ;;  %142 = vadd.xlane.f32.xlu0 %v296_v44 }
  0xe9   :  { %v298_v48 = vpop.f32.mrf.mxu0  ;;  %v304_v49 = vpop.f32.mrf.mxu1 }
  0xea   :  { %v299_v50 = vadd.f32 %v298_v48, %v297_v46  ;;  %v305_v51 = vadd.f32 %v304_v49, %v303_v47 }
  0xec   :  { %148 = vadd.xlane.f32.xlu1 %v305_v51  ;;  %144 = vadd.xlane.f32.xlu0 %v299_v50 }
 0x171   :  { %v147_v52 = vpop.xlane.xlu1 %146  ;;  %v143_v53 = vpop.xlane.xlu0 %142 }
 0x172   :  { %v152_v54 = vmul.f32 0.0078125, %v147_v52  ;;  %v150_v55 = vmul.f32 0.0078125, %v143_v53 }
 0x174   :  { %v495_v56 = vsub.f32 %v296_v44, %v150_v55  ;;  %v497_v59 = vsub.f32 %v302_v45, %v152_v54 }
 0x175   :  { %v149_v57 = vpop.xlane.xlu1 %148  ;;  %v145_v58 = vpop.xlane.xlu0 %144 }
 0x176   :  { %v153_v60 = vmul.f32 0.0078125, %v149_v57  ;;  %v151_v61 = vmul.f32 0.0078125, %v145_v58  ;;  %v158_v62 = vmul.f32 %v495_v56, %v495_v56  ;;  %v160_v1 = vmul.f32 %v497_v59, %v497_v59 }
 0x178   :  { %v501_v63 = vsub.f32 %v299_v50, %v151_v61  ;;  %162 = vadd.xlane.f32.xlu0 %v158_v62  ;;  %v503_v0 = vsub.f32 %v305_v51, %v153_v60 }
 0x17a   :  { %v159_v2 = vmul.f32 %v501_v63, %v501_v63  ;;  %v161_v3 = vmul.f32 %v503_v0, %v503_v0 }
 0x17c   :  { %166 = vadd.xlane.f32.xlu0 %v160_v1  ;;  %164 = vadd.xlane.f32.xlu1 %v159_v2 }
 0x180   :  { %168 = vadd.xlane.f32.xlu1 %v161_v3 }
 0x191   :  { %220 = vperm.xlu1 %340, %v214_v5  }
 0x195   :  { %225 = vperm.xlu1 %340, %v215_v6  }
 0x199   :  { %230 = vperm.xlu1 %340, %v216_v7  }
 0x201   :  { %v163_v8 = vpop.xlane.xlu0 %162 }
 0x202   :  { %v170_v9 = vmul.f32 0.0078125, %v163_v8 }
 0x204   :  { %v178_v10 = vadd.f32 1e-05, %v170_v9 }
 0x205   :  { %v165_v11 = vpop.xlane.xlu1 %164  ;;  %v167_v12 = vpop.xlane.xlu0 %166 }
 0x206   :  { %341 = vrsqrt.f32 %v178_v10  ;;  %v171_v13 = vmul.f32 0.0078125, %v165_v11  ;;  %v172_v14 = vmul.f32 0.0078125, %v167_v12 }
 0x208   :  { %v180_v15 = vadd.f32 1e-05, %v172_v14  ;;  %v179_v16 = vadd.f32 1e-05, %v171_v13 }
 0x209   :  { %v169_v17 = vpop.xlane.xlu1 %168 }
 0x20a   :  { %v173_v18 = vmul.f32 0.0078125, %v169_v17  ;;  %343 = vrsqrt.f32 %v180_v15 }
 0x20b   :  { %345 = vrsqrt.f32 %v179_v16 }
 0x20c   :  { %v181_v19 = vadd.f32 1e-05, %v173_v18 }
 0x20d   :  { %v221_v33 = vpop.permute.xlu1 %220 }
 0x20e   :  { %347 = vrsqrt.f32 %v181_v19 }
 0x211   :  { %v226_v34 = vpop.permute.xlu1 %225 }
 0x213   :  { %v342_v21 = vpop.eup %341 }
 0x214   :  { %v186_v22 = vmul.f32 %v342_v21, %v174_v20 }
 0x215   :  { %v231_v36 = vpop.permute.xlu1 %230 }
 0x216   :  { %192 = vperm.xlu0 %339, %v186_v22  }
 0x217   :  { %v344_v24 = vpop.eup %343 }
 0x218   :  { %v188_v25 = vmul.f32 %v344_v24, %v176_v23  ;;  %v346_v26 = vpop.eup %345 }
 0x219   :  { %v187_v28 = vmul.f32 %v346_v26, %v175_v27 }
 0x21a   :  { %202 = vperm.xlu1 %340, %v188_v25  }
 0x21b   :  { %v348_v29 = vpop.eup %347 }
 0x21c   :  { %v189_v31 = vmul.f32 %v348_v29, %v177_v30 }
 0x21e   :  { %197 = vperm.xlu1 %340, %v187_v28  }
 0x222   :  { %207 = vperm.xlu1 %340, %v189_v31  }
 0x226   :  { %235 = vperm.xlu1 %340, %v217_v32  }
 0x291   :  { %v193_v35 = vpop.permute.xlu0 %192 }
 0x292   :  { %v210_v37 = vmul.f32 %v193_v35, %v495_v56 }
 0x294   :  { %v238_v38 = vadd.f32 %v221_v33, %v210_v37 }
 0x295   :  { %v203_v40 = vpop.permute.xlu1 %202 }
 0x296   :  { %vm242_vm0 = vcmp.gt.f32.partialorder %v238_v38, 0.0  ;;  %v246_v39 = vmul.f32 0.2, %v238_v38  ;;  %v212_v41 = vmul.f32 %v203_v40, %v497_v59 }
 0x298   :  { %v250_v42 = vsel %vm242_vm0, %v238_v38, %v246_v39  ;;  %v240_v43 = vadd.f32 %v231_v36, %v212_v41 }
 0x299   :  { %254 = vst [vmem:[%s555_s4] sm:$0xff] %v250_v42  ;;  %v198_v44 = vpop.permute.xlu1 %197 }
 0x29a   :  { %vm244_vm1 = vcmp.gt.f32.partialorder %v240_v43, 0.0  ;;  %v248_v45 = vmul.f32 0.2, %v240_v43  ;;  %v211_v46 = vmul.f32 %v198_v44, %v501_v63 }
 0x29c   :  { %v252_v47 = vsel %vm244_vm1, %v240_v43, %v248_v45  ;;  %v239_v48 = vadd.f32 %v226_v34, %v211_v46 }
 0x29d   :  { %256 = vst [vmem:[%s555_s4 + $0x10] sm:$0xff] %v252_v47  ;;  %v208_v49 = vpop.permute.xlu1 %207 }
 0x29e   :  { %vm243_vm2 = vcmp.gt.f32.partialorder %v239_v48, 0.0  ;;  %v247_v50 = vmul.f32 0.2, %v239_v48  ;;  %v213_v52 = vmul.f32 %v208_v49, %v503_v0 }
 0x2a0   :  { %v251_v51 = vsel %vm243_vm2, %v239_v48, %v247_v50 }
 0x2a1   :  { %255 = vst [vmem:[%s555_s4 + $0x8] sm:$0xff] %v251_v51  ;;  %v236_v53 = vpop.permute.xlu1 %235 }
 0x2a2   :  { %v241_v54 = vadd.f32 %v236_v53, %v213_v52 }
 0x2a4   :  { %vm245_vm3 = vcmp.gt.f32.partialorder %v241_v54, 0.0  ;;  %v249_v55 = vmul.f32 0.2, %v241_v54 }
 0x2a6   :  { %v253_v56 = vsel %vm245_vm3, %v241_v54, %v249_v55 }
 0x2a7   :  { %257 = vst [vmem:[%s555_s4 + $0x18] sm:$0xff] %v253_v56 }

// kernel: discriminator_forward.9
= control target key start
LH: loop header
LB: loop body
LE: loop exit
PB: predicated region body
PF: predicated region fallthrough
CT: control target
= control target key end

     0   :  { %s1384_s0 = inlined_call_operand.vmem [shape: f32[64,512], index: 0, kind: input, shape index: {}]   ;;  %s1385_s1 = inlined_call_operand.vmem [shape: f32[64,1], index: 1, kind: input, shape index: {}]   ;;  %s1386_s2 = inlined_call_operand.vmem [shape: f32[64,1], index: 2, kind: input, shape index: {}]   ;;  %s1387_s3 = inlined_call_operand.vmem [shape: f32[512,32], index: 3, kind: input, shape index: {}]   ;;  %s1388_s4 = inlined_call_operand.vmem [shape: f32[64,32], index: 4, kind: input, shape index: {}]   ;;  %s1389_s5 = inlined_call_operand.vmem [shape: f32[32,2], index: 5, kind: input, shape index: {}]   ;;  %s1390_s6 = inlined_call_operand.<no memory space> [shape: f32[1,1], index: 6, kind: input, shape index: {}]   ;;  %s1391_s7 = inlined_call_operand.hbm [shape: f32[1,2], index: 7, kind: output, shape index: {}]  }
   0x1   :  { %v12_v0 = vstv %s1390_s6 }
   0x2   :  { %13 = vst [vmem:[#allocation2] sm:$0x1] %v12_v0 }
   0x3   :  { %v92_v1 = vld [vmem:[%s1387_s3 + $0xf8] sm:$0xff]  ;;  %v91_v5 = vld [vmem:[%s1387_s3 + $0xf0] sm:$0xff]  ;;  %v90_v9 = vld [vmem:[%s1387_s3 + $0xe8] sm:$0xff] }
   0x4   :  { %v124_v2 = vld [vmem:[%s1387_s3 + $0x1f8] sm:$0xff]  ;;  %717 = vmatprep.subr.mxu0 %v92_v1  ;;  %v123_v6 = vld [vmem:[%s1387_s3 + $0x1f0] sm:$0xff]  ;;  %v122_v10 = vld [vmem:[%s1387_s3 + $0x1e8] sm:$0xff] }
   0x5   :  { %v76_v3 = vld [vmem:[%s1387_s3 + $0x78] sm:$0xff]  ;;  %773 = vmatprep.subr.mxu1 %v124_v2  ;;  %v75_v7 = vld [vmem:[%s1387_s3 + $0x70] sm:$0xff]  ;;  %v74_v11 = vld [vmem:[%s1387_s3 + $0x68] sm:$0xff] }
   0x6   :  { %v108_v4 = vld [vmem:[%s1387_s3 + $0x178] sm:$0xff]  ;;  %718 = vmatpush3.msra.mxu0 %v76_v3  ;;  %v107_v8 = vld [vmem:[%s1387_s3 + $0x170] sm:$0xff]  ;;  %v106_v12 = vld [vmem:[%s1387_s3 + $0x168] sm:$0xff] }
   0x7   :  { %774 = vmatpush3.msra.mxu1 %v108_v4  ;;  %719 = vmatprep.subr.mxu0 %v91_v5  ;;  %v89_v13 = vld [vmem:[%s1387_s3 + $0xe0] sm:$0xff]  ;;  %v88_v17 = vld [vmem:[%s1387_s3 + $0xd8] sm:$0xff]  ;;  %v87_v21 = vld [vmem:[%s1387_s3 + $0xd0] sm:$0xff] }
   0x8   :  { %775 = vmatprep.subr.mxu1 %v123_v6  ;;  %720 = vmatpush3.msra.mxu0 %v75_v7  ;;  %v121_v14 = vld [vmem:[%s1387_s3 + $0x1e0] sm:$0xff]  ;;  %v120_v18 = vld [vmem:[%s1387_s3 + $0x1d8] sm:$0xff]  ;;  %v119_v22 = vld [vmem:[%s1387_s3 + $0x1d0] sm:$0xff] }
   0x9   :  { %776 = vmatpush3.msra.mxu1 %v107_v8  ;;  %721 = vmatprep.subr.mxu0 %v90_v9  ;;  %v73_v15 = vld [vmem:[%s1387_s3 + $0x60] sm:$0xff]  ;;  %v72_v19 = vld [vmem:[%s1387_s3 + $0x58] sm:$0xff]  ;;  %v71_v23 = vld [vmem:[%s1387_s3 + $0x50] sm:$0xff] }
   0xa   :  { %777 = vmatprep.subr.mxu1 %v122_v10  ;;  %v105_v16 = vld [vmem:[%s1387_s3 + $0x160] sm:$0xff]  ;;  %722 = vmatpush3.msra.mxu0 %v74_v11  ;;  %v104_v20 = vld [vmem:[%s1387_s3 + $0x158] sm:$0xff]  ;;  %v103_v24 = vld [vmem:[%s1387_s3 + $0x150] sm:$0xff] }
   0xb   :  { %778 = vmatpush3.msra.mxu1 %v106_v12  ;;  %723 = vmatprep.subr.mxu0 %v89_v13  ;;  %v86_v25 = vld [vmem:[%s1387_s3 + $0xc8] sm:$0xff]  ;;  %v85_v29 = vld [vmem:[%s1387_s3 + $0xc0] sm:$0xff]  ;;  %v84_v33 = vld [vmem:[%s1387_s3 + $0xb8] sm:$0xff] }
   0xc   :  { %779 = vmatprep.subr.mxu1 %v121_v14  ;;  %724 = vmatpush3.msra.mxu0 %v73_v15  ;;  %v118_v26 = vld [vmem:[%s1387_s3 + $0x1c8] sm:$0xff]  ;;  %v117_v30 = vld [vmem:[%s1387_s3 + $0x1c0] sm:$0xff]  ;;  %v116_v34 = vld [vmem:[%s1387_s3 + $0x1b8] sm:$0xff] }
   0xd   :  { %780 = vmatpush3.msra.mxu1 %v105_v16  ;;  %725 = vmatprep.subr.mxu0 %v88_v17  ;;  %v70_v27 = vld [vmem:[%s1387_s3 + $0x48] sm:$0xff]  ;;  %v69_v31 = vld [vmem:[%s1387_s3 + $0x40] sm:$0xff]  ;;  %v68_v35 = vld [vmem:[%s1387_s3 + $0x38] sm:$0xff] }
   0xe   :  { %781 = vmatprep.subr.mxu1 %v120_v18  ;;  %726 = vmatpush3.msra.mxu0 %v72_v19  ;;  %v102_v28 = vld [vmem:[%s1387_s3 + $0x148] sm:$0xff]  ;;  %v101_v32 = vld [vmem:[%s1387_s3 + $0x140] sm:$0xff]  ;;  %v100_v36 = vld [vmem:[%s1387_s3 + $0x138] sm:$0xff] }
   0xf   :  { %782 = vmatpush3.msra.mxu1 %v104_v20  ;;  %727 = vmatprep.subr.mxu0 %v87_v21  ;;  %v83_v37 = vld [vmem:[%s1387_s3 + $0xb0] sm:$0xff]  ;;  %v82_v41 = vld [vmem:[%s1387_s3 + $0xa8] sm:$0xff]  ;;  %v81_v45 = vld [vmem:[%s1387_s3 + $0xa0] sm:$0xff] }
  0x10   :  { %783 = vmatprep.subr.mxu1 %v119_v22  ;;  %728 = vmatpush3.msra.mxu0 %v71_v23  ;;  %v115_v38 = vld [vmem:[%s1387_s3 + $0x1b0] sm:$0xff]  ;;  %v114_v42 = vld [vmem:[%s1387_s3 + $0x1a8] sm:$0xff]  ;;  %v113_v46 = vld [vmem:[%s1387_s3 + $0x1a0] sm:$0xff] }
  0x11   :  { %784 = vmatpush3.msra.mxu1 %v103_v24  ;;  %729 = vmatprep.subr.mxu0 %v86_v25  ;;  %v67_v39 = vld [vmem:[%s1387_s3 + $0x30] sm:$0xff]  ;;  %v66_v43 = vld [vmem:[%s1387_s3 + $0x28] sm:$0xff]  ;;  %v65_v47 = vld [vmem:[%s1387_s3 + $0x20] sm:$0xff] }
  0x12   :  { %785 = vmatprep.subr.mxu1 %v118_v26  ;;  %730 = vmatpush3.msra.mxu0 %v70_v27  ;;  %v99_v40 = vld [vmem:[%s1387_s3 + $0x130] sm:$0xff]  ;;  %v98_v44 = vld [vmem:[%s1387_s3 + $0x128] sm:$0xff]  ;;  %v97_v48 = vld [vmem:[%s1387_s3 + $0x120] sm:$0xff] }
  0x13   :  { %786 = vmatpush3.msra.mxu1 %v102_v28  ;;  %731 = vmatprep.subr.mxu0 %v85_v29  ;;  %v80_v49 = vld [vmem:[%s1387_s3 + $0x98] sm:$0xff]  ;;  %v79_v53 = vld [vmem:[%s1387_s3 + $0x90] sm:$0xff]  ;;  %v78_v57 = vld [vmem:[%s1387_s3 + $0x88] sm:$0xff] }
  0x14   :  { %787 = vmatprep.subr.mxu1 %v117_v30  ;;  %732 = vmatpush3.msra.mxu0 %v69_v31  ;;  %v112_v50 = vld [vmem:[%s1387_s3 + $0x198] sm:$0xff]  ;;  %v111_v54 = vld [vmem:[%s1387_s3 + $0x190] sm:$0xff]  ;;  %v110_v58 = vld [vmem:[%s1387_s3 + $0x188] sm:$0xff] }
  0x15   :  { %788 = vmatpush3.msra.mxu1 %v101_v32  ;;  %733 = vmatprep.subr.mxu0 %v84_v33  ;;  %v64_v51 = vld [vmem:[%s1387_s3 + $0x18] sm:$0xff]  ;;  %v63_v55 = vld [vmem:[%s1387_s3 + $0x10] sm:$0xff]  ;;  %v62_v59 = vld [vmem:[%s1387_s3 + $0x8] sm:$0xff] }
  0x16   :  { %789 = vmatprep.subr.mxu1 %v116_v34  ;;  %734 = vmatpush3.msra.mxu0 %v68_v35  ;;  %v96_v52 = vld [vmem:[%s1387_s3 + $0x118] sm:$0xff]  ;;  %v95_v56 = vld [vmem:[%s1387_s3 + $0x110] sm:$0xff]  ;;  %v94_v60 = vld [vmem:[%s1387_s3 + $0x108] sm:$0xff] }
  0x17   :  { %790 = vmatpush3.msra.mxu1 %v100_v36  ;;  %735 = vmatprep.subr.mxu0 %v83_v37  ;;  %v77_v61 = vld [vmem:[%s1387_s3 + $0x80] sm:$0xff]  ;;  %v30_v0 = vld [vmem:[%s1384_s0 + $0x8] sm:$0xff]  ;;  %v32_v2 = vld [vmem:[%s1384_s0 + $0x18] sm:$0xff] }
  0x18   :  { %791 = vmatprep.subr.mxu1 %v115_v38  ;;  %736 = vmatpush3.msra.mxu0 %v67_v39  ;;  %v109_v62 = vld [vmem:[%s1387_s3 + $0x180] sm:$0xff]  ;;  %v31_v4 = vld [vmem:[%s1384_s0 + $0x10] sm:$0xff]  ;;  %v34_v5 = vld [vmem:[%s1384_s0 + $0x28] sm:$0xff] }
  0x19   :  { %792 = vmatpush3.msra.mxu1 %v99_v40  ;;  %737 = vmatprep.subr.mxu0 %v82_v41  ;;  %v61_v63 = vld [vmem:[%s1387_s3] sm:$0xff]  ;;  %v36_v6 = vld [vmem:[%s1384_s0 + $0x38] sm:$0xff] }
  0x1a   :  { %793 = vmatprep.subr.mxu1 %v114_v42  ;;  %738 = vmatpush3.msra.mxu0 %v66_v43  ;;  %v93_v1 = vld [vmem:[%s1387_s3 + $0x100] sm:$0xff] }
  0x1b   :  { %794 = vmatpush3.msra.mxu1 %v98_v44  ;;  %739 = vmatprep.subr.mxu0 %v81_v45  ;;  %v29_v3 = vld [vmem:[%s1384_s0] sm:$0xff] }
  0x1c   :  { %795 = vmatprep.subr.mxu1 %v113_v46  ;;  %740 = vmatpush3.msra.mxu0 %v65_v47 }
  0x1d   :  { %796 = vmatpush3.msra.mxu1 %v97_v48  ;;  %741 = vmatprep.subr.mxu0 %v80_v49 }
  0x1e   :  { %797 = vmatprep.subr.mxu1 %v112_v50  ;;  %742 = vmatpush3.msra.mxu0 %v64_v51 }
  0x1f   :  { %798 = vmatpush3.msra.mxu1 %v96_v52  ;;  %743 = vmatprep.subr.mxu0 %v79_v53 }
  0x20   :  { %799 = vmatprep.subr.mxu1 %v111_v54  ;;  %744 = vmatpush3.msra.mxu0 %v63_v55 }
  0x21   :  { %800 = vmatpush3.msra.mxu1 %v95_v56  ;;  %745 = vmatprep.subr.mxu0 %v78_v57 }
  0x22   :  { %801 = vmatprep.subr.mxu1 %v110_v58  ;;  %746 = vmatpush3.msra.mxu0 %v62_v59 }
  0x23   :  { %802 = vmatpush3.msra.mxu1 %v94_v60  ;;  %747 = vmatprep.subr.mxu0 %v77_v61 }
  0x24   :  { %803 = vmatprep.subr.mxu1 %v109_v62  ;;  %748 = vmatpush3.msra.mxu0 %v61_v63 }
  0x25   :  { %189 = vmatprep.mubr.f32.mxu0 %v30_v0 }
  0x26   :  { %14 = vsyncpa [#allocation4], 0  ;;  %804 = vmatpush3.msra.mxu1 %v93_v1  ;;  %294 = vmatprep.mubr.f32.mxu1 %v32_v2  ;;  %v33_v7 = vld [vmem:[%s1384_s0 + $0x20] sm:$0xff]  ;;  %v35_v8 = vld [vmem:[%s1384_s0 + $0x30] sm:$0xff]  ;;  %vm335_vm0 = vcmask 261120   ;;  %vm891_vm1 = vmmov 0  }
  0x27   :  { %190 = vmatmul.mubr.f32.vlgmr.msra.gmra.mxu0 %v29_v3  ;;  %295 = vmatmul.mubr.f32.vlgmr.msra.gmra.mxu1 %v31_v4  ;;  %v38_v9 = vld [vmem:[%s1384_s0 + $0x48] sm:$0xff]  ;;  %v40_v10 = vld [vmem:[%s1384_s0 + $0x58] sm:$0xff]  ;;  %v37_v11 = vld [vmem:[%s1384_s0 + $0x40] sm:$0xff]  ;;  %vm700_vm10 = vcmask 8192  }
  0x28   :  { %194 = vmatprep.mubr.f32.mxu0 %v34_v5  ;;  %299 = vmatprep.mubr.f32.mxu1 %v36_v6  ;;  %v39_v12 = vld [vmem:[%s1384_s0 + $0x50] sm:$0xff]  ;;  %v42_v13 = vld [vmem:[%s1384_s0 + $0x68] sm:$0xff]  ;;  %v44_v14 = vld [vmem:[%s1384_s0 + $0x78] sm:$0xff] }
  0x29   :  { %v41_v15 = vld [vmem:[%s1384_s0 + $0x60] sm:$0xff]  ;;  %v43_v16 = vld [vmem:[%s1384_s0 + $0x70] sm:$0xff]  ;;  %v46_v17 = vld [vmem:[%s1384_s0 + $0x88] sm:$0xff] }
  0x2a   :  { %v48_v18 = vld [vmem:[%s1384_s0 + $0x98] sm:$0xff]  ;;  %v45_v19 = vld [vmem:[%s1384_s0 + $0x80] sm:$0xff]  ;;  %v47_v20 = vld [vmem:[%s1384_s0 + $0x90] sm:$0xff] }
  0x2b   :  { %195 = vmatmul.mubr.f32.gmra.mxu0 %v33_v7  ;;  %300 = vmatmul.mubr.f32.gmra.mxu1 %v35_v8  ;;  %v50_v21 = vld [vmem:[%s1384_s0 + $0xa8] sm:$0xff]  ;;  %v52_v22 = vld [vmem:[%s1384_s0 + $0xb8] sm:$0xff]  ;;  %v49_v23 = vld [vmem:[%s1384_s0 + $0xa0] sm:$0xff] }
  0x2c   :  { %199 = vmatprep.mubr.f32.mxu0 %v38_v9  ;;  %304 = vmatprep.mubr.f32.mxu1 %v40_v10  ;;  %v51_v24 = vld [vmem:[%s1384_s0 + $0xb0] sm:$0xff]  ;;  %v54_v25 = vld [vmem:[%s1384_s0 + $0xc8] sm:$0xff]  ;;  %v56_v26 = vld [vmem:[%s1384_s0 + $0xd8] sm:$0xff] }
  0x2d   :  { %v53_v27 = vld [vmem:[%s1384_s0 + $0xc0] sm:$0xff]  ;;  %v55_v28 = vld [vmem:[%s1384_s0 + $0xd0] sm:$0xff]  ;;  %v58_v29 = vld [vmem:[%s1384_s0 + $0xe8] sm:$0xff] }
  0x2e   :  { %v60_v30 = vld [vmem:[%s1384_s0 + $0xf8] sm:$0xff]  ;;  %v57_v31 = vld [vmem:[%s1384_s0 + $0xe0] sm:$0xff]  ;;  %v59_v32 = vld [vmem:[%s1384_s0 + $0xf0] sm:$0xff] }
  0x2f   :  { %200 = vmatmul.mubr.f32.gmra.mxu0 %v37_v11  ;;  %305 = vmatmul.mubr.f32.gmra.mxu1 %v39_v12 }
  0x30   :  { %204 = vmatprep.mubr.f32.mxu0 %v42_v13  ;;  %309 = vmatprep.mubr.f32.mxu1 %v44_v14 }
  0x33   :  { %205 = vmatmul.mubr.f32.gmra.mxu0 %v41_v15  ;;  %310 = vmatmul.mubr.f32.gmra.mxu1 %v43_v16 }
  0x34   :  { %209 = vmatprep.mubr.f32.mxu0 %v46_v17  ;;  %314 = vmatprep.mubr.f32.mxu1 %v48_v18 }
  0x37   :  { %210 = vmatmul.mubr.f32.gmra.mxu0 %v45_v19  ;;  %315 = vmatmul.mubr.f32.gmra.mxu1 %v47_v20 }
  0x38   :  { %214 = vmatprep.mubr.f32.mxu0 %v50_v21  ;;  %319 = vmatprep.mubr.f32.mxu1 %v52_v22 }
  0x3b   :  { %215 = vmatmul.mubr.f32.gmra.mxu0 %v49_v23  ;;  %320 = vmatmul.mubr.f32.gmra.mxu1 %v51_v24 }
  0x3c   :  { %219 = vmatprep.mubr.f32.mxu0 %v54_v25  ;;  %324 = vmatprep.mubr.f32.mxu1 %v56_v26 }
  0x3f   :  { %220 = vmatmul.mubr.f32.gmra.mxu0 %v53_v27  ;;  %325 = vmatmul.mubr.f32.gmra.mxu1 %v55_v28 }
  0x40   :  { %224 = vmatprep.mubr.f32.mxu0 %v58_v29  ;;  %329 = vmatprep.mubr.f32.mxu1 %v60_v30 }
  0x43   :  { %225 = vmatmul.mubr.f32.gmra.mxu0 %v57_v31  ;;  %330 = vmatmul.mubr.f32.gmra.mxu1 %v59_v32 }
  0xe7   :  { %v749_v33 = vpop.f32.mrf.mxu0  ;;  %v805_v34 = vpop.f32.mrf.mxu1 }
  0xe9   :  { %v750_v35 = vpop.f32.mrf.mxu0  ;;  %v806_v36 = vpop.f32.mrf.mxu1 }
  0xea   :  { %v751_v37 = vadd.f32 %v750_v35, %v749_v33  ;;  %v807_v38 = vadd.f32 %v806_v36, %v805_v34  ;;  %v889_v33 = vmov 0  }
  0xeb   :  { %v752_v39 = vpop.f32.mrf.mxu0  ;;  %v808_v40 = vpop.f32.mrf.mxu1  ;;  %849 = vset.pattern.permute.xlu1 %v889_v33  ;;  %850 = vset.pattern.permute.xlu0 %v889_v33 }
  0xec   :  { %v1224_v41 = vadd.f32 %v807_v38, %v751_v37 }
  0xed   :  { %v753_v42 = vpop.f32.mrf.mxu0  ;;  %v809_v43 = vpop.f32.mrf.mxu1 }
  0xee   :  { %v754_v44 = vadd.f32 %v753_v42, %v752_v39  ;;  %v810_v45 = vadd.f32 %v809_v43, %v808_v40  ;;  %v336_v46 = vsel %vm335_vm0, %v1224_v41, 0.0 }
  0xef   :  { %v755_v47 = vpop.f32.mrf.mxu0  ;;  %v811_v48 = vpop.f32.mrf.mxu1  ;;  %337 = vadd.xlane.f32.xlu0 %v336_v46 }
  0xf0   :  { %v1228_v49 = vadd.f32 %v810_v45, %v754_v44 }
  0xf1   :  { %v756_v50 = vpop.f32.mrf.mxu0  ;;  %v812_v51 = vpop.f32.mrf.mxu1 }
  0xf2   :  { %v757_v52 = vadd.f32 %v756_v50, %v755_v47  ;;  %v813_v53 = vadd.f32 %v812_v51, %v811_v48  ;;  %v339_v54 = vsel %vm335_vm0, %v1228_v49, 0.0 }
  0xf3   :  { %v758_v55 = vpop.f32.mrf.mxu0  ;;  %v814_v56 = vpop.f32.mrf.mxu1  ;;  %340 = vadd.xlane.f32.xlu0 %v339_v54 }
  0xf4   :  { %v307_v57 = vadd.f32 %v813_v53, %v757_v52 }
  0xf5   :  { %v759_v58 = vpop.f32.mrf.mxu0  ;;  %v815_v59 = vpop.f32.mrf.mxu1 }
  0xf6   :  { %v760_v60 = vadd.f32 %v759_v58, %v758_v55  ;;  %v816_v61 = vadd.f32 %v815_v59, %v814_v56  ;;  %v342_v62 = vsel %vm335_vm0, %v307_v57, 0.0 }
  0xf7   :  { %v761_v63 = vpop.f32.mrf.mxu0  ;;  %v817_v0 = vpop.f32.mrf.mxu1  ;;  %343 = vadd.xlane.f32.xlu1 %v342_v62 }
  0xf8   :  { %v312_v1 = vadd.f32 %v816_v61, %v760_v60 }
  0xf9   :  { %v762_v2 = vpop.f32.mrf.mxu0  ;;  %v818_v3 = vpop.f32.mrf.mxu1 }
  0xfa   :  { %v763_v4 = vadd.f32 %v762_v2, %v761_v63  ;;  %v819_v5 = vadd.f32 %v818_v3, %v817_v0  ;;  %v345_v6 = vsel %vm335_vm0, %v312_v1, 0.0 }
  0xfb   :  { %v764_v7 = vpop.f32.mrf.mxu0  ;;  %v820_v8 = vpop.f32.mrf.mxu1  ;;  %346 = vadd.xlane.f32.xlu1 %v345_v6 }
  0xfc   :  { %v317_v9 = vadd.f32 %v819_v5, %v763_v4 }
  0xfd   :  { %v765_v10 = vpop.f32.mrf.mxu0  ;;  %v821_v11 = vpop.f32.mrf.mxu1 }
  0xfe   :  { %v766_v12 = vadd.f32 %v765_v10, %v764_v7  ;;  %v822_v13 = vadd.f32 %v821_v11, %v820_v8  ;;  %v348_v14 = vsel %vm335_vm0, %v317_v9, 0.0  ;;  %v496_v10 = vld [vmem:[%s1386_s2] sm:$0xff]  ;;  %v497_v11 = vld [vmem:[%s1386_s2 + $0x8] sm:$0xff] }
  0xff   :  { %v767_v15 = vpop.f32.mrf.mxu0  ;;  %v823_v16 = vpop.f32.mrf.mxu1  ;;  %349 = vadd.xlane.f32.xlu0 %v348_v14  ;;  %v500_v14 = vld [vmem:[%s1386_s2 + $0x20] sm:$0xff] }
 0x100   :  { %v322_v17 = vadd.f32 %v822_v13, %v766_v12  ;;  %v498_v12 = vld [vmem:[%s1386_s2 + $0x10] sm:$0xff]  ;;  %v499_v13 = vld [vmem:[%s1386_s2 + $0x18] sm:$0xff] }
 0x101   :  { %v768_v18 = vpop.f32.mrf.mxu0  ;;  %v824_v19 = vpop.f32.mrf.mxu1 }
 0x102   :  { %v769_v20 = vadd.f32 %v768_v18, %v767_v15  ;;  %v825_v21 = vadd.f32 %v824_v19, %v823_v16  ;;  %v351_v22 = vsel %vm335_vm0, %v322_v17, 0.0 }
 0x103   :  { %v770_v23 = vpop.f32.mrf.mxu0  ;;  %v826_v24 = vpop.f32.mrf.mxu1  ;;  %352 = vadd.xlane.f32.xlu1 %v351_v22 }
 0x104   :  { %v327_v25 = vadd.f32 %v825_v21, %v769_v20 }
 0x105   :  { %v771_v26 = vpop.f32.mrf.mxu0  ;;  %v827_v27 = vpop.f32.mrf.mxu1 }
 0x106   :  { %v772_v28 = vadd.f32 %v771_v26, %v770_v23  ;;  %v828_v29 = vadd.f32 %v827_v27, %v826_v24  ;;  %v354_v30 = vsel %vm335_vm0, %v327_v25, 0.0 }
 0x107   :  { %355 = vadd.xlane.f32.xlu0 %v354_v30 }
 0x108   :  { %v332_v31 = vadd.f32 %v828_v29, %v772_v28  ;;  %v416_v28 = vld [vmem:[%s1385_s1] sm:$0xff] }
 0x10a   :  { %v357_v32 = vsel %vm335_vm0, %v332_v31, 0.0 }
 0x10b   :  { %358 = vadd.xlane.f32.xlu1 %v357_v32 }
 0x178   :  { %v338_v34 = vpop.xlane.xlu0 %337 }
 0x179   :  { %v360_v35 = vmul.f32 0.03125, %v338_v34  ;;  %v417_v34 = vld [vmem:[%s1385_s1 + $0x8] sm:$0xff] }
 0x17b   :  { %v1239_v36 = vsub.f32 %v1224_v41, %v360_v35 }
 0x17c   :  { %v341_v37 = vpop.xlane.xlu0 %340 }
 0x17d   :  { %v361_v38 = vmul.f32 0.03125, %v341_v37  ;;  %v376_v39 = vmul.f32 %v1239_v36, %v1239_v36 }
 0x17f   :  { %v1244_v40 = vsub.f32 %v1228_v49, %v361_v38  ;;  %v384_v42 = vsel %vm335_vm0, %v376_v39, 0.0 }
 0x180   :  { %v344_v43 = vpop.xlane.xlu1 %343  ;;  %385 = vadd.xlane.f32.xlu0 %v384_v42 }
 0x181   :  { %v362_v44 = vmul.f32 0.03125, %v344_v43  ;;  %v377_v45 = vmul.f32 %v1244_v40, %v1244_v40  ;;  %v418_v43 = vld [vmem:[%s1385_s1 + $0x10] sm:$0xff] }
 0x183   :  { %v1249_v46 = vsub.f32 %v307_v57, %v362_v44  ;;  %v387_v41 = vsel %vm335_vm0, %v377_v45, 0.0 }
 0x184   :  { %v347_v47 = vpop.xlane.xlu1 %346  ;;  %388 = vadd.xlane.f32.xlu1 %v387_v41 }
 0x185   :  { %v363_v48 = vmul.f32 0.03125, %v347_v47  ;;  %v378_v50 = vmul.f32 %v1249_v46, %v1249_v46 }
 0x187   :  { %v1254_v49 = vsub.f32 %v312_v1, %v363_v48  ;;  %v390_v51 = vsel %vm335_vm0, %v378_v50, 0.0  ;;  %v419_v50 = vld [vmem:[%s1385_s1 + $0x18] sm:$0xff] }
 0x188   :  { %391 = vadd.xlane.f32.xlu0 %v390_v51  ;;  %v350_v52 = vpop.xlane.xlu0 %349 }
 0x189   :  { %v364_v53 = vmul.f32 0.03125, %v350_v52  ;;  %v379_v54 = vmul.f32 %v1254_v49, %v1254_v49 }
 0x18b   :  { %v1259_v55 = vsub.f32 %v317_v9, %v364_v53  ;;  %v393_v56 = vsel %vm335_vm0, %v379_v54, 0.0 }
 0x18c   :  { %v353_v57 = vpop.xlane.xlu1 %352  ;;  %394 = vadd.xlane.f32.xlu1 %v393_v56  ;;  %v420_v56 = vld [vmem:[%s1385_s1 + $0x20] sm:$0xff] }
 0x18d   :  { %v365_v58 = vmul.f32 0.03125, %v353_v57  ;;  %v380_v59 = vmul.f32 %v1259_v55, %v1259_v55 }
 0x18f   :  { %v1264_v60 = vsub.f32 %v322_v17, %v365_v58  ;;  %v396_v61 = vsel %vm335_vm0, %v380_v59, 0.0  ;;  %v421_v59 = vld [vmem:[%s1385_s1 + $0x28] sm:$0xff] }
 0x190   :  { %397 = vadd.xlane.f32.xlu0 %v396_v61  ;;  %v356_v62 = vpop.xlane.xlu0 %355 }
 0x191   :  { %v366_v63 = vmul.f32 0.03125, %v356_v62  ;;  %v381_v0 = vmul.f32 %v1264_v60, %v1264_v60  ;;  %v501_v62 = vld [vmem:[%s1386_s2 + $0x28] sm:$0xff] }
 0x193   :  { %v1269_v1 = vsub.f32 %v327_v25, %v366_v63  ;;  %v399_v2 = vsel %vm335_vm0, %v381_v0, 0.0  ;;  %v422_v0 = vld [vmem:[%s1385_s1 + $0x30] sm:$0xff] }
 0x194   :  { %v359_v3 = vpop.xlane.xlu1 %358  ;;  %400 = vadd.xlane.f32.xlu1 %v399_v2 }
 0x195   :  { %v367_v4 = vmul.f32 0.03125, %v359_v3  ;;  %v382_v5 = vmul.f32 %v1269_v1, %v1269_v1  ;;  %v502_v3 = vld [vmem:[%s1386_s2 + $0x30] sm:$0xff] }
 0x197   :  { %v1274_v6 = vsub.f32 %v332_v31, %v367_v4  ;;  %v402_v7 = vsel %vm335_vm0, %v382_v5, 0.0  ;;  %v423_v5 = vld [vmem:[%s1385_s1 + $0x38] sm:$0xff] }
 0x198   :  { %403 = vadd.xlane.f32.xlu0 %v402_v7 }
 0x199   :  { %v383_v8 = vmul.f32 %v1274_v6, %v1274_v6 }
 0x19b   :  { %v405_v9 = vsel %vm335_vm0, %v383_v8, 0.0  ;;  %v617_v8 = vld [vmem:[#allocation2] sm:$0x1] }
 0x19c   :  { %406 = vadd.xlane.f32.xlu1 %v405_v9 }
 0x1ad   :  { %506 = vperm.xlu1 %849, %v496_v10   ;;  %v616_v10 = vld [vmem:[%s1389_s5 + $0x18] sm:$0xff] }
 0x1b1   :  { %511 = vperm.xlu1 %849, %v497_v11   ;;  %v890_v11 = vmov 0.0  }
 0x1b2   :  { %834 = vmatprep.subr.mxu0 %v890_v11  ;;  %842 = vmatprep.mubr.msk.f32.mxu0 %vm891_vm1, %v890_v11 }
 0x1b3   :  { %835 = vmatpush3.msra.mxu0 %v616_v10 }
 0x1b4   :  { %836 = vmatprep.subr.mxu0 %v890_v11 }
 0x1b5   :  { %516 = vperm.xlu1 %849, %v498_v12   ;;  %v503_v12 = vld [vmem:[%s1386_s2 + $0x38] sm:$0xff] }
 0x1b9   :  { %521 = vperm.xlu1 %849, %v499_v13   ;;  %v615_v13 = vld [vmem:[%s1389_s5 + $0x10] sm:$0xff] }
 0x1ba   :  { %837 = vmatpush3.msra.mxu0 %v615_v13 }
 0x1bb   :  { %838 = vmatprep.subr.mxu0 %v890_v11 }
 0x1bd   :  { %526 = vperm.xlu1 %849, %v500_v14   ;;  %v614_v14 = vld [vmem:[%s1389_s5 + $0x8] sm:$0xff] }
 0x1be   :  { %839 = vmatpush3.msra.mxu0 %v614_v14 }
 0x1bf   :  { %840 = vmatprep.subr.mxu0 %v890_v11 }
 0x209   :  { %v386_v15 = vpop.xlane.xlu0 %385 }
 0x20a   :  { %v408_v16 = vmul.f32 0.03125, %v386_v15  ;;  %v613_v15 = vld [vmem:[%s1389_s5] sm:$0xff] }
 0x20b   :  { %841 = vmatpush3.msra.mxu0 %v613_v15 }
 0x20c   :  { %v424_v17 = vadd.f32 1e-05, %v408_v16 }
 0x20d   :  { %v389_v18 = vpop.xlane.xlu1 %388 }
 0x20e   :  { %851 = vrsqrt.f32 %v424_v17  ;;  %v409_v19 = vmul.f32 0.03125, %v389_v18 }
 0x210   :  { %v425_v20 = vadd.f32 1e-05, %v409_v19 }
 0x211   :  { %v392_v21 = vpop.xlane.xlu0 %391 }
 0x212   :  { %853 = vrsqrt.f32 %v425_v20  ;;  %v410_v22 = vmul.f32 0.03125, %v392_v21 }
 0x214   :  { %v426_v23 = vadd.f32 1e-05, %v410_v22 }
 0x215   :  { %v395_v24 = vpop.xlane.xlu1 %394 }
 0x216   :  { %855 = vrsqrt.f32 %v426_v23  ;;  %v411_v25 = vmul.f32 0.03125, %v395_v24 }
 0x218   :  { %v427_v26 = vadd.f32 1e-05, %v411_v25 }
 0x219   :  { %v398_v27 = vpop.xlane.xlu0 %397 }
 0x21a   :  { %857 = vrsqrt.f32 %v427_v26  ;;  %v412_v29 = vmul.f32 0.03125, %v398_v27 }
 0x21b   :  { %v852_v30 = vpop.eup %851 }
 0x21c   :  { %v428_v31 = vadd.f32 1e-05, %v412_v29  ;;  %v440_v32 = vmul.f32 %v852_v30, %v416_v28 }
 0x21d   :  { %v401_v33 = vpop.xlane.xlu1 %400 }
 0x21e   :  { %859 = vrsqrt.f32 %v428_v31  ;;  %v413_v35 = vmul.f32 0.03125, %v401_v33  ;;  %450 = vperm.xlu0 %850, %v440_v32  }
 0x21f   :  { %v854_v37 = vpop.eup %853 }
 0x220   :  { %v429_v38 = vadd.f32 1e-05, %v413_v35  ;;  %v441_v39 = vmul.f32 %v854_v37, %v417_v34 }
 0x221   :  { %v404_v42 = vpop.xlane.xlu0 %403 }
 0x222   :  { %861 = vrsqrt.f32 %v429_v38  ;;  %v414_v44 = vmul.f32 0.03125, %v404_v42  ;;  %455 = vperm.xlu1 %849, %v441_v39  }
 0x223   :  { %v856_v45 = vpop.eup %855 }
 0x224   :  { %v430_v41 = vadd.f32 1e-05, %v414_v44  ;;  %v442_v47 = vmul.f32 %v856_v45, %v418_v43  ;;  %v576_v43 = vld [vmem:[%s1388_s4] sm:$0xff] }
 0x225   :  { %v407_v48 = vpop.xlane.xlu1 %406 }
 0x226   :  { %863 = vrsqrt.f32 %v430_v41  ;;  %v415_v51 = vmul.f32 0.03125, %v407_v48  ;;  %460 = vperm.xlu1 %849, %v442_v47  }
 0x227   :  { %v858_v52 = vpop.eup %857 }
 0x228   :  { %v431_v53 = vadd.f32 1e-05, %v415_v51  ;;  %v443_v54 = vmul.f32 %v858_v52, %v419_v50  ;;  %v579_v50 = vld [vmem:[%s1388_s4 + $0x18] sm:$0xff] }
 0x229   :  { %v507_v16 = vpop.permute.xlu1 %506 }
 0x22a   :  { %865 = vrsqrt.f32 %v431_v53  ;;  %465 = vperm.xlu1 %849, %v443_v54  }
 0x22b   :  { %v860_v57 = vpop.eup %859 }
 0x22c   :  { %v444_v58 = vmul.f32 %v860_v57, %v420_v56  ;;  %v580_v57 = vld [vmem:[%s1388_s4 + $0x20] sm:$0xff] }
 0x22d   :  { %v512_v17 = vpop.permute.xlu1 %511 }
 0x22e   :  { %470 = vperm.xlu1 %849, %v444_v58  }
 0x22f   :  { %v862_v61 = vpop.eup %861 }
 0x230   :  { %v445_v63 = vmul.f32 %v862_v61, %v421_v59 }
 0x231   :  { %v517_v18 = vpop.permute.xlu1 %516 }
 0x232   :  { %475 = vperm.xlu0 %850, %v445_v63   ;;  %531 = vperm.xlu1 %849, %v501_v62  }
 0x233   :  { %v864_v2 = vpop.eup %863 }
 0x234   :  { %v446_v4 = vmul.f32 %v864_v2, %v422_v0  ;;  %v581_v0 = vld [vmem:[%s1388_s4 + $0x28] sm:$0xff] }
 0x235   :  { %v522_v19 = vpop.permute.xlu1 %521 }
 0x236   :  { %536 = vperm.xlu1 %849, %v502_v3   ;;  %480 = vperm.xlu0 %850, %v446_v4  }
 0x237   :  { %v866_v7 = vpop.eup %865 }
 0x238   :  { %v447_v9 = vmul.f32 %v866_v7, %v423_v5 }
 0x239   :  { %v527_v20 = vpop.permute.xlu1 %526 }
 0x23a   :  { %620 = vperm.xlu1 %849, %v617_v8   ;;  %485 = vperm.xlu0 %850, %v447_v9  }
 0x23e   :  { %541 = vperm.xlu0 %850, %v503_v12  }
 0x299   :  { %v451_v22 = vpop.permute.xlu0 %450 }
 0x29a   :  { %v488_v25 = vmul.f32 %v451_v22, %v1239_v36  ;;  %v577_v36 = vld [vmem:[%s1388_s4 + $0x8] sm:$0xff] }
 0x29c   :  { %v544_v29 = vadd.f32 %v507_v16, %v488_v25 }
 0x29d   :  { %v456_v21 = vpop.permute.xlu1 %455 }
 0x29e   :  { %v489_v23 = vmul.f32 %v456_v21, %v1244_v40  ;;  %v560_v35 = vmul.f32 0.2, %v544_v29  ;;  %vm552_vm3 = vcmp.gt.f32.partialorder %v544_v29, 0.0 }
 0x2a0   :  { %v545_v27 = vadd.f32 %v512_v17, %v489_v23  ;;  %v568_v44 = vsel %vm552_vm3, %v544_v29, %v560_v35  ;;  %v583_v23 = vld [vmem:[%s1388_s4 + $0x38] sm:$0xff] }
 0x2a1   :  { %v461_v24 = vpop.permute.xlu1 %460  ;;  %v584_v53 = vmul.f32 %v576_v43, %v568_v44 }
 0x2a2   :  { %v490_v26 = vmul.f32 %v461_v24, %v1249_v46  ;;  %v561_v32 = vmul.f32 0.2, %v545_v27  ;;  %vm553_vm2 = vcmp.gt.f32.partialorder %v545_v27, 0.0 }
 0x2a3   :  { %v592_v4 = vsel %vm335_vm0, %v584_v53, 0.0 }
 0x2a4   :  { %v546_v30 = vadd.f32 %v517_v18, %v490_v26  ;;  %v569_v40 = vsel %vm553_vm2, %v545_v27, %v561_v32 }
 0x2a5   :  { %v466_v28 = vpop.permute.xlu1 %465  ;;  %v585_v48 = vmul.f32 %v577_v36, %v569_v40 }
 0x2a6   :  { %v491_v31 = vmul.f32 %v466_v28, %v1254_v49  ;;  %v562_v37 = vmul.f32 0.2, %v546_v30  ;;  %vm554_vm4 = vcmp.gt.f32.partialorder %v546_v30, 0.0 }
 0x2a7   :  { %v593_v61 = vsel %vm335_vm0, %v585_v48, 0.0 }
 0x2a8   :  { %v547_v33 = vadd.f32 %v522_v19, %v491_v31  ;;  %v570_v45 = vsel %vm554_vm4, %v546_v30, %v562_v37  ;;  %v594_v9 = vadd.f32 %v593_v61, %v592_v4 }
 0x2a9   :  { %v471_v34 = vpop.permute.xlu1 %470 }
 0x2aa   :  { %v492_v38 = vmul.f32 %v471_v34, %v1259_v55  ;;  %v563_v46 = vmul.f32 0.2, %v547_v33  ;;  %vm555_vm5 = vcmp.gt.f32.partialorder %v547_v33, 0.0  ;;  %v578_v55 = vld [vmem:[%s1388_s4 + $0x10] sm:$0xff] }
 0x2ab   :  { %v586_v54 = vmul.f32 %v578_v55, %v570_v45 }
 0x2ac   :  { %v548_v39 = vadd.f32 %v527_v20, %v492_v38  ;;  %v571_v51 = vsel %vm555_vm5, %v547_v33, %v563_v46  ;;  %v623_v38 = vlaneseq }
 0x2ad   :  { %v532_v42 = vpop.permute.xlu1 %531  ;;  %v476_v49 = vpop.permute.xlu0 %475  ;;  %v587_v62 = vmul.f32 %v579_v50, %v571_v51  ;;  %v595_v5 = vsel %vm335_vm0, %v586_v54, 0.0 }
 0x2ae   :  { %v564_v41 = vmul.f32 0.2, %v548_v39  ;;  %v493_v47 = vmul.f32 %v476_v49, %v1264_v60  ;;  %vm556_vm6 = vcmp.gt.f32.partialorder %v548_v39, 0.0  ;;  %v596_v13 = vadd.f32 %v595_v5, %v594_v9 }
 0x2af   :  { %v597_v11 = vsel %vm335_vm0, %v587_v62, 0.0  ;;  %v624_v36 = vshrl.u32 %v623_v38, 7 }
 0x2b0   :  { %v549_v52 = vadd.f32 %v532_v42, %v493_v47  ;;  %v572_v58 = vsel %vm556_vm6, %v548_v39, %v564_v41  ;;  %v598_v19 = vadd.f32 %v597_v11, %v596_v13 }
 0x2b1   :  { %v481_v56 = vpop.permute.xlu0 %480  ;;  %v537_v63 = vpop.permute.xlu1 %536  ;;  %v588_v7 = vmul.f32 %v580_v57, %v572_v58  ;;  %v625_v40 = vsub.s32 0, %v624_v36 }
 0x2b2   :  { %vm557_vm7 = vcmp.gt.f32.partialorder %v549_v52, 0.0  ;;  %v565_v59 = vmul.f32 0.2, %v549_v52  ;;  %v494_v60 = vmul.f32 %v481_v56, %v1269_v1  ;;  %v582_v1 = vld [vmem:[%s1388_s4 + $0x30] sm:$0xff]  ;;  %s892_s4 = smov [#allocation3]  }
 0x2b3   :  { %v599_v16 = vsel %vm335_vm0, %v588_v7, 0.0  ;;  %s708_s23 = sshll.u32 %s892_s4, 4  ;;  %s709_s23 = int_to_ptr.vmem [resolvable:$true] %s708_s23 }
 0x2b4   :  { %v573_v2 = vsel %vm557_vm7, %v549_v52, %v565_v59  ;;  %v550_v3 = vadd.f32 %v537_v63, %v494_v60  ;;  %v600_v22 = vadd.f32 %v599_v16, %v598_v19  ;;  %s867_s24 = scalar_lea.vmem %s709_s23, 16  ;;  %s871_s25 = scalar_lea.vmem %s709_s23, 32 }
 0x2b5   :  { %v486_v8 = vpop.permute.xlu0 %485  ;;  %v589_v12 = vmul.f32 %v581_v0, %v573_v2  ;;  %v621_v46 = vpop.permute.xlu1 %620  ;;  %p868_p0 = scmp.ne.s32.totalorder %s709_s23, %s867_s24  ;;  %p872_p1 = scmp.lt.s32.totalorder %s709_s23, %s709_s23 }
 0x2b6   :  { %vm558_vm8 = vcmp.gt.f32.partialorder %v550_v3, 0.0  ;;  %v566_v10 = vmul.f32 0.2, %v550_v3  ;;  %v495_v15 = vmul.f32 %v486_v8, %v1274_v6  ;;  %v626_v39 = vrot.slane %v621_v46, %v625_v40  ;;  %p873_p2 = scmp.lt.s32.totalorder %s871_s25, %s867_s24 }
 0x2b7   :  { %v601_v21 = vsel %vm335_vm0, %v589_v12, 0.0 }
 0x2b8   :  { %v574_v14 = vsel %vm558_vm8, %v550_v3, %v566_v10  ;;  %v602_v26 = vadd.f32 %v601_v21, %v600_v22  ;;  %p874_p3 = por %p873_p2, %p872_p1 }
 0x2b9   :  { %v590_v17 = vmul.f32 %v582_v1, %v574_v14  ;;  %v542_v18 = vpop.permute.xlu0 %541 }
 0x2ba   :  { %v551_v20 = vadd.f32 %v542_v18, %v495_v15  ;;  %p875_p4 = pnand %p874_p3, %p868_p0 }
 0x2bb   :  { %v603_v25 = vsel %vm335_vm0, %v590_v17, 0.0 }
 0x2bc   :  { %vm559_vm9 = vcmp.gt.f32.partialorder %v551_v20, 0.0  ;;  %v567_v24 = vmul.f32 0.2, %v551_v20  ;;  %v604_v28 = vadd.f32 %v603_v25, %v602_v26 }
 0x2be   :  { %v575_v27 = vsel %vm559_vm9, %v551_v20, %v567_v24 }
 0x2bf   :  { %v591_v6 = vmul.f32 %v583_v23, %v575_v27 }
 0x2c1   :  { %v605_v29 = vsel %vm335_vm0, %v591_v6, 0.0 }
 0x2c2   :  { %v606_v30 = vadd.f32 %v605_v29, %v604_v28 }
 0x2c4   :  { %v607_v31 = vrot.slane %v606_v30, 4 }
 0x2c6   :  { %v608_v32 = vadd.f32 %v607_v31, %v606_v30 }
 0x2c8   :  { %v609_v33 = vrot.slane %v608_v32, 2 }
 0x2ca   :  { %v610_v34 = vadd.f32 %v609_v33, %v608_v32 }
 0x2cc   :  { %v611_v35 = vrot.slane %v610_v34, 1 }
 0x2ce   :  { %v612_v37 = vadd.f32 %v611_v35, %v610_v34 }
 0x2d0   :  { %843 = vmatmul.mubr.msk.f32.vlgmr.msra.gmra.mxu0 %vm335_vm0, %v612_v37 }
 0x390   :  { %v696_v42 = vpop.f32.mrf.mxu0 }
 0x391   :  { %v697_v49 = vadd.f32 %v696_v42, %v626_v39 }
 0x392   :  { %v844_v43 = vpop.f32.mrf.mxu0 }
 0x393   :  { %701 = vst.msk [vmem:[#allocation3] sm:$0x1] %vm700_vm10, %v697_v49 }
 0x394   :  { %878 = shalt.err (!%p875_p4)
}
 0x395   :  { %711 = dma.vmem_to_hbm [thread:$0]  %s709_s23, 16, %s1391_s7, [#allocation4]  }
 0x396   :  { %887 = dma.done.wait [#allocation4], 16  }
 0x397   :  { %888 = vsyncadd [#allocation4], 4294967280 }
 0x398   :  { %715 = vsyncpa [#allocation4], 1 }

</bundles_post_ra>
